<compile_context>
chip_gen: v6e
topology: v6e:2x2x1
jax: 0.10.0
libtpu: 0.0.40
codegen_flags: <defaults>
</compile_context>

<pallas_src>
import functools

import jax
import jax.numpy as jnp
from jax.experimental import pallas as pl
from jax.experimental.pallas import tpu as pltpu


def _round_up(x, m):
    return (x + m - 1) // m * m


def _pick_row_tile(H, cap=32):
    """Row-tile height: prefer a divisor of H (multiple of 8, <= cap, giving >= 2 tiles);
    otherwise fall back to `cap` with a masked tail (grid = cdiv(H, TH))."""
    best = 0
    for th in range(8, min(cap, H // 2) + 1, 8):
        if H % th == 0:
            best = th
    if best:
        return best
    return min(cap, H)


def _vmem_limit_bytes(TH, W, K1, Cmid, Cout):
    """Scoped-VMEM request computed from the actual per-step buffers (+2x headroom)."""
    def tile_bytes(shape, itemsize):
        s = list(shape)
        s[-1] = _round_up(s[-1], 128)            # lane padding
        if len(s) >= 2:
            s[-2] = _round_up(s[-2], 8)          # sublane padding
        n = 1
        for d in s:
            n *= d
        return n * itemsize

    est = (
        2 * tile_bytes((TH + 2, W + 2, K1), 2)        # input slab (double-buffered, bf16)
        + 2 * tile_bytes((TH, W, Cout), 2)            # output tile (double-buffered, bf16)
        + tile_bytes((K1, Cmid), 2)                   # conv1 weights
        + 9 * tile_bytes((Cmid, Cout), 2)             # conv2 weights
        + tile_bytes((1, Cmid), 4) + tile_bytes((1, Cout), 4)
        + tile_bytes((TH + 2, W + 2, Cmid), 2)        # mid scratch (bf16)
        + 2 * tile_bytes((TH + 2, W + 2, Cmid), 4)    # conv1 f32 activation temporaries
        + 2 * tile_bytes((TH, W, Cout), 4)            # conv2 f32 accumulator temporaries
    )
    return max(32 << 20, min(100 << 20, 2 * est))


def _double_conv_kernel(xp_ref, w1_ref, t1_ref, w2_ref, t2_ref, o_ref, mid_ref, *, valid_h):
    # xp_ref:  (TH+2, W+2, 9*Cin) bf16  im2col patches for intermediate rows r*TH-1 .. r*TH+TH
    # w1_ref:  (9*Cin, Cmid)      bf16  BN-scale-folded conv1 weights (im2col layout)
    # t1_ref:  (1, Cmid)          f32   folded bias / BN shift
    # w2_ref:  (3, 3, Cmid, Cout) bf16  BN-scale-folded conv2 weights (per-tap, K = Cmid)
    # t2_ref:  (1, Cout)          f32
    # o_ref:   (TH, W, Cout)      bf16  output row tile (no channel padding)
    # mid_ref: (TH+2, W+2, Cmid)  bf16  zero-bordered intermediate activation scratch
    TH, W, _ = o_ref.shape
    r = pl.program_id(1)

    # ---- conv1 + BN + ReLU: one im2col matmul => a single MXU accumulation pass ----
    a1 = jax.lax.dot_general(
        xp_ref[...], w1_ref[...], (((2,), (0,)), ((), ())),
        preferred_element_type=jnp.float32)                       # (TH+2, W+2, Cmid)
    a1 = jnp.maximum(a1 + t1_ref[...], 0.0)
    # Dropout2d: identity in eval mode.

    # Zero everything outside the real image: those positions are conv2's zero padding
    # (image border) or masked-tail rows.  One vectorized select replaces the per-iteration
    # border-column stores and the pl.when halo-row stores.
    row = r * TH + jax.lax.broadcasted_iota(jnp.int32, (TH + 2, W + 2, 1), 0) - 1
    col = jax.lax.broadcasted_iota(jnp.int32, (TH + 2, W + 2, 1), 1) - 1
    valid = (row >= 0) & (row < valid_h) & (col >= 0) & (col < W)
    mid_ref[...] = jnp.where(valid, a1, 0.0).astype(mid_ref.dtype)

    # ---- conv2 + BN + ReLU: 9 per-tap K=Cmid matmuls reading straight from the scratch ----
    # (no materialized im2col buffer, no K zero-padding; adds pipeline behind the MXU pushes)
    acc = None
    for kh in range(3):
        for kw in range(3):
            tap = mid_ref[kh:kh + TH, kw:kw + W, :]               # (TH, W, Cmid) bf16
            d = jax.lax.dot_general(
                tap, w2_ref[kh, kw], (((2,), (0,)), ((), ())),
                preferred_element_type=jnp.float32)               # (TH, W, Cout)
            acc = d if acc is None else acc + d
    o_ref[...] = jnp.maximum(acc + t2_ref[...], 0.0).astype(o_ref.dtype)


def double_conv_pallas(x_nchw, params):
    """x_nchw: (N, Cin, H, W) float32. Returns (N, Cout, H, W) float32 (eval mode)."""
    w1, b1, g1, beta1, m1, v1, w2, b2, g2, beta2, m2, v2 = params
    eps = 1e-5

    N, Cin, H, W = x_nchw.shape
    Cmid = w1.shape[0]
    Cout = w2.shape[0]
    K1 = 9 * Cin

    TH = _pick_row_tile(H)
    R = (H + TH - 1) // TH
    H_pad = R * TH

    # ---- BN (eval) + bias folding: y*s + (beta + s*(b - m)), s = g/sqrt(v+eps) ----
    s1 = g1 / jnp.sqrt(v1 + eps)
    t1 = beta1 + s1 * (b1 - m1)
    s2 = g2 / jnp.sqrt(v2 + eps)
    t2 = beta2 + s2 * (b2 - m2)

    # conv1 weights: OIHW -> (kh, kw, Cin, Cmid), scale-fold, flatten to im2col (9*Cin, Cmid).
    w1m = (jnp.transpose(w1, (2, 3, 1, 0)) * s1[None, None, None, :]
           ).reshape(K1, Cmid).astype(jnp.bfloat16)
    # conv2 weights: OIHW -> (kh, kw, Cmid, Cout), scale-fold; per-tap K = Cmid (no padding).
    w2m = (jnp.transpose(w2, (2, 3, 1, 0)) * s2[None, None, None, :]).astype(jnp.bfloat16)
    t1m = t1.reshape(1, Cmid).astype(jnp.float32)
    t2m = t2.reshape(1, Cout).astype(jnp.float32)

    # ---- input im2col (lane dim = 9*Cin) + per-tile row slabs (layout glue, fused by XLA) ----
    x_nhwc = jnp.transpose(x_nchw, (0, 2, 3, 1)).astype(jnp.bfloat16)
    xp = jnp.pad(x_nhwc, ((0, 0), (1, 1), (2, 2), (0, 0)))        # 1-row / 2-col conv halo
    patches = jnp.concatenate(
        [xp[:, kh:kh + H, kw:kw + W + 2, :] for kh in range(3) for kw in range(3)], axis=-1)
    # (N, H, W+2, 9*Cin): row i / col j hold the 3x3 patch of intermediate row i, image col j-1.
    # Zero patch rows above/below the image (conv2 halo) and for the masked tail rows.
    patches = jnp.pad(patches, ((0, 0), (1, H_pad - H + 1), (0, 0), (0, 0)))
    # Pre-slab TH+2-row tiles (2-row overlap) so each grid step DMAs one bounded, disjoint block.
    slabs = jnp.stack([patches[:, r * TH: r * TH + TH + 2] for r in range(R)], axis=1)
    slabs = slabs.reshape(N * R, TH + 2, W + 2, K1)

    def _const_spec(shape):
        idx = lambda n, r: (0,) * len(shape)
        try:
            # constant index map -> single-buffered (no point double-buffering weights)
            return pl.BlockSpec(shape, idx, pipeline_mode=pl.Buffered(1))
        except (TypeError, AttributeError):
            return pl.BlockSpec(shape, idx)

    kernel = functools.partial(_double_conv_kernel, valid_h=H)

    out_nhwc = pl.pallas_call(
        kernel,
        out_shape=jax.ShapeDtypeStruct((N, H_pad, W, Cout), jnp.bfloat16),
        grid_spec=pltpu.PrefetchScalarGridSpec(
            num_scalar_prefetch=0,
            grid=(N, R),
            in_specs=[
                pl.BlockSpec((None, TH + 2, W + 2, K1), lambda n, r: (n * R + r, 0, 0, 0)),
                _const_spec((K1, Cmid)),
                _const_spec((1, Cmid)),
                _const_spec((3, 3, Cmid, Cout)),
                _const_spec((1, Cout)),
            ],
            out_specs=pl.BlockSpec((None, TH, W, Cout), lambda n, r: (n, r, 0, 0)),
            scratch_shapes=[pltpu.VMEM((TH + 2, W + 2, Cmid), jnp.bfloat16)],
        ),
        compiler_params=pltpu.CompilerParams(
            dimension_semantics=("parallel", "parallel"),
            vmem_limit_bytes=_vmem_limit_bytes(TH, W, K1, Cmid, Cout)),
    )(slabs, w1m, t1m, w2m, t2m)

    # strip the masked-tail rows, cast back to f32, back to NCHW
    return jnp.transpose(out_nhwc[:, :H].astype(jnp.float32), (0, 3, 1, 2))


def double_conv_ref(x_nchw, params):
    """Pure-JAX f32 reference (eval-mode DoubleConv) for the correctness check."""
    w1, b1, g1, beta1, m1, v1, w2, b2, g2, beta2, m2, v2 = params
    eps = 1e-5

    def conv(x, w, b):
        y = jax.lax.conv_general_dilated(
            x, w, window_strides=(1, 1), padding=((1, 1), (1, 1)),
            dimension_numbers=('NCHW', 'OIHW', 'NCHW'))
        return y + b[None, :, None, None]

    def bn(x, g, beta, m, v):
        return (x - m[None, :, None, None]) / jnp.sqrt(v[None, :, None, None] + eps) \
            * g[None, :, None, None] + beta[None, :, None, None]

    h = jax.nn.relu(bn(conv(x_nchw, w1, b1), g1, beta1, m1, v1))
    return jax.nn.relu(bn(conv(h, w2, b2), g2, beta2, m2, v2))


if __name__ == "__main__":
    N, Cin, Cout, H, W = 2, 4, 8, 16, 16

    key = jax.random.PRNGKey(0)
    keys = jax.random.split(key, 9)

    # Deterministic synthetic parameters (shapes follow nn.Conv2d / nn.BatchNorm2d).
    w1 = jax.random.normal(keys[0], (Cout, Cin, 3, 3), jnp.float32) * 0.1
    b1 = jax.random.normal(keys[1], (Cout,), jnp.float32) * 0.1
    g1 = 1.0 + 0.1 * jax.random.normal(keys[2], (Cout,), jnp.float32)
    beta1 = 0.1 * jax.random.normal(keys[3], (Cout,), jnp.float32)
    m1 = 0.05 * jnp.arange(Cout, dtype=jnp.float32)
    v1 = 1.0 + 0.02 * jnp.arange(Cout, dtype=jnp.float32)

    w2 = jax.random.normal(keys[4], (Cout, Cout, 3, 3), jnp.float32) * 0.1
    b2 = jax.random.normal(keys[5], (Cout,), jnp.float32) * 0.1
    g2 = 1.0 + 0.1 * jax.random.normal(keys[6], (Cout,), jnp.float32)
    beta2 = 0.1 * jax.random.normal(keys[7], (Cout,), jnp.float32)
    m2 = 0.03 * jnp.arange(Cout, dtype=jnp.float32)
    v2 = 1.0 + 0.01 * jnp.arange(Cout, dtype=jnp.float32)

    params = (w1, b1, g1, beta1, m1, v1, w2, b2, g2, beta2, m2, v2)

    x = jax.random.normal(keys[8], (N, Cin, H, W), jnp.float32)

    out = jax.block_until_ready(double_conv_pallas(x, params))
    ref = double_conv_ref(x, params)

    assert out.shape == (N, Cout, H, W)
    max_err = jnp.max(jnp.abs(out - ref))
    # bf16 matmul operands + bf16 output store (f32 accumulation): tolerance reflects bf16 rounding.
    assert jnp.allclose(out, ref, atol=7e-2, rtol=7e-2), f"max abs err = {max_err}"

    print("KERNEL_OK")
</pallas_src>

<mosaic_0001>
module attributes {stable_mosaic.version = 11 : i64} {
  func.func @_double_conv_kernel(%arg0: i32, %arg1: i32, %arg2: memref<1x10x18x36xbf16, #tpu.memory_space<vmem>>, %arg3: memref<36x8xbf16, #tpu.memory_space<vmem>>, %arg4: memref<1x8xf32, #tpu.memory_space<vmem>>, %arg5: memref<3x3x8x8xbf16, #tpu.memory_space<vmem>>, %arg6: memref<1x8xf32, #tpu.memory_space<vmem>>, %arg7: memref<1x8x16x8xbf16, #tpu.memory_space<vmem>>, %arg8: memref<10x18x8xbf16, #tpu.memory_space<vmem>>) attributes {dimension_semantics = [#tpu.dimension_semantics<parallel>, #tpu.dimension_semantics<parallel>], iteration_bounds = array<i64: 2, 2>, scalar_prefetch = 0 : i64, scratch_operands = 1 : i64, tpu.core_type = #tpu.core_type<tc>, window_params = [{transform_indices = @transform_0, window_bounds = array<i64: 1, 10, 18, 36>}, {pipeline_mode = #tpu.pipeline_mode<synchronous>, transform_indices = @transform_1, window_bounds = array<i64: 36, 8>}, {pipeline_mode = #tpu.pipeline_mode<synchronous>, transform_indices = @transform_2, window_bounds = array<i64: 1, 8>}, {pipeline_mode = #tpu.pipeline_mode<synchronous>, transform_indices = @transform_3, window_bounds = array<i64: 3, 3, 8, 8>}, {pipeline_mode = #tpu.pipeline_mode<synchronous>, transform_indices = @transform_4, window_bounds = array<i64: 1, 8>}, {transform_indices = @transform_5, window_bounds = array<i64: 1, 8, 16, 8>}]} {
    %c0 = arith.constant 0 : index
    %c0_0 = arith.constant 0 : index
    %c0_1 = arith.constant 0 : index
    %c0_2 = arith.constant 0 : index
    %0 = vector.load %arg2[%c0, %c0_0, %c0_1, %c0_2] : memref<1x10x18x36xbf16, #tpu.memory_space<vmem>>, vector<1x10x18x36xbf16>
    %1 = vector.shape_cast %0 : vector<1x10x18x36xbf16> to vector<10x18x36xbf16>
    %c0_3 = arith.constant 0 : index
    %c0_4 = arith.constant 0 : index
    %2 = vector.load %arg3[%c0_3, %c0_4] : memref<36x8xbf16, #tpu.memory_space<vmem>>, vector<36x8xbf16>
    %cst = arith.constant dense<0.000000e+00> : vector<10x18x8xf32>
    %3 = tpu.matmul %1, %2, %cst {dimension_numbers = #tpu.dot_dimension_numbers<[2], [0], [0, 1], [1], [0, 0, 0, 1, 1, 1], [], []>} : vector<10x18x36xbf16>, vector<36x8xbf16>, vector<10x18x8xf32> -> vector<10x18x8xf32>
    %c0_5 = arith.constant 0 : index
    %c0_6 = arith.constant 0 : index
    %4 = vector.load %arg4[%c0_5, %c0_6] : memref<1x8xf32, #tpu.memory_space<vmem>>, vector<1x8xf32>
    %5 = vector.shape_cast %4 : vector<1x8xf32> to vector<1x1x8xf32>
    %6 = vector.broadcast %5 : vector<1x1x8xf32> to vector<10x18x8xf32>
    %7 = arith.addf %3, %6 : vector<10x18x8xf32>
    %cst_7 = arith.constant 0.000000e+00 : f32
    %8 = vector.broadcast %cst_7 : f32 to vector<10x18x8xf32>
    %9 = arith.maximumf %7, %8 : vector<10x18x8xf32>
    %c8_i32 = arith.constant 8 : i32
    %10 = arith.muli %arg1, %c8_i32 : i32
    %11 = tpu.iota {dimensions = array<i32: 0>} : vector<10x18x1xi32>
    %12 = vector.broadcast %10 : i32 to vector<10x18x1xi32>
    %13 = arith.addi %12, %11 : vector<10x18x1xi32>
    %c1_i32 = arith.constant 1 : i32
    %14 = vector.broadcast %c1_i32 : i32 to vector<10x18x1xi32>
    %15 = arith.subi %13, %14 : vector<10x18x1xi32>
    %16 = tpu.iota {dimensions = array<i32: 1>} : vector<10x18x1xi32>
    %c1_i32_8 = arith.constant 1 : i32
    %17 = vector.broadcast %c1_i32_8 : i32 to vector<10x18x1xi32>
    %18 = arith.subi %16, %17 : vector<10x18x1xi32>
    %c0_i32 = arith.constant 0 : i32
    %19 = vector.broadcast %c0_i32 : i32 to vector<10x18x1xi32>
    %20 = arith.cmpi sge, %15, %19 : vector<10x18x1xi32>
    %c16_i32 = arith.constant 16 : i32
    %21 = vector.broadcast %c16_i32 : i32 to vector<10x18x1xi32>
    %22 = arith.cmpi slt, %15, %21 : vector<10x18x1xi32>
    %23 = arith.andi %20, %22 : vector<10x18x1xi1>
    %c0_i32_9 = arith.constant 0 : i32
    %24 = vector.broadcast %c0_i32_9 : i32 to vector<10x18x1xi32>
    %25 = arith.cmpi sge, %18, %24 : vector<10x18x1xi32>
    %26 = arith.andi %23, %25 : vector<10x18x1xi1>
    %c16_i32_10 = arith.constant 16 : i32
    %27 = vector.broadcast %c16_i32_10 : i32 to vector<10x18x1xi32>
    %28 = arith.cmpi slt, %18, %27 : vector<10x18x1xi32>
    %29 = arith.andi %26, %28 : vector<10x18x1xi1>
    %cst_11 = arith.constant 0.000000e+00 : f32
    %30 = vector.shape_cast %29 : vector<10x18x1xi1> to vector<10x18x1xi1>
    %31 = vector.broadcast %30 : vector<10x18x1xi1> to vector<10x18x8xi1>
    %32 = vector.broadcast %cst_11 : f32 to vector<10x18x8xf32>
    %33 = arith.select %31, %9, %32 : vector<10x18x8xi1>, vector<10x18x8xf32>
    %34 = arith.truncf %33 : vector<10x18x8xf32> to vector<10x18x8xbf16>
    %c0_12 = arith.constant 0 : index
    %c0_13 = arith.constant 0 : index
    %c0_14 = arith.constant 0 : index
    %35 = vector.load %arg8[%c0_12, %c0_13, %c0_14] : memref<10x18x8xbf16, #tpu.memory_space<vmem>>, vector<10x18x8xbf16>
    tpu.vector_store %arg8[%c0_12, %c0_13, %c0_14], %34 {strides = array<i32>} : memref<10x18x8xbf16, #tpu.memory_space<vmem>>, vector<10x18x8xbf16>,
    %c0_15 = arith.constant 0 : index
    %c0_16 = arith.constant 0 : index
    %c0_17 = arith.constant 0 : index
    %36 = vector.load %arg8[%c0_15, %c0_16, %c0_17] : memref<10x18x8xbf16, #tpu.memory_space<vmem>>, vector<8x16x8xbf16>
    %c0_18 = arith.constant 0 : index
    %c0_19 = arith.constant 0 : index
    %c0_20 = arith.constant 0 : index
    %c0_21 = arith.constant 0 : index
    %37 = vector.load %arg5[%c0_18, %c0_19, %c0_20, %c0_21] : memref<3x3x8x8xbf16, #tpu.memory_space<vmem>>, vector<1x1x8x8xbf16>
    %38 = vector.shape_cast %37 : vector<1x1x8x8xbf16> to vector<8x8xbf16>
    %cst_22 = arith.constant dense<0.000000e+00> : vector<8x16x8xf32>
    %39 = tpu.matmul %36, %38, %cst_22 {dimension_numbers = #tpu.dot_dimension_numbers<[2], [0], [0, 1], [1], [0, 0, 0, 1, 1, 1], [], []>} : vector<8x16x8xbf16>, vector<8x8xbf16>, vector<8x16x8xf32> -> vector<8x16x8xf32>
    %c0_23 = arith.constant 0 : index
    %c1 = arith.constant 1 : index
    %c0_24 = arith.constant 0 : index
    %40 = vector.load %arg8[%c0_23, %c1, %c0_24] : memref<10x18x8xbf16, #tpu.memory_space<vmem>>, vector<8x16x8xbf16>
    %c0_25 = arith.constant 0 : index
    %c1_26 = arith.constant 1 : index
    %c0_27 = arith.constant 0 : index
    %c0_28 = arith.constant 0 : index
    %41 = vector.load %arg5[%c0_25, %c1_26, %c0_27, %c0_28] : memref<3x3x8x8xbf16, #tpu.memory_space<vmem>>, vector<1x1x8x8xbf16>
    %42 = vector.shape_cast %41 : vector<1x1x8x8xbf16> to vector<8x8xbf16>
    %cst_29 = arith.constant dense<0.000000e+00> : vector<8x16x8xf32>
    %43 = tpu.matmul %40, %42, %cst_29 {dimension_numbers = #tpu.dot_dimension_numbers<[2], [0], [0, 1], [1], [0, 0, 0, 1, 1, 1], [], []>} : vector<8x16x8xbf16>, vector<8x8xbf16>, vector<8x16x8xf32> -> vector<8x16x8xf32>
    %44 = arith.addf %39, %43 : vector<8x16x8xf32>
    %c0_30 = arith.constant 0 : index
    %c2 = arith.constant 2 : index
    %c0_31 = arith.constant 0 : index
    %45 = vector.load %arg8[%c0_30, %c2, %c0_31] : memref<10x18x8xbf16, #tpu.memory_space<vmem>>, vector<8x16x8xbf16>
    %c0_32 = arith.constant 0 : index
    %c2_33 = arith.constant 2 : index
    %c0_34 = arith.constant 0 : index
    %c0_35 = arith.constant 0 : index
    %46 = vector.load %arg5[%c0_32, %c2_33, %c0_34, %c0_35] : memref<3x3x8x8xbf16, #tpu.memory_space<vmem>>, vector<1x1x8x8xbf16>
    %47 = vector.shape_cast %46 : vector<1x1x8x8xbf16> to vector<8x8xbf16>
    %cst_36 = arith.constant dense<0.000000e+00> : vector<8x16x8xf32>
    %48 = tpu.matmul %45, %47, %cst_36 {dimension_numbers = #tpu.dot_dimension_numbers<[2], [0], [0, 1], [1], [0, 0, 0, 1, 1, 1], [], []>} : vector<8x16x8xbf16>, vector<8x8xbf16>, vector<8x16x8xf32> -> vector<8x16x8xf32>
    %49 = arith.addf %44, %48 : vector<8x16x8xf32>
    %c1_37 = arith.constant 1 : index
    %c0_38 = arith.constant 0 : index
    %c0_39 = arith.constant 0 : index
    %50 = vector.load %arg8[%c1_37, %c0_38, %c0_39] : memref<10x18x8xbf16, #tpu.memory_space<vmem>>, vector<8x16x8xbf16>
    %c1_40 = arith.constant 1 : index
    %c0_41 = arith.constant 0 : index
    %c0_42 = arith.constant 0 : index
    %c0_43 = arith.constant 0 : index
    %51 = vector.load %arg5[%c1_40, %c0_41, %c0_42, %c0_43] : memref<3x3x8x8xbf16, #tpu.memory_space<vmem>>, vector<1x1x8x8xbf16>
    %52 = vector.shape_cast %51 : vector<1x1x8x8xbf16> to vector<8x8xbf16>
    %cst_44 = arith.constant dense<0.000000e+00> : vector<8x16x8xf32>
    %53 = tpu.matmul %50, %52, %cst_44 {dimension_numbers = #tpu.dot_dimension_numbers<[2], [0], [0, 1], [1], [0, 0, 0, 1, 1, 1], [], []>} : vector<8x16x8xbf16>, vector<8x8xbf16>, vector<8x16x8xf32> -> vector<8x16x8xf32>
    %54 = arith.addf %49, %53 : vector<8x16x8xf32>
    %c1_45 = arith.constant 1 : index
    %c1_46 = arith.constant 1 : index
    %c0_47 = arith.constant 0 : index
    %55 = vector.load %arg8[%c1_45, %c1_46, %c0_47] : memref<10x18x8xbf16, #tpu.memory_space<vmem>>, vector<8x16x8xbf16>
    %c1_48 = arith.constant 1 : index
    %c1_49 = arith.constant 1 : index
    %c0_50 = arith.constant 0 : index
    %c0_51 = arith.constant 0 : index
    %56 = vector.load %arg5[%c1_48, %c1_49, %c0_50, %c0_51] : memref<3x3x8x8xbf16, #tpu.memory_space<vmem>>, vector<1x1x8x8xbf16>
    %57 = vector.shape_cast %56 : vector<1x1x8x8xbf16> to vector<8x8xbf16>
    %cst_52 = arith.constant dense<0.000000e+00> : vector<8x16x8xf32>
    %58 = tpu.matmul %55, %57, %cst_52 {dimension_numbers = #tpu.dot_dimension_numbers<[2], [0], [0, 1], [1], [0, 0, 0, 1, 1, 1], [], []>} : vector<8x16x8xbf16>, vector<8x8xbf16>, vector<8x16x8xf32> -> vector<8x16x8xf32>
    %59 = arith.addf %54, %58 : vector<8x16x8xf32>
    %c1_53 = arith.constant 1 : index
    %c2_54 = arith.constant 2 : index
    %c0_55 = arith.constant 0 : index
    %60 = vector.load %arg8[%c1_53, %c2_54, %c0_55] : memref<10x18x8xbf16, #tpu.memory_space<vmem>>, vector<8x16x8xbf16>
    %c1_56 = arith.constant 1 : index
    %c2_57 = arith.constant 2 : index
    %c0_58 = arith.constant 0 : index
    %c0_59 = arith.constant 0 : index
    %61 = vector.load %arg5[%c1_56, %c2_57, %c0_58, %c0_59] : memref<3x3x8x8xbf16, #tpu.memory_space<vmem>>, vector<1x1x8x8xbf16>
    %62 = vector.shape_cast %61 : vector<1x1x8x8xbf16> to vector<8x8xbf16>
    %cst_60 = arith.constant dense<0.000000e+00> : vector<8x16x8xf32>
    %63 = tpu.matmul %60, %62, %cst_60 {dimension_numbers = #tpu.dot_dimension_numbers<[2], [0], [0, 1], [1], [0, 0, 0, 1, 1, 1], [], []>} : vector<8x16x8xbf16>, vector<8x8xbf16>, vector<8x16x8xf32> -> vector<8x16x8xf32>
    %64 = arith.addf %59, %63 : vector<8x16x8xf32>
    %c2_61 = arith.constant 2 : index
    %c0_62 = arith.constant 0 : index
    %c0_63 = arith.constant 0 : index
    %65 = vector.load %arg8[%c2_61, %c0_62, %c0_63] : memref<10x18x8xbf16, #tpu.memory_space<vmem>>, vector<8x16x8xbf16>
    %c2_64 = arith.constant 2 : index
    %c0_65 = arith.constant 0 : index
    %c0_66 = arith.constant 0 : index
    %c0_67 = arith.constant 0 : index
    %66 = vector.load %arg5[%c2_64, %c0_65, %c0_66, %c0_67] : memref<3x3x8x8xbf16, #tpu.memory_space<vmem>>, vector<1x1x8x8xbf16>
    %67 = vector.shape_cast %66 : vector<1x1x8x8xbf16> to vector<8x8xbf16>
    %cst_68 = arith.constant dense<0.000000e+00> : vector<8x16x8xf32>
    %68 = tpu.matmul %65, %67, %cst_68 {dimension_numbers = #tpu.dot_dimension_numbers<[2], [0], [0, 1], [1], [0, 0, 0, 1, 1, 1], [], []>} : vector<8x16x8xbf16>, vector<8x8xbf16>, vector<8x16x8xf32> -> vector<8x16x8xf32>
    %69 = arith.addf %64, %68 : vector<8x16x8xf32>
    %c2_69 = arith.constant 2 : index
    %c1_70 = arith.constant 1 : index
    %c0_71 = arith.constant 0 : index
    %70 = vector.load %arg8[%c2_69, %c1_70, %c0_71] : memref<10x18x8xbf16, #tpu.memory_space<vmem>>, vector<8x16x8xbf16>
    %c2_72 = arith.constant 2 : index
    %c1_73 = arith.constant 1 : index
    %c0_74 = arith.constant 0 : index
    %c0_75 = arith.constant 0 : index
    %71 = vector.load %arg5[%c2_72, %c1_73, %c0_74, %c0_75] : memref<3x3x8x8xbf16, #tpu.memory_space<vmem>>, vector<1x1x8x8xbf16>
    %72 = vector.shape_cast %71 : vector<1x1x8x8xbf16> to vector<8x8xbf16>
    %cst_76 = arith.constant dense<0.000000e+00> : vector<8x16x8xf32>
    %73 = tpu.matmul %70, %72, %cst_76 {dimension_numbers = #tpu.dot_dimension_numbers<[2], [0], [0, 1], [1], [0, 0, 0, 1, 1, 1], [], []>} : vector<8x16x8xbf16>, vector<8x8xbf16>, vector<8x16x8xf32> -> vector<8x16x8xf32>
    %74 = arith.addf %69, %73 : vector<8x16x8xf32>
    %c2_77 = arith.constant 2 : index
    %c2_78 = arith.constant 2 : index
    %c0_79 = arith.constant 0 : index
    %75 = vector.load %arg8[%c2_77, %c2_78, %c0_79] : memref<10x18x8xbf16, #tpu.memory_space<vmem>>, vector<8x16x8xbf16>
    %c2_80 = arith.constant 2 : index
    %c2_81 = arith.constant 2 : index
    %c0_82 = arith.constant 0 : index
    %c0_83 = arith.constant 0 : index
    %76 = vector.load %arg5[%c2_80, %c2_81, %c0_82, %c0_83] : memref<3x3x8x8xbf16, #tpu.memory_space<vmem>>, vector<1x1x8x8xbf16>
    %77 = vector.shape_cast %76 : vector<1x1x8x8xbf16> to vector<8x8xbf16>
    %cst_84 = arith.constant dense<0.000000e+00> : vector<8x16x8xf32>
    %78 = tpu.matmul %75, %77, %cst_84 {dimension_numbers = #tpu.dot_dimension_numbers<[2], [0], [0, 1], [1], [0, 0, 0, 1, 1, 1], [], []>} : vector<8x16x8xbf16>, vector<8x8xbf16>, vector<8x16x8xf32> -> vector<8x16x8xf32>
    %79 = arith.addf %74, %78 : vector<8x16x8xf32>
    %c0_85 = arith.constant 0 : index
    %c0_86 = arith.constant 0 : index
    %80 = vector.load %arg6[%c0_85, %c0_86] : memref<1x8xf32, #tpu.memory_space<vmem>>, vector<1x8xf32>
    %81 = vector.shape_cast %80 : vector<1x8xf32> to vector<1x1x8xf32>
    %82 = vector.broadcast %81 : vector<1x1x8xf32> to vector<8x16x8xf32>
    %83 = arith.addf %79, %82 : vector<8x16x8xf32>
    %cst_87 = arith.constant 0.000000e+00 : f32
    %84 = vector.broadcast %cst_87 : f32 to vector<8x16x8xf32>
    %85 = arith.maximumf %83, %84 : vector<8x16x8xf32>
    %86 = arith.truncf %85 : vector<8x16x8xf32> to vector<8x16x8xbf16>
    %c0_88 = arith.constant 0 : index
    %c0_89 = arith.constant 0 : index
    %c0_90 = arith.constant 0 : index
    %c0_91 = arith.constant 0 : index
    %87 = vector.load %arg7[%c0_88, %c0_89, %c0_90, %c0_91] : memref<1x8x16x8xbf16, #tpu.memory_space<vmem>>, vector<1x8x16x8xbf16>
    %88 = vector.shape_cast %87 : vector<1x8x16x8xbf16> to vector<8x16x8xbf16>
    %89 = vector.shape_cast %86 : vector<8x16x8xbf16> to vector<1x8x16x8xbf16>
    tpu.vector_store %arg7[%c0_88, %c0_89, %c0_90, %c0_91], %89 {strides = array<i32>} : memref<1x8x16x8xbf16, #tpu.memory_space<vmem>>, vector<1x8x16x8xbf16>,
    return
  }
  func.func @transform_0(%arg0: i32, %arg1: i32) -> (i32, i32, i32, i32) {
    %c2_i32 = arith.constant 2 : i32
    %0 = arith.muli %arg0, %c2_i32 : i32
    %1 = arith.addi %0, %arg1 : i32
    %c0_i32 = arith.constant 0 : i32
    %c0_i32_0 = arith.constant 0 : i32
    %c0_i32_1 = arith.constant 0 : i32
    %c0_i32_2 = arith.constant 0 : i32
    return %1, %c0_i32, %c0_i32_0, %c0_i32_1 : i32, i32, i32, i32
  }
  func.func @transform_1(%arg0: i32, %arg1: i32) -> (i32, i32) {
    %c0_i32 = arith.constant 0 : i32
    %c0_i32_0 = arith.constant 0 : i32
    %c0_i32_1 = arith.constant 0 : i32
    return %c0_i32, %c0_i32_0 : i32, i32
  }
  func.func @transform_2(%arg0: i32, %arg1: i32) -> (i32, i32) {
    %c0_i32 = arith.constant 0 : i32
    %c0_i32_0 = arith.constant 0 : i32
    %c0_i32_1 = arith.constant 0 : i32
    return %c0_i32, %c0_i32_0 : i32, i32
  }
  func.func @transform_3(%arg0: i32, %arg1: i32) -> (i32, i32, i32, i32) {
    %c0_i32 = arith.constant 0 : i32
    %c0_i32_0 = arith.constant 0 : i32
    %c0_i32_1 = arith.constant 0 : i32
    %c0_i32_2 = arith.constant 0 : i32
    %c0_i32_3 = arith.constant 0 : i32
    return %c0_i32, %c0_i32_0, %c0_i32_1, %c0_i32_2 : i32, i32, i32, i32
  }
  func.func @transform_4(%arg0: i32, %arg1: i32) -> (i32, i32) {
    %c0_i32 = arith.constant 0 : i32
    %c0_i32_0 = arith.constant 0 : i32
    %c0_i32_1 = arith.constant 0 : i32
    return %c0_i32, %c0_i32_0 : i32, i32
  }
  func.func @transform_5(%arg0: i32, %arg1: i32) -> (i32, i32, i32, i32) {
    %c0_i32 = arith.constant 0 : i32
    %c0_i32_0 = arith.constant 0 : i32
    %c0_i32_1 = arith.constant 0 : i32
    return %arg0, %arg1, %c0_i32, %c0_i32_0 : i32, i32, i32, i32
  }
}

</mosaic_0001>

<bundles_post_ra>
// kernel: tpu_custom_call.1
= control target key start
LH: loop header
LB: loop body
LE: loop exit
PB: predicated region body
PF: predicated region fallthrough
CT: control target
= control target key end

     0   :  { %s6718_s18 = smov 0   ;;  %s6720_s19 = smov 0   ;;  %s8459_s0 = inlined_call_operand.vmem [shape: bf16[4,10,18,36], index: 0, kind: input, shape index: {}]   ;;  %s8460_s1 = inlined_call_operand.vmem [shape: bf16[36,8], index: 1, kind: input, shape index: {}]   ;;  %s8461_s2 = inlined_call_operand.vmem [shape: f32[1,8], index: 2, kind: input, shape index: {}]   ;;  %s8462_s3 = inlined_call_operand.vmem [shape: bf16[3,3,8,8], index: 3, kind: input, shape index: {}]   ;;  %s8463_s4 = inlined_call_operand.vmem [shape: f32[1,8], index: 4, kind: input, shape index: {}]   ;;  %s8464_s5 = inlined_call_operand.vmem [shape: bf16[2,16,16,8], index: 5, kind: output, shape index: {}]  }
   0x1   :  { %s6722_s20 = smov 0   ;;  %s6724_s21 = smov 0  }
   0x2   :  { %s6726_s22 = smov 0  }
   0x3 LB: > { %s24_s23 = sadd.s32 1, %s6676_s20  ;;  %s27_s24 = sadd.s32 1, %s6680_s21  ;;  %s6684_s22 = sphi %s6726_s22, %s15_s22   ;;  %s6680_s21 = sphi %s6724_s21, %s8562_s21   ;;  %s6676_s20 = sphi %s6722_s20, %s8561_s20   ;;  %s6672_s19 = sphi %s6720_s19, %s8560_s19   ;;  %s6668_s18 = sphi %s6718_s18, %s8559_s18  }
   0x4   : > { %p25_p0 = scmp.ge.s32.totalorder %s24_s23, 2  ;;  %p5925_p1 = scmp.ge.s32.totalorder %s6684_s22, 1 }
   0x5   : > { %p209_p2 = scmp.lt.s32.totalorder %s6684_s22, 5 }
   0x6   : > { %s8564_s23 = smov (%p25_p0, %s24_s23), 0  ;;  %s8566_s24 = smov (!%p25_p0, %s27_s24), %s6680_s21 }
   0x7   : > { %p210_p3 = pnand %p5925_p1, %p209_p2  ;;  %p29_p4 = scmp.ge.s32.totalorder %s8566_s24, 2 }
   0x9   : > { %s8568_s24 = smov (%p29_p4, %s8566_s24), 0  ;;  %213 = sbr.rel (%p210_p3) target bundleno = 732 (0x2dc), region = 40 }
   0xe   : > { %v6620_v0 = vld [vmem:[%s8460_s1 + $0x10] ss:$0 sps:$4 sm:$0x33]   ;;  %vm1634_vm0 = vcmask 1041408   ;;  %v347_v1 = vlaneseq  ;;  %v6621_v2 = vld [vmem:[%s8460_s1 + $0x8] sm:$0xff]   ;;  %s5926_s29 = sshll.u32 %s6672_s19, 1 }
   0xf   : > { %6566 = vmatprep.subr.msk.bf16.mxu0 %vm1634_vm0, %v6620_v0  ;;  %v1636_v3 = vsel %vm1634_vm0, %v6620_v0, 0  ;;  %s245_s30 = sadd.s32 %s6668_s18, %s5926_s29  ;;  %6567 = vmatprep.subr.msk.bf16.mxu1 %vm1634_vm0, %v6620_v0  ;;  %v6622_v4 = vld [vmem:[%s8460_s1] sm:$0xff]   ;;  %v6686_v5 = vmov 1966171168   ;;  %vm1597_vm1 = vcmask 293888   ;;  %vm3526_vm2 = vcmask 1043456  }
  0x10   : > { %6369 = vmatpush3.bf16.msra.mxu0 %v1636_v3  ;;  %p246_p5 = scmp.lt.s32.totalorder %s245_s30, 3  ;;  %6563 = vmatpush3.bf16.msra.mxu1 %v1636_v3  ;;  %v345_v6 = vunpack.c.l.s4 %v6686_v5  ;;  %v6763_v7 = vshrl.u32 %v347_v1, 7  ;;  %s6952_s25 = sshll.u32 %s6668_s18, 3  ;;  %vm3226_vm6 = vcmask 57344   ;;  %vm3223_vm14 = vcmask 60416  }
  0x11   : > { %6370 = vmatprep.subr.bf16.mxu0 %v6621_v2  ;;  %6561 = vmatprep.subr.bf16.mxu1 %v6621_v2  ;;  %p254_p6 = scmp.lt.s32.totalorder %s6672_s19, 1  ;;  %p256_p7 = scmp.lt.s32.totalorder %s6952_s25, 15 }
  0x12   : > { %s8570_s30 = smov (!%p246_p5, %s245_s30), 3  ;;  %v346_v8 = vunpack.c.0.s8 %v345_v6 }
  0x13   : > { %s6577_s8 = smul.u32 120, %s8570_s30  ;;  %s8572_s19 = smov (!%p254_p6, %s6672_s19), 1 }
  0x14   : > { %6371 = vmatpush3.bf16.msra.mxu0 %v6621_v2  ;;  %6564 = vmatpush3.bf16.msra.mxu1 %v6621_v2  ;;  %v6766_v9 = vsub.s32 %v346_v8, %v6763_v7  ;;  %s5930_s27 = sshll.u32 %s8572_s19, 5 }
  0x15   : > { %6372 = vmatprep.subr.bf16.mxu0 %v6622_v4  ;;  %6562 = vmatprep.subr.bf16.mxu1 %v6622_v4  ;;  %s6771_s11 = scalar_lea.vmem %s8459_s0, %s6577_s8 }
  0x16   : > { %v5933_v10 = vld.sshfl [vmem:[%s6771_s11] sm:$0x33 pattern:$0x75316420] }
  0x17   : > { %v5934_v11 = vld.sshfl [vmem:[%s6771_s11 + $0x4] sm:$0x33 pattern:$0x75316420]  ;;  %v343_v12 = vcombine.high %v5933_v10, %v5933_v10  ;;  %v350_v13 = vrot.slane %v5933_v10, %v6766_v9 }
  0x18   : > { %6373 = vmatpush3.bf16.msra.mxu0 %v6622_v4  ;;  %6565 = vmatpush3.bf16.msra.mxu1 %v6622_v4  ;;  %v367_v14 = vcombine.high %v5934_v11, %v5934_v11  ;;  %v374_v15 = vrot.slane %v5934_v11, %v6766_v9  ;;  %v5935_v16 = vld.sshfl [vmem:[%s6771_s11 + $0x8] sm:$0x1 pattern:$0x75316420] }
  0x19   : > { %v357_v17 = vrot.slane %v343_v12, %v6766_v9  ;;  %v5936_v18 = vld.sshfl [vmem:[%s6771_s11 + $0xc] sm:$0x33 pattern:$0x75316420]  ;;  %v397_v21 = vrot.slane %v5935_v16, %v6766_v9 }
  0x1a   : > { %v381_v19 = vrot.slane %v367_v14, %v6766_v9  ;;  %v5937_v20 = vld.sshfl [vmem:[%s6771_s11 + $0x10] sm:$0x33 pattern:$0x75316420]  ;;  %v405_v22 = vcombine.high %v5936_v18, %v5936_v18  ;;  %v412_v23 = vrot.slane %v5936_v18, %v6766_v9 }
  0x1b   : > { %v973_v24 = vcombine.low %v350_v13, %v357_v17  ;;  %v5963_v25 = vcombine.high %v350_v13, %v357_v17  ;;  %v429_v26 = vcombine.high %v5937_v20, %v5937_v20  ;;  %v436_v27 = vrot.slane %v5937_v20, %v6766_v9  ;;  %v5938_v36 = vld.sshfl [vmem:[%s6771_s11 + $0x14] sm:$0x1 pattern:$0x75316420] }
  0x1c   : > { %v975_v28 = vcombine.low %v374_v15, %v381_v19  ;;  %v5964_v29 = vcombine.high %v374_v15, %v381_v19  ;;  %v419_v30 = vrot.slane %v405_v22, %v6766_v9  ;;  %v420_v31 = vcombine.high %v412_v23, %v412_v23  ;;  %v5939_v41 = vld.sshfl [vmem:[%s6771_s11 + $0x18] sm:$0x33 pattern:$0x75316420] }
  0x1d   : > { %v983_v32 = vrot.slane %v973_v24, %v6766_v9  ;;  %v990_v33 = vrot.slane %v5963_v25, %v6766_v9  ;;  %v443_v34 = vrot.slane %v429_v26, %v6766_v9  ;;  %v444_v35 = vcombine.high %v436_v27, %v436_v27  ;;  %v5940_v45 = vld.sshfl [vmem:[%s6771_s11 + $0x1c] sm:$0x33 pattern:$0x75316420] }
  0x1e   : > { %v997_v37 = vrot.slane %v975_v28, %v6766_v9  ;;  %v1004_v38 = vrot.slane %v5964_v29, %v6766_v9  ;;  %v421_v39 = vcombine.high %v419_v30, %v419_v30  ;;  %v1022_v40 = vcombine.low %v397_v21, %v412_v23  ;;  %v5941_v55 = vld.sshfl [vmem:[%s6771_s11 + $0x20] sm:$0x1 pattern:$0x75316420] }
  0x1f   : > { %v1005_v42 = vcombine.low %v983_v32, %v990_v33  ;;  %v1023_v43 = vcombine.low %v419_v30, %v420_v31  ;;  %v1025_v44 = vcombine.low %v443_v34, %v444_v35  ;;  %v445_v46 = vcombine.high %v443_v34, %v443_v34  ;;  %v5942_v0 = vld.sshfl [vmem:[%s6771_s11 + $0x24] sm:$0x33 pattern:$0x75316420] }
  0x20   : > { %v1006_v47 = vcombine.low %v997_v37, %v1004_v38  ;;  %v1024_v48 = vcombine.low %v421_v39, %v436_v27  ;;  %v1032_v49 = vrot.slane %v1022_v40, %v6766_v9  ;;  %v459_v50 = vrot.slane %v5938_v36, %v6766_v9  ;;  %v5943_v4 = vld.sshfl [vmem:[%s6771_s11 + $0x28] sm:$0x33 pattern:$0x75316420] }
  0x21   : > { %v1013_v51 = vrot.slane %v1005_v42, %v6766_v9  ;;  %v1039_v52 = vrot.slane %v1023_v43, %v6766_v9  ;;  %v1053_v53 = vrot.slane %v1025_v44, %v6766_v9  ;;  %v467_v54 = vcombine.high %v5939_v41, %v5939_v41  ;;  %v5944_v24 = vld.sshfl [vmem:[%s6771_s11 + $0x2c] sm:$0x1 pattern:$0x75316420] }
  0x22   : > { %v1020_v56 = vrot.slane %v1006_v47, %v6766_v9  ;;  %v1046_v57 = vrot.slane %v1024_v48, %v6766_v9  ;;  %v474_v58 = vrot.slane %v5939_v41, %v6766_v9  ;;  %v491_v59 = vcombine.high %v5940_v45, %v5940_v45  ;;  %v5945_v28 = vld.sshfl [vmem:[%s6771_s11 + $0x30] sm:$0x33 pattern:$0x75316420] }
  0x23   : > { %v1054_v60 = vcombine.low %v1032_v49, %v1039_v52  ;;  %v481_v61 = vrot.slane %v467_v54, %v6766_v9  ;;  %v498_v62 = vrot.slane %v5940_v45, %v6766_v9  ;;  %v1071_v63 = vcombine.low %v445_v46, %v459_v50  ;;  %v5946_v38 = vld.sshfl [vmem:[%s6771_s11 + $0x34] sm:$0x33 pattern:$0x75316420] }
  0x24   : > { %v1021_v1 = vcombine.low %v1013_v51, %v1020_v56  ;;  %v1055_v2 = vcombine.low %v1046_v57, %v1053_v53  ;;  %v505_v3 = vrot.slane %v491_v59, %v6766_v9  ;;  %v521_v5 = vrot.slane %v5941_v55, %v6766_v9  ;;  %v5947_v47 = vld.sshfl [vmem:[%s6771_s11 + $0x38] sm:$0x1 pattern:$0x75316420] }
  0x25   : > { %v1062_v6 = vrot.slane %v1054_v60, %v6766_v9  ;;  %v1072_v8 = vcombine.low %v474_v58, %v481_v61  ;;  %v5965_v10 = vcombine.high %v474_v58, %v481_v61  ;;  %v1081_v11 = vrot.slane %v1071_v63, %v6766_v9  ;;  %v5948_v51 = vld.sshfl [vmem:[%s6771_s11 + $0x3c] sm:$0x33 pattern:$0x75316420] }
  0x26   : > { %6374 = vmatprep.mubr.msk.bf16.mxu0 %vm1597_vm1, %v1021_v1  ;;  %v1069_v12 = vrot.slane %v1055_v2, %v6766_v9  ;;  %v1074_v13 = vcombine.low %v498_v62, %v505_v3  ;;  %v529_v14 = vcombine.high %v5942_v0, %v5942_v0  ;;  %v536_v15 = vrot.slane %v5942_v0, %v6766_v9 }
  0x27   : > { %v1088_v16 = vrot.slane %v1072_v8, %v6766_v9  ;;  %v1095_v17 = vrot.slane %v5965_v10, %v6766_v9  ;;  %v560_v18 = vrot.slane %v5943_v4, %v6766_v9  ;;  %v5966_v19 = vcombine.high %v498_v62, %v505_v3 }
  0x28   : > { %v1070_v20 = vcombine.low %v1062_v6, %v1069_v12  ;;  %v1102_v21 = vrot.slane %v1074_v13, %v6766_v9  ;;  %v543_v22 = vrot.slane %v529_v14, %v6766_v9  ;;  %v544_v23 = vcombine.high %v536_v15, %v536_v15  ;;  %v5950_v12 = vld.sshfl [vmem:[%s6771_s11 + $0x44] sm:$0x1 pattern:$0x75316420] }
  0x29   : > { %v1103_v25 = vcombine.low %v1081_v11, %v1088_v16  ;;  %v1121_v26 = vcombine.low %v521_v5, %v536_v15  ;;  %v1130_v27 = vrot.slane %v5966_v19, %v6766_v9  ;;  %v553_v29 = vcombine.high %v5943_v4, %v5943_v4  ;;  %v5949_v5 = vld.sshfl [vmem:[%s6771_s11 + $0x40] sm:$0x33 pattern:$0x75316420] }
  0x2a   : > { %6375 = vmatmul.mubr.msk.bf16.vlgmr.msra.gmra.mxu0 %vm1597_vm1, %v1070_v20  ;;  %v1104_v30 = vcombine.low %v1095_v17, %v1102_v21  ;;  %v545_v31 = vcombine.high %v543_v22, %v543_v22  ;;  %v1122_v32 = vcombine.low %v543_v22, %v544_v23  ;;  %v568_v33 = vcombine.high %v560_v18, %v560_v18  ;;  %v5951_v17 = vld.sshfl [vmem:[%s6771_s11 + $0x48] sm:$0x33 pattern:$0x75316420] }
  0x2b   : > { %v1111_v34 = vrot.slane %v1103_v25, %v6766_v9  ;;  %v1137_v35 = vrot.slane %v1121_v26, %v6766_v9  ;;  %v567_v36 = vrot.slane %v553_v29, %v6766_v9  ;;  %v583_v37 = vrot.slane %v5944_v24, %v6766_v9 }
  0x2c   : > { %v1118_v39 = vrot.slane %v1104_v30, %v6766_v9  ;;  %v1123_v40 = vcombine.low %v545_v31, %v560_v18  ;;  %v1144_v41 = vrot.slane %v1122_v32, %v6766_v9  ;;  %v591_v42 = vcombine.high %v5945_v28, %v5945_v28  ;;  %v5952_v30 = vld.sshfl [vmem:[%s6771_s11 + $0x4c] sm:$0x33 pattern:$0x75316420] }
  0x2d   : > { %v1152_v43 = vcombine.low %v1130_v27, %v1137_v35  ;;  %v569_v44 = vcombine.high %v567_v36, %v567_v36  ;;  %v598_v45 = vrot.slane %v5945_v28, %v6766_v9  ;;  %v1169_v46 = vcombine.low %v567_v36, %v568_v33  ;;  %v5953_v35 = vld.sshfl [vmem:[%s6771_s11 + $0x50] sm:$0x1 pattern:$0x75316420] }
  0x2e   : > { %v1119_v48 = vcombine.low %v1111_v34, %v1118_v39  ;;  %v1151_v49 = vrot.slane %v1123_v40, %v6766_v9  ;;  %v605_v50 = vrot.slane %v591_v42, %v6766_v9  ;;  %v615_v52 = vcombine.high %v5946_v38, %v5946_v38  ;;  %v5954_v40 = vld.sshfl [vmem:[%s6771_s11 + $0x54] sm:$0x33 pattern:$0x75316420] }
  0x2f   : > { %v1160_v53 = vrot.slane %v1152_v43, %v6766_v9  ;;  %v1170_v54 = vcombine.low %v569_v44, %v583_v37  ;;  %v1179_v55 = vrot.slane %v1169_v46, %v6766_v9  ;;  %v622_v56 = vrot.slane %v5946_v38, %v6766_v9 }
  0x30   : > { %6378 = vmatprep.mubr.msk.bf16.mxu0 %vm1597_vm1, %v1119_v48  ;;  %v1153_v57 = vcombine.low %v1144_v41, %v1151_v49  ;;  %v1171_v58 = vcombine.low %v598_v45, %v605_v50  ;;  %v5967_v59 = vcombine.high %v598_v45, %v605_v50  ;;  %v629_v60 = vrot.slane %v615_v52, %v6766_v9 }
  0x31   : > { %v1186_v61 = vrot.slane %v1170_v54, %v6766_v9  ;;  %v645_v62 = vrot.slane %v5947_v47, %v6766_v9  ;;  %v653_v63 = vcombine.high %v5948_v51, %v5948_v51  ;;  %v660_v0 = vrot.slane %v5948_v51, %v6766_v9 }
  0x32   : > { %v1167_v1 = vrot.slane %v1153_v57, %v6766_v9  ;;  %v1193_v2 = vrot.slane %v1171_v58, %v6766_v9  ;;  %v1200_v3 = vrot.slane %v5967_v59, %v6766_v9  ;;  %v1218_v4 = vcombine.low %v622_v56, %v629_v60 }
  0x33   : > { %v1201_v6 = vcombine.low %v1179_v55, %v1186_v61  ;;  %v667_v8 = vrot.slane %v653_v63, %v6766_v9  ;;  %v668_v10 = vcombine.high %v660_v0, %v660_v0  ;;  %v5968_v11 = vcombine.high %v622_v56, %v629_v60  ;;  %v5955_v61 = vld.sshfl [vmem:[%s6771_s11 + $0x58] sm:$0x33 pattern:$0x75316420] }
  0x34   : > { %v1168_v13 = vcombine.low %v1160_v53, %v1167_v1  ;;  %v1202_v14 = vcombine.low %v1193_v2, %v1200_v3  ;;  %v1220_v15 = vcombine.low %v645_v62, %v660_v0  ;;  %v1228_v16 = vrot.slane %v1218_v4, %v6766_v9  ;;  %v5956_v0 = vld.sshfl [vmem:[%s6771_s11 + $0x5c] sm:$0x1 pattern:$0x75316420] }
  0x35   : > { %v1209_v18 = vrot.slane %v1201_v6, %v6766_v9  ;;  %v1221_v19 = vcombine.low %v667_v8, %v668_v10  ;;  %v1235_v20 = vrot.slane %v5968_v11, %v6766_v9  ;;  %v669_v21 = vcombine.high %v667_v8, %v667_v8 }
  0x36   : > { %6379 = vmatmul.mubr.msk.bf16.gmra.mxu0 %vm1597_vm1, %v1168_v13  ;;  %v1216_v22 = vrot.slane %v1202_v14, %v6766_v9  ;;  %v1242_v23 = vrot.slane %v1220_v15, %v6766_v9  ;;  %v677_v24 = vcombine.high %v5949_v5, %v5949_v5  ;;  %v684_v25 = vrot.slane %v5949_v5, %v6766_v9  ;;  %v5957_v13 = vld.sshfl [vmem:[%s6771_s11 + $0x60] sm:$0x33 pattern:$0x75316420] }
  0x37   : > { %v1249_v26 = vrot.slane %v1221_v19, %v6766_v9  ;;  %v1250_v27 = vcombine.low %v1228_v16, %v1235_v20  ;;  %v707_v28 = vrot.slane %v5950_v12, %v6766_v9  ;;  %v715_v29 = vcombine.high %v5951_v17, %v5951_v17 }
  0x38   : > { %v1217_v31 = vcombine.low %v1209_v18, %v1216_v22  ;;  %v691_v32 = vrot.slane %v677_v24, %v6766_v9  ;;  %v692_v33 = vcombine.high %v684_v25, %v684_v25  ;;  %v722_v34 = vrot.slane %v5951_v17, %v6766_v9  ;;  %v5958_v22 = vld.sshfl [vmem:[%s6771_s11 + $0x64] sm:$0x33 pattern:$0x75316420] }
  0x39   : > { %v1251_v36 = vcombine.low %v1242_v23, %v1249_v26  ;;  %v1258_v37 = vrot.slane %v1250_v27, %v6766_v9  ;;  %v729_v38 = vrot.slane %v715_v29, %v6766_v9  ;;  %v1267_v39 = vcombine.low %v669_v21, %v684_v25 }
  0x3a   : > { %6382 = vmatprep.mubr.msk.bf16.mxu0 %vm1597_vm1, %v1217_v31  ;;  %v693_v41 = vcombine.high %v691_v32, %v691_v32  ;;  %v1268_v42 = vcombine.low %v691_v32, %v692_v33  ;;  %v739_v43 = vcombine.high %v5952_v30, %v5952_v30  ;;  %v746_v44 = vrot.slane %v5952_v30, %v6766_v9  ;;  %v5959_v31 = vld.sshfl [vmem:[%s6771_s11 + $0x68] sm:$0x1 pattern:$0x75316420] }
  0x3b   : > { %v1265_v45 = vrot.slane %v1251_v36, %v6766_v9  ;;  %v1270_v46 = vcombine.low %v722_v34, %v729_v38  ;;  %v1277_v47 = vrot.slane %v1267_v39, %v6766_v9  ;;  %v769_v48 = vrot.slane %v5953_v35, %v6766_v9  ;;  %v5960_v36 = vld.sshfl [vmem:[%s6771_s11 + $0x6c] sm:$0x33 pattern:$0x75316420] }
  0x3c   : > { %v1269_v49 = vcombine.low %v693_v41, %v707_v28  ;;  %v1284_v50 = vrot.slane %v1268_v42, %v6766_v9  ;;  %v753_v51 = vrot.slane %v739_v43, %v6766_v9  ;;  %v784_v52 = vrot.slane %v5954_v40, %v6766_v9 }
  0x3d   : > { %v1266_v53 = vcombine.low %v1258_v37, %v1265_v45  ;;  %v1298_v54 = vrot.slane %v1270_v46, %v6766_v9  ;;  %v5969_v55 = vcombine.high %v722_v34, %v729_v38  ;;  %v777_v56 = vcombine.high %v5954_v40, %v5954_v40 }
  0x3e   : > { %v1291_v57 = vrot.slane %v1269_v49, %v6766_v9  ;;  %v1299_v58 = vcombine.low %v1277_v47, %v1284_v50  ;;  %v1317_v59 = vcombine.low %v746_v44, %v753_v51  ;;  %v5970_v60 = vcombine.high %v746_v44, %v753_v51  ;;  %v5961_v44 = vld.sshfl [vmem:[%s6771_s11 + $0x70] sm:$0x33 pattern:$0x75316420] }
  0x3f   : > { %6383 = vmatmul.mubr.msk.bf16.gmra.mxu0 %vm1597_vm1, %v1266_v53  ;;  %v1319_v62 = vcombine.low %v769_v48, %v784_v52  ;;  %v1326_v63 = vrot.slane %v5969_v55, %v6766_v9  ;;  %v791_v1 = vrot.slane %v777_v56, %v6766_v9  ;;  %v792_v2 = vcombine.high %v784_v52, %v784_v52 }
  0x40   : > { %v1300_v3 = vcombine.low %v1291_v57, %v1298_v54  ;;  %v1307_v4 = vrot.slane %v1299_v58, %v6766_v9  ;;  %v1333_v5 = vrot.slane %v1317_v59, %v6766_v9  ;;  %v1340_v6 = vrot.slane %v5970_v60, %v6766_v9 }
  0x41   : > { %v1347_v8 = vrot.slane %v1319_v62, %v6766_v9  ;;  %v793_v10 = vcombine.high %v791_v1, %v791_v1  ;;  %v801_v11 = vcombine.high %v5955_v61, %v5955_v61  ;;  %v808_v12 = vrot.slane %v5955_v61, %v6766_v9 }
  0x42   : > { %v1314_v14 = vrot.slane %v1300_v3, %v6766_v9  ;;  %v1348_v15 = vcombine.low %v1326_v63, %v1333_v5  ;;  %v831_v16 = vrot.slane %v5956_v0, %v6766_v9  ;;  %v1365_v17 = vcombine.low %v791_v1, %v792_v2  ;;  %v5962_v2 = vld.sshfl [vmem:[%s6771_s11 + $0x74] sm:$0x1 pattern:$0x75316420] }
  0x43   : > { %v1349_v18 = vcombine.low %v1340_v6, %v1347_v8  ;;  %v815_v19 = vrot.slane %v801_v11, %v6766_v9  ;;  %v816_v20 = vcombine.high %v808_v12, %v808_v12  ;;  %v1366_v21 = vcombine.low %v793_v10, %v808_v12 }
  0x44   : > { %v1315_v23 = vcombine.low %v1307_v4, %v1314_v14  ;;  %v1356_v24 = vrot.slane %v1348_v15, %v6766_v9  ;;  %v1375_v25 = vrot.slane %v1365_v17, %v6766_v9  ;;  %v839_v26 = vcombine.high %v5957_v13, %v5957_v13 }
  0x45   : > { %v1363_v27 = vrot.slane %v1349_v18, %v6766_v9  ;;  %v817_v28 = vcombine.high %v815_v19, %v815_v19  ;;  %v1367_v29 = vcombine.low %v815_v19, %v816_v20  ;;  %v1382_v30 = vrot.slane %v1366_v21, %v6766_v9 }
  0x46   : > { %6386 = vmatprep.mubr.msk.bf16.mxu0 %vm1597_vm1, %v1315_v23  ;;  %v846_v32 = vrot.slane %v5957_v13, %v6766_v9  ;;  %v853_v33 = vrot.slane %v839_v26, %v6766_v9  ;;  %v863_v34 = vcombine.high %v5958_v22, %v5958_v22  ;;  %v870_v35 = vrot.slane %v5958_v22, %v6766_v9 }
  0x47   : > { %v1364_v37 = vcombine.low %v1356_v24, %v1363_v27  ;;  %v1368_v38 = vcombine.low %v817_v28, %v831_v16  ;;  %v1389_v39 = vrot.slane %v1367_v29, %v6766_v9  ;;  %v1397_v40 = vcombine.low %v1375_v25, %v1382_v30  ;;  %v6064_v28 = vld [vmem:[%s8462_s3 + $0x8] sm:$0xf] }
  0x48   : > { %v877_v41 = vrot.slane %v863_v34, %v6766_v9  ;;  %v1414_v42 = vcombine.low %v846_v32, %v853_v33  ;;  %v5971_v43 = vcombine.high %v846_v32, %v853_v33  ;;  %v893_v45 = vrot.slane %v5959_v31, %v6766_v9  ;;  %6570 = vmatprep.subr.msk.bf16.mxu0 %vm3526_vm2, %v6064_v28  ;;  %v5932_v34 = vld [vmem:[%s8461_s2] ss:$0 sm:$0xff] }
  0x49   : > { %6387 = vmatmul.mubr.msk.bf16.gmra.mxu0 %vm1597_vm1, %v1364_v37  ;;  %v1396_v46 = vrot.slane %v1368_v38, %v6766_v9  ;;  %v1405_v47 = vrot.slane %v1397_v40, %v6766_v9  ;;  %v901_v48 = vcombine.high %v5960_v36, %v5960_v36  ;;  %v908_v49 = vrot.slane %v5960_v36, %v6766_v9 }
  0x4a   : > { %v1416_v50 = vcombine.low %v870_v35, %v877_v41  ;;  %v5972_v51 = vcombine.high %v870_v35, %v877_v41  ;;  %v1424_v52 = vrot.slane %v1414_v42, %v6766_v9  ;;  %v1431_v53 = vrot.slane %v5971_v43, %v6766_v9  ;;  %v3271_v41 = vld [vmem:[%s8462_s3] sm:$0xf] }
  0x4b   : > { %v1398_v54 = vcombine.low %v1389_v39, %v1396_v46  ;;  %v915_v55 = vrot.slane %v901_v48, %v6766_v9  ;;  %v916_v56 = vcombine.high %v908_v49, %v908_v49  ;;  %v925_v57 = vcombine.high %v5961_v44, %v5961_v44 }
  0x4c   : > { %v1438_v58 = vrot.slane %v1416_v50, %v6766_v9  ;;  %v1445_v59 = vrot.slane %v5972_v51, %v6766_v9  ;;  %v1446_v60 = vcombine.low %v1424_v52, %v1431_v53  ;;  %v932_v61 = vrot.slane %v5961_v44, %v6766_v9 }
  0x4d   : > { %v1412_v62 = vrot.slane %v1398_v54, %v6766_v9  ;;  %v917_v63 = vcombine.high %v915_v55, %v915_v55  ;;  %v939_v0 = vrot.slane %v925_v57, %v6766_v9  ;;  %v1463_v1 = vcombine.low %v893_v45, %v908_v49 }
  0x4e   : > { %v1447_v3 = vcombine.low %v1438_v58, %v1445_v59  ;;  %v1454_v4 = vrot.slane %v1446_v60, %v6766_v9  ;;  %v940_v5 = vcombine.high %v932_v61, %v932_v61  ;;  %v1464_v6 = vcombine.low %v915_v55, %v916_v56 }
  0x4f   : > { %v1413_v8 = vcombine.low %v1405_v47, %v1412_v62  ;;  %v1465_v10 = vcombine.low %v917_v63, %v932_v61  ;;  %v1473_v11 = vrot.slane %v1463_v1, %v6766_v9  ;;  %v941_v12 = vcombine.high %v939_v0, %v939_v0 }
  0x50   : > { %v1461_v13 = vrot.slane %v1447_v3, %v6766_v9  ;;  %v1466_v14 = vcombine.low %v939_v0, %v940_v5  ;;  %v1480_v15 = vrot.slane %v1464_v6, %v6766_v9  ;;  %v955_v16 = vrot.slane %v5962_v2, %v6766_v9 }
  0x51   : > { %6390 = vmatprep.mubr.msk.bf16.mxu0 %vm1597_vm1, %v1413_v8  ;;  %v1487_v17 = vrot.slane %v1465_v10, %v6766_v9  ;;  %v3925_v29 = vsel %vm3526_vm2, %v6064_v28, 0  ;;  %v6687_v30 = vmov 1983009808   ;;  %v956_v36 = vcombine.high %v5932_v34, %v5932_v34 }
  0x52   : > { %v1462_v18 = vcombine.low %v1454_v4, %v1461_v13  ;;  %v1494_v19 = vrot.slane %v1466_v14, %v6766_v9  ;;  %v1495_v20 = vcombine.low %v1473_v11, %v1480_v15  ;;  %v1512_v21 = vcombine.low %v941_v12, %v955_v16  ;;  %6435 = vmatpush3.bf16.msra.mxu0 %v3925_v29 }
  0x53   : > { %v958_v31 = vunpack.c.l.s4 %v6687_v30  ;;  %v6959_v46 = vstv %s6952_s25  ;;  %v2373_v47 = vadd.s32 16, %v6763_v7  ;;  %v6979_v59 = vadd.s32 4294967295, %v6763_v7  ;;  %s8574_s25 = smov (!%p256_p7, %s6952_s25), 15 }
  0x54   : > { %6391 = vmatmul.mubr.msk.bf16.gmra.mxu0 %vm1597_vm1, %v1462_v18  ;;  %v1496_v22 = vcombine.low %v1487_v17, %v1494_v19  ;;  %v1503_v23 = vrot.slane %v1495_v20, %v6766_v9  ;;  %v1519_v24 = vrot.slane %v1512_v21, %v6766_v9  ;;  %v5989_v51 = vadd.s32 4294967295, %v6959_v46  ;;  %s5929_s26 = sshll.u32 %s8574_s25, 1 }
  0x55   : > { %v959_v32 = vunpack.c.0.s8 %v958_v31  ;;  %v6967_v54 = vadd.s32 4294967295, %v2373_v47  ;;  %v2353_v58 = vadd.s32 2, %v6959_v46  ;;  %v2354_v60 = vadd.s32 3, %v6959_v46  ;;  %s8321_s19 = sadd.s32 %s5930_s27, %s5929_s26 }
  0x56   : > { %v1510_v25 = vrot.slane %v1496_v22, %v6766_v9  ;;  %v1526_v26 = vrot.slane %v1519_v24, %v6766_v9  ;;  %v6031_v9 = vld [vmem:[%s8462_s3 + $0x4] sm:$0xf]  ;;  %vm2377_vm3 = vcmp.ge.s32.totalorder %v5989_v51, 0  ;;  %vm2387_vm4 = vcmp.lt.s32.totalorder %v5989_v51, 16  ;;  %s5931_s28 = sshll.u32 %s8321_s19, 2 }
  0x57   : > { %6568 = vmatprep.subr.msk.bf16.mxu1 %vm3526_vm2, %v6031_v9  ;;  %v3528_v33 = vsel %vm3526_vm2, %v6031_v9, 0  ;;  %v6947_v35 = vsub.s32 %v959_v32, %v6763_v7  ;;  %vm2442_vm5 = vcmp.lt.s32.totalorder %v6967_v54, 16  ;;  %v2355_v63 = vadd.s32 4, %v6959_v46  ;;  %vm7006_vm7 = vmand %vm2377_vm3, %vm2387_vm4  ;;  %s8355_s6 = scalar_lea.vmem %s8464_s5, %s5931_s28 }
  0x58   : > { %v1511_v27 = vcombine.low %v1503_v23, %v1510_v25  ;;  %v2357_v0 = vadd.s32 6, %v6959_v46  ;;  %v2356_v1 = vadd.s32 5, %v6959_v46  ;;  %v6997_v6 = vadd.s32 4294967295, %v2353_v58  ;;  %vm7027_vm10 = vmand %vm7006_vm7, %vm2442_vm5 }
  0x59   : > { %v963_v37 = vrot.slane %v5932_v34, %v6947_v35  ;;  %v970_v38 = vrot.slane %v956_v36, %v6947_v35  ;;  %v2358_v10 = vadd.s32 7, %v6959_v46  ;;  %v2360_v11 = vadd.s32 9, %v6959_v46 }
  0x5a   : > { %6394 = vmatprep.mubr.msk.bf16.mxu1 %vm1597_vm1, %v1511_v27  ;;  %vm2378_vm8 = vcmp.ge.s32.totalorder %v6959_v46, 0  ;;  %vm2388_vm9 = vcmp.lt.s32.totalorder %v6959_v46, 16  ;;  %v7013_v16 = vadd.s32 4294967295, %v2354_v60  ;;  %v7015_v18 = vadd.s32 4294967295, %v2355_v63 }
  0x5b   : > { %6395 = vmatmul.mubr.msk.bf16.vlgmr.msra.gmra.mxu1 %vm1597_vm1, %v1526_v26  ;;  %v971_v39 = vcombine.high %v963_v37, %v963_v37  ;;  %v972_v40 = vcombine.high %v970_v38, %v970_v38  ;;  %v1559_v42 = vcombine.low %v963_v37, %v963_v37  ;;  %v7017_v19 = vadd.s32 4294967295, %v2357_v0  ;;  %vm7057_vm15 = vmand %vm2378_vm8, %vm2388_vm9 }
  0x5c   : > { %6399 = vmatpush3.bf16.msra.mxu1 %v3528_v33  ;;  %v7019_v20 = vadd.s32 4294967295, %v2356_v1  ;;  %v2359_v21 = vadd.s32 8, %v6959_v46  ;;  %vm2407_vm11 = vcmp.ge.s32.totalorder %v6979_v59, 0  ;;  %v7034_v29 = vadd.s32 4294967295, %v2358_v10 }
  0x5d   : > { %v1560_v43 = vcombine.low %v971_v39, %v970_v38  ;;  %6569 = vmatprep.subr.msk.bf16.mxu1 %vm3526_vm2, %v3271_v41  ;;  %v1542_v44 = vcombine.low %v963_v37, %v971_v39  ;;  %v1543_v45 = vcombine.low %v970_v38, %v972_v40  ;;  %v1576_v48 = vcombine.low %v972_v40, %v963_v37  ;;  %vm7069_vm0 = vmand %vm7006_vm7, %vm2407_vm11 }
  0x5e   : > { %v1567_v49 = vrot.slane %v1559_v42, %v6947_v35  ;;  %v7036_v30 = vadd.s32 4294967295, %v2360_v11  ;;  %vm2379_vm12 = vcmp.ge.s32.totalorder %v6997_v6, 0  ;;  %vm2389_vm13 = vcmp.lt.s32.totalorder %v6997_v6, 16  ;;  %vm2413_vm1 = vmand %vm7057_vm15, %vm2407_vm11 }
  0x5f   : > { %v1574_v50 = vrot.slane %v1560_v43, %v6947_v35  ;;  %v1550_v52 = vrot.slane %v1542_v44, %v6947_v35  ;;  %v1557_v53 = vrot.slane %v1543_v45, %v6947_v35  ;;  %v6970_v55 = vrot.slane %v1576_v48, %v6947_v35  ;;  %vm7087_vm3 = vmand %vm2379_vm12, %vm2389_vm13 }
  0x60   : > { %v7042_v39 = vadd.s32 4294967295, %v2359_v21  ;;  %vm2451_vm4 = vmand %vm7087_vm3, %vm2442_vm5  ;;  %vm2380_vm8 = vcmp.ge.s32.totalorder %v7013_v16, 0  ;;  %vm2390_vm9 = vcmp.lt.s32.totalorder %v7013_v16, 16  ;;  %vm2381_vm12 = vcmp.ge.s32.totalorder %v7015_v18, 0 }
  0x61   : > { %v6972_v56 = vcombine.low %v1567_v49, %v1574_v50  ;;  %v6974_v57 = vcombine.low %v1550_v52, %v1557_v53  ;;  %v6983_v62 = vcombine.low %v6970_v55, %v1574_v50  ;;  %v6989_v3 = vcombine.low %v1557_v53, %v1567_v49 }
  0x62   : > { %v6992_v7 = vcombine.low %v6970_v55, %v1550_v52  ;;  %v6995_v4 = vcombine.low %v1574_v50, %v6970_v55  ;;  %v6999_v8 = vcombine.low %v1557_v53, %v1550_v52  ;;  %vm2391_vm13 = vcmp.lt.s32.totalorder %v7015_v18, 16 }
  0xea   : > { %v6376_v61 = vpop.f32.mrf.mxu0 }
  0xeb   : > { %v1681_v2 = vadd.f32 %v6376_v61, %v6972_v56 }
  0xec   : > { %v1672_v5 = vpop.f32.mrf.mxu0 }
  0xed   : > { %v1823_v12 = vcombine.high %v1681_v2, %v1681_v2  ;;  %v1830_v13 = vrot.slane %v1681_v2, %v6947_v35  ;;  %v1673_v15 = vadd.f32 %v1672_v5, %v6974_v57 }
  0xee   : > { %v6377_v17 = vpop.f32.mrf.mxu0 }
  0xef   : > { %v1837_v22 = vrot.slane %v1823_v12, %v6947_v35  ;;  %v1838_v23 = vcombine.high %v1830_v13, %v1830_v13  ;;  %v2269_v24 = vmax.f32 %v1830_v13, 0.0  ;;  %v1789_v25 = vcombine.high %v1673_v15, %v1673_v15 }
  0xf0   : > { %v1796_v27 = vrot.slane %v1673_v15, %v6947_v35  ;;  %v1684_v28 = vadd.f32 %v6377_v17, %v6983_v62  ;;  %v1675_v38 = vpop.f32.mrf.mxu0 }
  0xf1   : > { %v1839_v31 = vcombine.high %v1837_v22, %v1837_v22  ;;  %v2270_v9 = vmax.f32 %v1838_v23, 0.0  ;;  %v2271_v32 = vmax.f32 %v1837_v22, 0.0  ;;  %v2663_v33 = vrot.slane %v2269_v24, %v6947_v35 }
  0xf2   : > { %v1803_v34 = vrot.slane %v1789_v25, %v6947_v35  ;;  %v1804_v36 = vcombine.high %v1796_v27, %v1796_v27  ;;  %v1840_v37 = vcombine.high %v1684_v28, %v1684_v28  ;;  %v1847_v43 = vrot.slane %v1684_v28, %v6947_v35 }
  0xf3   : > { %v2272_v40 = vmax.f32 %v1839_v31, 0.0  ;;  %v2664_v41 = vcombine.low %v2270_v9, %v2271_v32  ;;  %v3065_v42 = vsel %vm7027_vm10, %v2663_v33, 0.0  ;;  %v2261_v47 = vmax.f32 %v1796_v27, 0.0  ;;  %vm7119_vm10 = vmand %vm7057_vm15, %vm2442_vm5 }
  0xf4   : > { %v6228_v44 = vpack.c.bf16 %v3065_v42, %v3065_v42  ;;  %v1805_v45 = vcombine.high %v1803_v34, %v1803_v34  ;;  %v2262_v48 = vmax.f32 %v1804_v36, 0.0  ;;  %v2263_v49 = vmax.f32 %v1803_v34, 0.0 }
  0xf5   : > { %v1854_v50 = vrot.slane %v1840_v37, %v6947_v35  ;;  %v1855_v51 = vcombine.high %v1847_v43, %v1847_v43  ;;  %v2273_v52 = vmax.f32 %v1847_v43, 0.0  ;;  %v2672_v53 = vrot.slane %v2664_v41, %v6947_v35 }
  0xf6   : > { %3227 = vst.msk [vmem:[#allocation2 + $0x8] sm:$0x1] %vm3226_vm6, %v6228_v44  ;;  %v2264_v58 = vmax.f32 %v1805_v45, 0.0  ;;  %v2623_v60 = vcombine.low %v2261_v47, %v2262_v48  ;;  %v1676_v61 = vadd.f32 %v1675_v38, %v6974_v57  ;;  %v6380_v63 = vpop.f32.mrf.mxu0 }
  0xf7   : > { %v1856_v0 = vcombine.high %v1854_v50, %v1854_v50  ;;  %v2274_v1 = vmax.f32 %v1855_v51, 0.0  ;;  %v2275_v2 = vmax.f32 %v1854_v50, 0.0  ;;  %v2665_v5 = vcombine.low %v2272_v40, %v2273_v52 }
  0xf8   : > { %v2624_v10 = vcombine.low %v2263_v49, %v2264_v58  ;;  %v2631_v11 = vrot.slane %v2623_v60, %v6947_v35  ;;  %v1806_v12 = vcombine.high %v1676_v61, %v1676_v61  ;;  %v1813_v13 = vrot.slane %v1676_v61, %v6947_v35  ;;  %v1688_v15 = vpop.f32.mrf.mxu0 }
  0xf9   : > { %v2276_v21 = vmax.f32 %v1856_v0, 0.0  ;;  %v2679_v22 = vrot.slane %v2665_v5, %v6947_v35  ;;  %v7062_v23 = vcombine.low %v2274_v1, %v2275_v2  ;;  %v1697_v24 = vadd.f32 %v6380_v63, %v6989_v3 }
  0xfa   : > { %v2638_v46 = vrot.slane %v2624_v10, %v6947_v35  ;;  %v1820_v26 = vrot.slane %v1806_v12, %v6947_v35  ;;  %v1821_v27 = vcombine.high %v1813_v13, %v1813_v13  ;;  %v2265_v28 = vmax.f32 %v1813_v13, 0.0  ;;  %v6381_v31 = vpop.f32.mrf.mxu0 }
  0xfb   : > { %v2680_v9 = vcombine.low %v2672_v53, %v2679_v22  ;;  %v2689_v32 = vrot.slane %v7062_v23, %v6947_v35  ;;  %v1891_v33 = vcombine.high %v1697_v24, %v1697_v24  ;;  %v1898_v34 = vrot.slane %v1697_v24, %v6947_v35 }
  0xfc   : > { %v2639_v36 = vcombine.low %v2631_v11, %v2638_v46  ;;  %v1822_v37 = vcombine.high %v1820_v26, %v1820_v26  ;;  %v2266_v38 = vmax.f32 %v1821_v27, 0.0  ;;  %v2267_v40 = vmax.f32 %v1820_v26, 0.0  ;;  %v1691_v41 = vpop.f32.mrf.mxu0 }
  0xfd   : > { %v1905_v42 = vrot.slane %v1891_v33, %v6947_v35  ;;  %v1906_v43 = vcombine.high %v1898_v34, %v1898_v34  ;;  %v2285_v44 = vmax.f32 %v1898_v34, 0.0  ;;  %v1689_v47 = vadd.f32 %v1688_v15, %v6992_v7 }
  0xfe   : > { %v3063_v48 = vsel %vm7069_vm0, %v2639_v36, 0.0  ;;  %v2268_v49 = vmax.f32 %v1822_v37, 0.0  ;;  %v2640_v50 = vcombine.low %v2265_v28, %v2266_v38  ;;  %v3066_v51 = vsel %vm2413_vm1, %v2680_v9, 0.0  ;;  %vm2416_vm0 = vmand %vm7087_vm3, %vm2407_vm11 }
  0xff   : > { %v6226_v52 = vpack.c.bf16 %v3063_v48, %v3063_v48  ;;  %v1907_v53 = vcombine.high %v1905_v42, %v1905_v42  ;;  %v2286_v58 = vmax.f32 %v1906_v43, 0.0  ;;  %v2287_v60 = vmax.f32 %v1905_v42, 0.0  ;;  %v7094_v61 = vpop.f32.mrf.mxu0 }
 0x100   : > { %v2641_v63 = vcombine.low %v2267_v40, %v2268_v49  ;;  %v2648_v6 = vrot.slane %v2640_v50, %v6947_v35  ;;  %v1857_v0 = vcombine.high %v1689_v47, %v1689_v47  ;;  %v1864_v1 = vrot.slane %v1689_v47, %v6947_v35  ;;  %v6106_v47 = vld [vmem:[%s8462_s3 + $0x10] sm:$0xf] }
 0x101   : > { %3224 = vst.msk [vmem:[#allocation2] sm:$0xf] %vm3223_vm14, %v6226_v52  ;;  %v2288_v2 = vmax.f32 %v1907_v53, 0.0  ;;  %v7103_v5 = vcombine.low %v2285_v44, %v2286_v58  ;;  %v2745_v10 = vrot.slane %v2287_v60, %v6947_v35  ;;  %v6229_v11 = vpack.c.bf16 %v3066_v51, %v3066_v51  ;;  %v1704_v27 = vpop.f32.mrf.mxu0  ;;  %6572 = vmatprep.subr.msk.bf16.mxu0 %vm3526_vm2, %v6106_v47 }
 0x102   : > { %v2655_v12 = vrot.slane %v2641_v63, %v6947_v35  ;;  %v1871_v13 = vrot.slane %v1857_v0, %v6947_v35  ;;  %v1872_v15 = vcombine.high %v1864_v1, %v1864_v1  ;;  %v2277_v22 = vmax.f32 %v1864_v1, 0.0 }
 0x103   : > { %v2737_v24 = vrot.slane %v7103_v5, %v6947_v35  ;;  %v3071_v25 = vsel %vm2451_vm4, %v2745_v10, 0.0  ;;  %3228 = vst.msk [vmem:[#allocation2 + $0xc] sm:$0xf] %vm3223_vm14, %v6229_v11  ;;  %v1700_v46 = vadd.f32 %v6381_v31, %v6995_v4  ;;  %v1692_v26 = vadd.f32 %v1691_v41, %v6999_v8  ;;  %v6385_v51 = vpop.f32.mrf.mxu0 }
 0x104   : > { %v2656_v28 = vcombine.low %v2648_v6, %v2655_v12  ;;  %v6234_v9 = vpack.c.bf16 %v3071_v25, %v3071_v25  ;;  %v1873_v33 = vcombine.high %v1871_v13, %v1871_v13  ;;  %v2278_v34 = vmax.f32 %v1872_v15, 0.0 }
 0x105   : > { %v2279_v36 = vmax.f32 %v1871_v13, 0.0  ;;  %v2682_v38 = vcombine.low %v2276_v21, %v2277_v22  ;;  %v1908_v40 = vcombine.high %v1700_v46, %v1700_v46  ;;  %v1915_v31 = vrot.slane %v1700_v46, %v6947_v35  ;;  %v1707_v46 = vpop.f32.mrf.mxu0 }
 0x106   : > { %v3064_v41 = vsel %vm7006_vm7, %v2656_v28, 0.0  ;;  %3233 = vst.msk [vmem:[#allocation2 + $0x20] sm:$0x1] %vm3226_vm6, %v6234_v9  ;;  %v2280_v42 = vmax.f32 %v1873_v33, 0.0  ;;  %v2704_v43 = vrot.slane %v2278_v34, %v6947_v35  ;;  %v1874_v44 = vcombine.high %v1692_v26, %v1692_v26  ;;  %vm7150_vm7 = vmand %vm2380_vm8, %vm2390_vm9 }
 0x107   : > { %v6227_v48 = vpack.c.bf16 %v3064_v41, %v3064_v41  ;;  %v2696_v49 = vrot.slane %v2682_v38, %v6947_v35  ;;  %v1922_v21 = vrot.slane %v1908_v40, %v6947_v35  ;;  %v1923_v50 = vcombine.high %v1915_v31, %v1915_v31  ;;  %vm2454_vm1 = vmand %vm7150_vm7, %vm2442_vm5 }
 0x108   : > { %v2705_v14 = vcombine.low %v2279_v36, %v2280_v42  ;;  %v3068_v52 = vsel %vm7119_vm10, %v2704_v43, 0.0  ;;  %v2289_v53 = vmax.f32 %v1915_v31, 0.0  ;;  %v1881_v58 = vrot.slane %v1692_v26, %v6947_v35 }
 0x109   : > { %3225 = vst.msk [vmem:[#allocation2 + $0x4] sm:$0xf] %vm3223_vm14, %v6227_v48  ;;  %v2697_v60 = vcombine.low %v2689_v32, %v2696_v49  ;;  %v6231_v63 = vpack.c.bf16 %v3068_v52, %v3068_v52  ;;  %v1924_v6 = vcombine.high %v1922_v21, %v1922_v21  ;;  %v2290_v0 = vmax.f32 %v1923_v50, 0.0  ;;  %v7171_v41 = vpop.f32.mrf.mxu0 }
 0x10a   : > { %v2713_v1 = vrot.slane %v2705_v14, %v6947_v35  ;;  %v2291_v10 = vmax.f32 %v1922_v21, 0.0  ;;  %v2746_v11 = vcombine.low %v2288_v2, %v2289_v53  ;;  %v1888_v12 = vrot.slane %v1874_v44, %v6947_v35 }
 0x10b   : > { %v3067_v13 = vsel %vm7057_vm15, %v2697_v60, 0.0  ;;  %3230 = vst.msk [vmem:[#allocation2 + $0x14] sm:$0x1] %vm3226_vm6, %v6231_v63  ;;  %v2292_v15 = vmax.f32 %v1924_v6, 0.0  ;;  %v1889_v22 = vcombine.high %v1881_v58, %v1881_v58  ;;  %v2281_v25 = vmax.f32 %v1881_v58, 0.0  ;;  %vm2419_vm15 = vmand %vm7150_vm7, %vm2407_vm11 }
 0x10c   : > { %v6230_v23 = vpack.c.bf16 %v3067_v13, %v3067_v13  ;;  %v2747_v2 = vcombine.low %v2290_v0, %v2291_v10  ;;  %v2754_v26 = vrot.slane %v2746_v11, %v6947_v35  ;;  %v1890_v17 = vcombine.high %v1888_v12, %v1888_v12  ;;  %v7182_v0 = vpop.f32.mrf.mxu0 }
 0x10d   : > { %v2282_v28 = vmax.f32 %v1889_v22, 0.0  ;;  %v2283_v9 = vmax.f32 %v1888_v12, 0.0  ;;  %v1713_v33 = vadd.f32 %v7094_v61, %v6974_v57  ;;  %v1705_v34 = vadd.f32 %v1704_v27, %v6995_v4 }
 0x10e   : > { %3229 = vst.msk [vmem:[#allocation2 + $0x10] sm:$0xf] %vm3223_vm14, %v6230_v23  ;;  %v2761_v36 = vrot.slane %v2747_v2, %v6947_v35  ;;  %v2284_v16 = vmax.f32 %v1890_v17, 0.0  ;;  %v1716_v37 = vadd.f32 %v6385_v51, %v6972_v56  ;;  %v7164_v38 = vadd.f32 %v1707_v46, %v6974_v57 }
 0x10f   : > { %v2706_v61 = vcombine.low %v2281_v25, %v2282_v28  ;;  %v1959_v27 = vcombine.high %v1713_v33, %v1713_v33  ;;  %v1966_v40 = vrot.slane %v1713_v33, %v6947_v35  ;;  %v1925_v31 = vcombine.high %v1705_v34, %v1705_v34  ;;  %v6389_v33 = vpop.f32.mrf.mxu0 }
 0x110   : > { %v2762_v42 = vcombine.low %v2754_v26, %v2761_v36  ;;  %v2722_v43 = vcombine.low %v2283_v9, %v2284_v16  ;;  %v1932_v44 = vrot.slane %v1705_v34, %v6947_v35  ;;  %v1976_v47 = vcombine.high %v1716_v37, %v1716_v37 }
 0x111   : > { %v2720_v48 = vrot.slane %v2706_v61, %v6947_v35  ;;  %v1973_v49 = vrot.slane %v1959_v27, %v6947_v35  ;;  %v1974_v21 = vcombine.high %v1966_v40, %v1966_v40  ;;  %v2301_v50 = vmax.f32 %v1966_v40, 0.0  ;;  %v1723_v18 = vpop.f32.mrf.mxu0 }
 0x112   : > { %v3072_v51 = vsel %vm2419_vm15, %v2762_v42, 0.0  ;;  %v2730_v14 = vrot.slane %v2722_v43, %v6947_v35  ;;  %v1939_v52 = vrot.slane %v1925_v31, %v6947_v35  ;;  %v1940_v53 = vcombine.high %v1932_v44, %v1932_v44 }
 0x113   : > { %v6235_v58 = vpack.c.bf16 %v3072_v51, %v3072_v51  ;;  %v2721_v60 = vcombine.low %v2713_v1, %v2720_v48  ;;  %v1975_v63 = vcombine.high %v1973_v49, %v1973_v49  ;;  %v2302_v6 = vmax.f32 %v1974_v21, 0.0 }
 0x114   : > { %v2738_v10 = vcombine.low %v2730_v14, %v2737_v24  ;;  %v2303_v11 = vmax.f32 %v1973_v49, 0.0  ;;  %v1941_v12 = vcombine.high %v1939_v52, %v1939_v52  ;;  %v2293_v13 = vmax.f32 %v1932_v44, 0.0 }
 0x115   : > { %3234 = vst.msk [vmem:[#allocation2 + $0x24] sm:$0xf] %vm3223_vm14, %v6235_v58  ;;  %v3069_v22 = vsel %vm2416_vm0, %v2721_v60, 0.0  ;;  %v2304_v25 = vmax.f32 %v1975_v63, 0.0  ;;  %v2804_v46 = vcombine.low %v2301_v50, %v2302_v6  ;;  %v2294_v23 = vmax.f32 %v1940_v53, 0.0 }
 0x116   : > { %v3070_v1 = vsel %vm7087_vm3, %v2738_v10, 0.0  ;;  %v6232_v2 = vpack.c.bf16 %v3069_v22, %v3069_v22  ;;  %v2295_v26 = vmax.f32 %v1939_v52, 0.0  ;;  %v2296_v17 = vmax.f32 %v1941_v12, 0.0  ;;  %vm7206_vm3 = vmand %vm2381_vm12, %vm2391_vm13 }
 0x117   : > { %v6233_v28 = vpack.c.bf16 %v3070_v1, %v3070_v1  ;;  %v2805_v9 = vcombine.low %v2303_v11, %v2304_v25  ;;  %v2812_v5 = vrot.slane %v2804_v46, %v6947_v35  ;;  %v2763_v24 = vcombine.low %v2292_v15, %v2293_v13  ;;  %vm2457_vm9 = vmand %vm7206_vm3, %vm2442_vm5  ;;  %v6392_v1 = vpop.f32.mrf.mxu0 }
 0x118   : > { %3231 = vst.msk [vmem:[#allocation2 + $0x18] sm:$0xf] %vm3223_vm14, %v6232_v2  ;;  %v2764_v34 = vcombine.low %v2294_v23, %v2295_v26  ;;  %v2786_v45 = vrot.slane %v2296_v17, %v6947_v35  ;;  %v1983_v36 = vrot.slane %v1716_v37, %v6947_v35  ;;  %v1990_v16 = vrot.slane %v1976_v47, %v6947_v35 }
 0x119   : > { %3232 = vst.msk [vmem:[#allocation2 + $0x1c] sm:$0xf] %vm3223_vm14, %v6233_v28  ;;  %v2819_v61 = vrot.slane %v2805_v9, %v6947_v35  ;;  %v2771_v27 = vrot.slane %v2763_v24, %v6947_v35  ;;  %v1942_v40 = vcombine.high %v7164_v38, %v7164_v38  ;;  %v1949_v37 = vrot.slane %v7164_v38, %v6947_v35 }
 0x11a   : > { %v2778_v31 = vrot.slane %v2764_v34, %v6947_v35  ;;  %v3074_v42 = vsel %vm2454_vm1, %v2786_v45, 0.0  ;;  %v1991_v43 = vcombine.high %v1983_v36, %v1983_v36  ;;  %v1992_v44 = vcombine.high %v1990_v16, %v1990_v16 }
 0x11b   : > { %v2820_v47 = vcombine.low %v2812_v5, %v2819_v61  ;;  %v6237_v48 = vpack.c.bf16 %v3074_v42, %v3074_v42  ;;  %v2305_v49 = vmax.f32 %v1983_v36, 0.0  ;;  %v2307_v21 = vmax.f32 %v1990_v16, 0.0  ;;  %v7217_v50 = vpop.f32.mrf.mxu1 }
 0x11c   : > { %vm2382_vm4 = vcmp.ge.s32.totalorder %v7019_v20, 0  ;;  %vm2392_vm8 = vcmp.lt.s32.totalorder %v7019_v20, 16  ;;  %v2779_v51 = vcombine.low %v2771_v27, %v2778_v31  ;;  %v2306_v14 = vmax.f32 %v1991_v43, 0.0 }
 0x11d   : > { %v2308_v52 = vmax.f32 %v1992_v44, 0.0  ;;  %v1956_v38 = vrot.slane %v1942_v40, %v6947_v35  ;;  %3236 = vst.msk [vmem:[#allocation2 + $0x2c] sm:$0x1] %vm3226_vm6, %v6237_v48  ;;  %v2827_v53 = vrot.slane %v2305_v49, %v6947_v35  ;;  %v3076_v58 = vsel %vm7206_vm3, %v2820_v47, 0.0  ;;  %v7230_v6 = vpop.f32.mrf.mxu1  ;;  %vm7260_vm13 = vmand %vm2382_vm4, %vm2392_vm8 }
 0x11e   : > { %v1957_v60 = vcombine.high %v1949_v37, %v1949_v37  ;;  %v2297_v63 = vmax.f32 %v1949_v37, 0.0  ;;  %vm2383_vm10 = vcmp.ge.s32.totalorder %v7017_v19, 0  ;;  %vm2393_vm12 = vcmp.lt.s32.totalorder %v7017_v19, 16  ;;  %vm7280_vm0 = vmand %vm7260_vm13, %vm2407_vm11 }
 0x11f   : > { %v3073_v10 = vsel %vm7150_vm7, %v2779_v51, 0.0  ;;  %v2828_v11 = vcombine.low %v2306_v14, %v2307_v21  ;;  %v6239_v12 = vpack.c.bf16 %v3076_v58, %v3076_v58  ;;  %v1958_v13 = vcombine.high %v1956_v38, %v1956_v38  ;;  %v6397_v2 = vpop.f32.mrf.mxu1  ;;  %vm2422_vm7 = vmand %vm7206_vm3, %vm2407_vm11 }
 0x120   : > { %v6236_v22 = vpack.c.bf16 %v3073_v10, %v3073_v10  ;;  %v3077_v25 = vsel %vm2457_vm9, %v2827_v53, 0.0  ;;  %v2298_v46 = vmax.f32 %v1957_v60, 0.0  ;;  %v2299_v23 = vmax.f32 %v1956_v38, 0.0  ;;  %vm7271_vm15 = vmand %vm2383_vm10, %vm2393_vm12  ;;  %v7503_v54 = vld [vmem:[#allocation2 + $0x1c] sm:$0xf] }
 0x121   : > { %v2836_v26 = vrot.slane %v2828_v11, %v6947_v35  ;;  %v6240_v17 = vpack.c.bf16 %v3077_v25, %v3077_v25  ;;  %3238 = vst.msk [vmem:[#allocation2 + $0x34] sm:$0xf] %vm3223_vm14, %v6239_v12  ;;  %v2300_v28 = vmax.f32 %v1958_v13, 0.0  ;;  %v1729_v9 = vadd.f32 %v7171_v41, %v6999_v8  ;;  %vm2463_vm1 = vmand %vm7271_vm15, %vm2442_vm5 }
 0x122   : > { %3235 = vst.msk [vmem:[#allocation2 + $0x28] sm:$0xf] %vm3223_vm14, %v6236_v22  ;;  %v2787_v32 = vcombine.low %v2297_v63, %v2298_v46  ;;  %v1721_v5 = vadd.f32 %v7182_v0, %v6983_v62  ;;  %v1732_v24 = vadd.f32 %v6389_v33, %v6989_v3  ;;  %v1724_v34 = vadd.f32 %v1723_v18, %v6992_v7  ;;  %vm2460_vm8 = vmand %vm7260_vm13, %vm2442_vm5 }
 0x123   : > { %3239 = vst.msk [vmem:[#allocation2 + $0x38] sm:$0x1] %vm3226_vm6, %v6240_v17  ;;  %v2788_v45 = vcombine.low %v2299_v23, %v2300_v28  ;;  %v2027_v36 = vcombine.high %v1729_v9, %v1729_v9  ;;  %v2034_v16 = vrot.slane %v1729_v9, %v6947_v35  ;;  %v1745_v61 = vadd.f32 %v6392_v1, %v6974_v57  ;;  %vm2428_vm12 = vmand %vm7271_vm15, %vm2407_vm11 }
 0x124   : > { %v2795_v8 = vrot.slane %v2787_v32, %v6947_v35  ;;  %v1993_v41 = vcombine.high %v1721_v5, %v1721_v5  ;;  %v2000_v27 = vrot.slane %v1721_v5, %v6947_v35  ;;  %v2044_v40 = vcombine.high %v1732_v24, %v1732_v24 }
 0x125   : > { %v2802_v0 = vrot.slane %v2788_v45, %v6947_v35  ;;  %v2041_v3 = vrot.slane %v2027_v36, %v6947_v35  ;;  %v2042_v33 = vcombine.high %v2034_v16, %v2034_v16  ;;  %v2317_v7 = vmax.f32 %v2034_v16, 0.0  ;;  %v1736_v36 = vpop.f32.mrf.mxu0 }
 0x126   : > { %v2007_v37 = vrot.slane %v1993_v41, %v6947_v35  ;;  %v2008_v31 = vcombine.high %v2000_v27, %v2000_v27  ;;  %v2309_v42 = vmax.f32 %v2000_v27, 0.0  ;;  %v2051_v43 = vrot.slane %v1732_v24, %v6947_v35 }
 0x127   : > { %v2803_v44 = vcombine.low %v2795_v8, %v2802_v0  ;;  %v2043_v47 = vcombine.high %v2041_v3, %v2041_v3  ;;  %v2318_v48 = vmax.f32 %v2042_v33, 0.0  ;;  %v2319_v49 = vmax.f32 %v2041_v3, 0.0 }
 0x128   : > { %v2009_v15 = vcombine.high %v2007_v37, %v2007_v37  ;;  %v2310_v18 = vmax.f32 %v2008_v31, 0.0  ;;  %v2311_v51 = vmax.f32 %v2007_v37, 0.0  ;;  %v2829_v14 = vcombine.low %v2308_v52, %v2309_v42 }
 0x129   : > { %v3075_v38 = vsel %vm2422_vm7, %v2803_v44, 0.0  ;;  %v2320_v53 = vmax.f32 %v2043_v47, 0.0  ;;  %v7264_v58 = vcombine.low %v2317_v7, %v2318_v48  ;;  %v2058_v60 = vrot.slane %v2044_v40, %v6947_v35  ;;  %v6393_v48 = vpop.f32.mrf.mxu0 }
 0x12a   : > { %v6238_v63 = vpack.c.bf16 %v3075_v38, %v3075_v38  ;;  %v2312_v10 = vmax.f32 %v2009_v15, 0.0  ;;  %v2843_v11 = vrot.slane %v2829_v14, %v6947_v35  ;;  %v2845_v12 = vcombine.low %v2310_v18, %v2311_v51 }
 0x12b   : > { %v2884_v19 = vrot.slane %v7264_v58, %v6947_v35  ;;  %v2886_v13 = vcombine.low %v2319_v49, %v2320_v53  ;;  %v2059_v22 = vcombine.high %v2051_v43, %v2051_v43  ;;  %v2060_v25 = vcombine.high %v2058_v60, %v2058_v60 }
 0x12c   : > { %3237 = vst.msk [vmem:[#allocation2 + $0x30] sm:$0xf] %vm3223_vm14, %v6238_v63  ;;  %v2844_v46 = vcombine.low %v2836_v26, %v2843_v11  ;;  %v2853_v23 = vrot.slane %v2845_v12, %v6947_v35  ;;  %v2321_v1 = vmax.f32 %v2051_v43, 0.0  ;;  %v2323_v2 = vmax.f32 %v2058_v60, 0.0 }
 0x12d   : > { %v2894_v17 = vrot.slane %v2886_v13, %v6947_v35  ;;  %v2322_v28 = vmax.f32 %v2059_v22, 0.0  ;;  %v7289_v9 = vmax.f32 %v2060_v25, 0.0  ;;  %v2010_v32 = vcombine.high %v1724_v34, %v1724_v34 }
 0x12e   : > { %v2909_v5 = vrot.slane %v2323_v2, %v6947_v35  ;;  %v2017_v24 = vrot.slane %v1724_v34, %v6947_v35  ;;  %v3078_v26 = vsel %vm7280_vm0, %v2844_v46, 0.0  ;;  %v2095_v45 = vcombine.high %v1745_v61, %v1745_v61 }
 0x12f   : > { %v2887_v16 = vcombine.low %v2321_v1, %v2322_v28  ;;  %v2024_v8 = vrot.slane %v2010_v32, %v6947_v35  ;;  %v6241_v41 = vpack.c.bf16 %v3078_v26, %v3078_v26  ;;  %v2102_v27 = vrot.slane %v1745_v61, %v6947_v35 }
 0x130   : > { %v3083_v40 = vsel %vm2463_vm1, %v2909_v5, 0.0  ;;  %v2025_v0 = vcombine.high %v2017_v24, %v2017_v24  ;;  %v2313_v3 = vmax.f32 %v2017_v24, 0.0  ;;  %v2109_v33 = vrot.slane %v2095_v45, %v6947_v35 }
 0x131   : > { %v2901_v7 = vrot.slane %v2887_v16, %v6947_v35  ;;  %v6246_v37 = vpack.c.bf16 %v3083_v40, %v3083_v40  ;;  %v2026_v34 = vcombine.high %v2024_v8, %v2024_v8  ;;  %v2315_v31 = vmax.f32 %v2024_v8, 0.0  ;;  %3240 = vst.msk [vmem:[#allocation2 + $0x3c] sm:$0xf] %vm3223_vm14, %v6241_v41  ;;  %v1739_v41 = vpop.f32.mrf.mxu0 }
 0x132   : > { %v2314_v42 = vmax.f32 %v2025_v0, 0.0  ;;  %v2846_v43 = vcombine.low %v2312_v10, %v2313_v3  ;;  %v2110_v44 = vcombine.high %v2102_v27, %v2102_v27  ;;  %v2111_v47 = vcombine.high %v2109_v33, %v2109_v33 }
 0x133   : > { %vm3817_vm3 = vcmask 1042432   ;;  %vm3818_vm4 = vcmask 1046532   ;;  %v2902_v61 = vcombine.low %v2894_v17, %v2901_v7  ;;  %3245 = vst.msk [vmem:[#allocation2 + $0x50] sm:$0x1] %vm3226_vm6, %v6246_v37  ;;  %v2316_v49 = vmax.f32 %v2026_v34, 0.0 }
 0x134   : > { %v2333_v15 = vmax.f32 %v2102_v27, 0.0  ;;  %v2335_v18 = vmax.f32 %v2109_v33, 0.0  ;;  %vm2384_vm9 = vcmp.ge.s32.totalorder %v7034_v29, 0  ;;  %vm2394_vm10 = vcmp.lt.s32.totalorder %v7034_v29, 16  ;;  %v7338_v27 = vld [vmem:[#allocation2 + $0x8] sm:$0x1]  ;;  %vm7347_vm0 = vmor %vm3817_vm3, %vm3818_vm4 }
 0x135   : > { %v2860_v51 = vrot.slane %v2846_v43, %v6947_v35  ;;  %v2868_v14 = vrot.slane %v2314_v42, %v6947_v35  ;;  %v2334_v38 = vmax.f32 %v2110_v44, 0.0  ;;  %v2336_v53 = vmax.f32 %v2111_v47, 0.0  ;;  %v7341_v7 = vld [vmem:[#allocation2 + $0x4] sm:$0xf]  ;;  %v3791_v37 = vld [vmem:[#allocation2] sm:$0xe]  ;;  %vm7356_vm1 = vmand %vm2384_vm9, %vm2394_vm10 }
 0x136   : > { %v3082_v60 = vsel %vm7271_vm15, %v2902_v61, 0.0  ;;  %v2869_v63 = vcombine.low %v2315_v31, %v2316_v49  ;;  %v1737_v10 = vadd.f32 %v1736_v36, %v6995_v4  ;;  %v1748_v11 = vadd.f32 %v6393_v48, %v6974_v57  ;;  %vm7372_vm3 = vmand %vm7356_vm1, %vm2407_vm11 }
 0x137   : > { %v6245_v12 = vpack.c.bf16 %v3082_v60, %v3082_v60  ;;  %v2861_v52 = vcombine.low %v2853_v23, %v2860_v51  ;;  %v3080_v13 = vsel %vm2460_vm8, %v2868_v14, 0.0  ;;  %v2951_v22 = vcombine.low %v2333_v15, %v2334_v38  ;;  %v3792_v15 = vld [vmem:[#allocation2 + $0xc] sm:$0xe] }
 0x138   : > { %v2877_v25 = vrot.slane %v2869_v63, %v6947_v35  ;;  %v6243_v46 = vpack.c.bf16 %v3080_v13, %v3080_v13  ;;  %v2952_v1 = vcombine.low %v2335_v18, %v2336_v53  ;;  %v2061_v2 = vcombine.high %v1737_v10, %v1737_v10 }
 0x139   : > { %3244 = vst.msk [vmem:[#allocation2 + $0x4c] sm:$0xf] %vm3223_vm14, %v6245_v12  ;;  %v3079_v17 = vsel %vm7260_vm13, %v2861_v52, 0.0  ;;  %v2959_v57 = vrot.slane %v2951_v22, %v6947_v35  ;;  %v2068_v23 = vrot.slane %v1737_v10, %v6947_v35  ;;  %v2112_v28 = vcombine.high %v1748_v11, %v1748_v11  ;;  %v7366_v10 = vld [vmem:[#allocation2 + $0x10] sm:$0xf] }
 0x13a   : > { %v2885_v32 = vcombine.low %v2877_v25, %v2884_v19  ;;  %v6242_v5 = vpack.c.bf16 %v3079_v17, %v3079_v17  ;;  %3242 = vst.msk [vmem:[#allocation2 + $0x44] sm:$0x1] %vm3226_vm6, %v6243_v46  ;;  %v2966_v24 = vrot.slane %v2952_v1, %v6947_v35  ;;  %v2075_v20 = vrot.slane %v2061_v2, %v6947_v35 }
 0x13b   : > { %v2076_v26 = vcombine.high %v2068_v23, %v2068_v23  ;;  %v2325_v45 = vmax.f32 %v2068_v23, 0.0  ;;  %v2119_v21 = vrot.slane %v1748_v11, %v6947_v35  ;;  %v2126_v36 = vrot.slane %v2112_v28, %v6947_v35  ;;  %v7386_v28 = vld [vmem:[#allocation2] sm:$0xf] }
 0x13c   : > { %v3081_v16 = vsel %vm2428_vm12, %v2885_v32, 0.0  ;;  %3241 = vst.msk [vmem:[#allocation2 + $0x40] sm:$0xf] %vm3223_vm14, %v6242_v5  ;;  %v7336_v8 = vcombine.low %v2959_v57, %v2966_v24  ;;  %v2077_v58 = vcombine.high %v2075_v20, %v2075_v20  ;;  %v2327_v19 = vmax.f32 %v2075_v20, 0.0  ;;  %vm7396_vm12 = vmand %vm7356_vm1, %vm2442_vm5 }
 0x13d   : > { %v6244_v40 = vpack.c.bf16 %v3081_v16, %v3081_v16  ;;  %v2326_v0 = vmax.f32 %v2076_v26, 0.0  ;;  %v2910_v3 = vcombine.low %v7289_v9, %v2325_v45  ;;  %v2127_v33 = vcombine.high %v2119_v21, %v2119_v21  ;;  %v7390_v26 = vld [vmem:[#allocation2 + $0x14] sm:$0x1]  ;;  %v7838_v9 = vld [vmem:[%s8462_s3 + $0x1c] sm:$0xf] }
 0x13e   : > { %vm3501_vm7 = vcmask 64512   ;;  %vm2385_vm13 = vcmp.ge.s32.totalorder %v7042_v39, 0  ;;  %vm2395_vm15 = vcmp.lt.s32.totalorder %v7042_v39, 16  ;;  %v2328_v34 = vmax.f32 %v2077_v58, 0.0 }
 0x13f   : > { %v2128_v31 = vcombine.high %v2126_v36, %v2126_v36  ;;  %v2337_v42 = vmax.f32 %v2119_v21, 0.0  ;;  %v2339_v43 = vmax.f32 %v2126_v36, 0.0  ;;  %3243 = vst.msk [vmem:[#allocation2 + $0x48] sm:$0xf] %vm3223_vm14, %v6244_v40  ;;  %v2911_v47 = vcombine.low %v2326_v0, %v2327_v19 }
 0x140   : > { %v2918_v48 = vrot.slane %v2910_v3, %v6947_v35  ;;  %v2338_v61 = vmax.f32 %v2127_v33, 0.0  ;;  %v1740_v49 = vadd.f32 %v1739_v41, %v6995_v4  ;;  %v6065_v51 = vrot.slane %v3791_v37, 9 }
 0x141   : > { %v2340_v18 = vmax.f32 %v2128_v31, 0.0  ;;  %v3822_v14 = vrot.slane %v7341_v7, 5  ;;  %v3825_v38 = vrot.slane %v7338_v27, 5  ;;  %v2925_v53 = vrot.slane %v2911_v47, %v6947_v35 }
 0x142   : > { %v2968_v29 = vcombine.low %v2337_v42, %v2338_v61  ;;  %v2078_v60 = vcombine.high %v1740_v49, %v1740_v49  ;;  %v2085_v63 = vrot.slane %v1740_v49, %v6947_v35  ;;  %v6066_v13 = vrot.slane %v3792_v15, 9 }
 0x143   : > { %v2969_v11 = vcombine.low %v2339_v43, %v2340_v18  ;;  %v3823_v12 = vsel %vm7347_vm0, %v6065_v51, %v3822_v14  ;;  %v3824_v52 = vrot.slane %v3822_v14, 4  ;;  %vm3282_vm4 = vsmask.f32 3328  ;;  %v7514_v14 = vld [vmem:[#allocation2 + $0x18] sm:$0xf] }
 0x144   : > { %vm3283_vm8 = vsmask.f32 7440  ;;  %v2926_v22 = vcombine.low %v2918_v48, %v2925_v53  ;;  %v2976_v25 = vrot.slane %v2968_v29, %v6947_v35  ;;  %v2092_v46 = vrot.slane %v2078_v60, %v6947_v35  ;;  %v6644_v60 = vld [vmem:[%s8462_s3] sm:$0xf] }
 0x145   : > { %v2093_v1 = vcombine.high %v2085_v63, %v2085_v63  ;;  %vm2386_vm9 = vcmp.ge.s32.totalorder %v7036_v30, 0  ;;  %vm2396_vm10 = vcmp.lt.s32.totalorder %v7036_v30, 16  ;;  %v2983_v2 = vrot.slane %v2969_v11, %v6947_v35 }
 0x146   : > { %v2329_v17 = vmax.f32 %v2085_v63, 0.0  ;;  %v3826_v57 = vsel %vm7347_vm0, %v3824_v52, %v3825_v38  ;;  %v3829_v23 = vrot.slane %v7366_v10, 5  ;;  %v3084_v32 = vsel %vm7372_vm3, %v2926_v22, 0.0  ;;  %vm7413_vm3 = vmand %vm2385_vm13, %vm2395_vm15 }
 0x147   : > { %v2094_v5 = vcombine.high %v2092_v46, %v2092_v46  ;;  %v2330_v24 = vmax.f32 %v2093_v1, 0.0  ;;  %v2331_v20 = vmax.f32 %v2092_v46, 0.0  ;;  %v6247_v45 = vpack.c.bf16 %v3084_v32, %v3084_v32  ;;  %vm7433_vm13 = vmand %vm7413_vm3, %vm2407_vm11 }
 0x148   : > { %v2984_v21 = vcombine.low %v2976_v25, %v2983_v2  ;;  %v2927_v36 = vcombine.low %v2328_v34, %v2329_v17  ;;  %v6073_v16 = vcombine.low %v3823_v12, %v3826_v57  ;;  %v3830_v40 = vsel %vm7347_vm0, %v6066_v13, %v3829_v23  ;;  %vm7450_vm15 = vmor %vm3282_vm4, %vm3283_vm8 }
 0x149   : > { %v2332_v58 = vmax.f32 %v2094_v5, 0.0  ;;  %v2928_v41 = vcombine.low %v2330_v24, %v2331_v20  ;;  %v3831_v0 = vrot.slane %v3829_v23, 4  ;;  %3246 = vst.msk [vmem:[#allocation2 + $0x54] sm:$0xf] %vm3223_vm14, %v6247_v45  ;;  %v3832_v33 = vrot.slane %v7390_v26, 5  ;;  %vm7493_vm8 = vmand %vm7413_vm3, %vm2442_vm5 }
 0x14a   : > { %v2935_v3 = vrot.slane %v2927_v36, %v6947_v35  ;;  %6436 = vmatprep.mubr.msk.bf16.mxu0 %vm3501_vm7, %v6073_v16  ;;  %v1761_v37 = vadd.f32 %v7217_v50, %v6970_v55  ;;  %v3286_v34 = vshrl.u32 %v7386_v28, 16  ;;  %v3289_v47 = vshll.u32 %v7386_v28, 16 }
 0x14b   : > { %v2942_v42 = vrot.slane %v2928_v41, %v6947_v35  ;;  %v2950_v43 = vrot.slane %v2332_v58, %v6947_v35  ;;  %v3295_v48 = vshll.u32 %v7341_v7, 16  ;;  %v3833_v55 = vsel %vm7347_vm0, %v3831_v0, %v3832_v33 }
 0x14c   : > { %v7424_v50 = vrot.slane %v1761_v37, %v6947_v35  ;;  %v3288_v61 = vrot.slane %v3286_v34, 4  ;;  %v3299_v39 = vshrl.u32 %v7341_v7, 16  ;;  %v6074_v18 = vcombine.low %v3830_v40, %v3833_v55 }
 0x14d   : > { %v2943_v49 = vcombine.low %v2935_v3, %v2942_v42  ;;  %v3086_v15 = vsel %vm7396_vm12, %v2950_v43, 0.0  ;;  %v3291_v51 = vrot.slane %v3289_v47, 5  ;;  %v3297_v29 = vrot.slane %v3295_v48, 5  ;;  %v7497_v42 = vld [vmem:[#allocation2 + $0x20] sm:$0x1] }
 0x14e   : > { %v6249_v38 = vpack.c.bf16 %v3086_v15, %v3086_v15  ;;  %v2170_v53 = vcombine.high %v7424_v50, %v7424_v50  ;;  %v7443_v63 = vsel %vm3526_vm2, %v6644_v60, 0  ;;  %6437 = vmatmul.mubr.msk.bf16.vlgmr.msra.gmra.mxu0 %vm3501_vm7, %v6074_v18  ;;  %v3301_v52 = vrot.slane %v3299_v39, 4  ;;  %v3793_v43 = vld [vmem:[#allocation2 + $0x18] sm:$0xe]  ;;  %v3794_v47 = vld [vmem:[#allocation2 + $0x24] sm:$0xe] }
 0x14f   : > { %v3085_v4 = vsel %vm7356_vm1, %v2943_v49, 0.0  ;;  %v3292_v12 = vor.u32 %v3291_v51, %v3288_v61  ;;  %v3305_v13 = vshll.u32 %v7338_v27, 16  ;;  %vm7460_vm1 = vmand %vm2386_vm9, %vm2396_vm10  ;;  %v1753_v46 = vadd.f32 %v7230_v6, %v6972_v56  ;;  %v7469_v27 = vld [vmem:[#allocation2 + $0xc] sm:$0xf] }
 0x150   : > { %v6248_v22 = vpack.c.bf16 %v3085_v4, %v3085_v4  ;;  %3248 = vst.msk [vmem:[#allocation2 + $0x5c] sm:$0x1] %vm3226_vm6, %v6249_v38  ;;  %v2350_v25 = vmax.f32 %v2170_v53, 0.0  ;;  %v3087_v1 = vsel %vm7433_vm13, %v7336_v8, 0.0  ;;  %vm2472_vm4 = vmand %vm7460_vm1, %vm2442_vm5  ;;  %v3302_v30 = vor.u32 %v3301_v52, %v3297_v29  ;;  %v7512_v51 = vld [vmem:[#allocation2 + $0x2c] sm:$0x1] }
 0x151   : > { %v3293_v2 = vrot.slane %v3292_v12, 4  ;;  %v3307_v17 = vrot.slane %v3305_v13, 5  ;;  %v3088_v57 = vsel %vm7413_vm3, %v2984_v21, 0.0  ;;  %v2129_v6 = vcombine.high %v1753_v46, %v1753_v46  ;;  %v7518_v4 = vld [vmem:[#allocation2 + $0x28] sm:$0xf]  ;;  %vm2437_vm5 = vmand %vm7460_vm1, %vm2407_vm11 }
 0x152   : > { %3247 = vst.msk [vmem:[#allocation2 + $0x58] sm:$0xf] %vm3223_vm14, %v6248_v22  ;;  %v3032_v56 = vrot.slane %v2350_v25, %v6947_v35  ;;  %v2136_v8 = vrot.slane %v1753_v46, %v6947_v35  ;;  %v6250_v23 = vpack.c.bf16 %v3087_v1, %v3087_v1  ;;  %v3303_v5 = vrot.slane %v3302_v30, 4 }
 0x153   : > { %v3298_v32 = vsel %vm7450_vm15, %v3293_v2, %v3297_v29  ;;  %v6251_v24 = vpack.c.bf16 %v3088_v57, %v3088_v57  ;;  %v3310_v20 = vshrl.u32 %v7469_v27, 16  ;;  %v2143_v36 = vrot.slane %v2129_v6, %v6947_v35 }
 0x154   : > { %v3092_v45 = vsel %vm2472_vm4, %v3032_v56, 0.0  ;;  %v2144_v16 = vcombine.high %v2136_v8, %v2136_v8  ;;  %v2341_v21 = vmax.f32 %v2136_v8, 0.0  ;;  %3249 = vst.msk [vmem:[#allocation2 + $0x60] sm:$0xf] %vm3223_vm14, %v6250_v23  ;;  %v3308_v19 = vsel %vm7450_vm15, %v3303_v5, %v3307_v17  ;;  %v7527_v56 = vld [vmem:[#allocation2 + $0x24] sm:$0xf] }
 0x155   : > { %v6255_v58 = vpack.c.bf16 %v3092_v45, %v3092_v45  ;;  %3250 = vst.msk [vmem:[#allocation2 + $0x64] sm:$0xf] %vm3223_vm14, %v6251_v24  ;;  %v3312_v41 = vrot.slane %v3310_v20, 4  ;;  %v3313_v40 = vshll.u32 %v7469_v27, 16  ;;  %v6032_v0 = vcombine.low %v3298_v32, %v3308_v19 }
 0x156   : > { %v2145_v3 = vcombine.high %v2143_v36, %v2143_v36  ;;  %v2342_v33 = vmax.f32 %v2144_v16, 0.0  ;;  %v2343_v37 = vmax.f32 %v2143_v36, 0.0  ;;  %v2991_v48 = vrot.slane %v2341_v21, %v6947_v35 }
 0x157   : > { %3254 = vst.msk [vmem:[#allocation2 + $0x74] sm:$0x1] %vm3226_vm6, %v6255_v58  ;;  %v3315_v55 = vrot.slane %v3313_v40, 5  ;;  %v3319_v61 = vshll.u32 %v7366_v10, 16  ;;  %v3323_v39 = vshrl.u32 %v7366_v10, 16  ;;  %v2349_v31 = vmax.f32 %v7424_v50, 0.0  ;;  %6400 = vmatprep.mubr.msk.bf16.mxu1 %vm3501_vm7, %v6032_v0 }
 0x158   : > { %v7507_v49 = vmax.f32 %v2145_v3, 0.0  ;;  %v7509_v15 = vcombine.low %v2342_v33, %v2343_v37  ;;  %v3329_v18 = vshll.u32 %v7390_v26, 16  ;;  %v3089_v38 = vsel %vm7493_vm8, %v2991_v48, 0.0  ;;  %v6629_v50 = vld [vmem:[#allocation2 + $0xc] sm:$0xff]  }
 0x159   : > { %v3316_v53 = vor.u32 %v3315_v55, %v3312_v41  ;;  %v3321_v29 = vrot.slane %v3319_v61, 5  ;;  %v3325_v60 = vrot.slane %v3323_v39, 4  ;;  %v6252_v12 = vpack.c.bf16 %v3089_v38, %v3089_v38 }
 0x15a   : > { %v3331_v52 = vrot.slane %v3329_v18, 5  ;;  %v6067_v13 = vrot.slane %v3793_v43, 9  ;;  %v3836_v22 = vrot.slane %v7503_v54, 5  ;;  %v3839_v26 = vrot.slane %v7497_v42, 5  ;;  %v7546_v43 = vld [vmem:[#allocation2 + $0x34] sm:$0xf] }
 0x15b   : > { %v3317_v25 = vrot.slane %v3316_v53, 4  ;;  %v3326_v46 = vor.u32 %v3325_v60, %v3321_v29  ;;  %v6068_v1 = vrot.slane %v3794_v47, 9  ;;  %3251 = vst.msk [vmem:[#allocation2 + $0x68] sm:$0x1] %vm3226_vm6, %v6252_v12  ;;  %v3843_v17 = vrot.slane %v7518_v4, 5 }
 0x15c   : > { %v3837_v2 = vsel %vm7347_vm0, %v6067_v13, %v3836_v22  ;;  %v3838_v30 = vrot.slane %v3836_v22, 4  ;;  %v3846_v57 = vrot.slane %v7512_v51, 5  ;;  %v3334_v23 = vshrl.u32 %v7514_v14, 16  ;;  %v7551_v47 = vld [vmem:[%s8462_s3 + $0xc] sm:$0xf] }
 0x15d   : > { %v3322_v6 = vsel %vm7450_vm15, %v3317_v25, %v3321_v29  ;;  %v3327_v8 = vrot.slane %v3326_v46, 4  ;;  %v3337_v32 = vshll.u32 %v7514_v14, 16  ;;  %v3844_v24 = vsel %vm7347_vm0, %v6068_v1, %v3843_v17  ;;  %v3795_v18 = vld [vmem:[#allocation2 + $0x30] sm:$0xe]  ;;  %v3276_v60 = vld [vmem:[#allocation2 + $0x38] sm:$0x1] }
 0x15e   : > { %v3840_v5 = vsel %vm7347_vm0, %v3838_v30, %v3839_v26  ;;  %v3845_v20 = vrot.slane %v3843_v17, 4  ;;  %v3343_v45 = vshll.u32 %v7503_v54, 16  ;;  %v3336_v21 = vrot.slane %v3334_v23, 4  ;;  %v7560_v25 = vld [vmem:[#allocation2 + $0x30] sm:$0xf] }
 0x15f   : > { %v3332_v36 = vsel %vm7450_vm15, %v3327_v8, %v3331_v52  ;;  %v6075_v16 = vcombine.low %v3837_v2, %v3840_v5  ;;  %v3339_v58 = vrot.slane %v3337_v32, 5  ;;  %v3347_v0 = vshrl.u32 %v7503_v54, 16  ;;  %v3796_v32 = vld [vmem:[#allocation2 + $0x3c] sm:$0xe] }
 0x160   : > { %v6033_v19 = vcombine.low %v3322_v6, %v3332_v36  ;;  %v3847_v41 = vsel %vm7347_vm0, %v3845_v20, %v3846_v57  ;;  %v3345_v40 = vrot.slane %v3343_v45, 5  ;;  %v3353_v37 = vshll.u32 %v7497_v42, 16  ;;  %v3277_v36 = vld [vmem:[#allocation2 + $0x44] sm:$0x1] }
 0x161   : > { %6440 = vmatprep.mubr.msk.bf16.mxu0 %vm3501_vm7, %v6075_v16  ;;  %v6076_v3 = vcombine.low %v3844_v24, %v3847_v41  ;;  %v3340_v33 = vor.u32 %v3339_v58, %v3336_v21  ;;  %v3358_v34 = vshrl.u32 %v7527_v56, 16  ;;  %v3349_v48 = vrot.slane %v3347_v0, 4  ;;  %v7576_v41 = vld [vmem:[#allocation2 + $0x40] sm:$0xf] }
 0x162   : > { %6401 = vmatmul.mubr.msk.bf16.vlgmr.msra.gmra.mxu1 %vm3501_vm7, %v6033_v19  ;;  %v3361_v55 = vshll.u32 %v7527_v56, 16  ;;  %v3367_v61 = vshll.u32 %v7518_v4, 16  ;;  %v3371_v39 = vshrl.u32 %v7518_v4, 16  ;;  %v3355_v38 = vrot.slane %v3353_v37, 5 }
 0x163   : > { %6417 = vmatpush3.bf16.msra.mxu1 %v7443_v63  ;;  %6441 = vmatmul.mubr.msk.bf16.gmra.mxu0 %vm3501_vm7, %v6076_v3  ;;  %v3341_v42 = vrot.slane %v3340_v33, 4  ;;  %v3360_v53 = vrot.slane %v3358_v34, 4  ;;  %v3377_v29 = vshll.u32 %v7512_v51, 16  ;;  %v3350_v12 = vor.u32 %v3349_v48, %v3345_v40  ;;  %v7582_v34 = vld [vmem:[#allocation2 + $0x4c] sm:$0xf] }
 0x164   : > { %v3363_v52 = vrot.slane %v3361_v55, 5  ;;  %v3369_v13 = vrot.slane %v3367_v61, 5  ;;  %v3373_v22 = vrot.slane %v3371_v39, 4  ;;  %6571 = vmatprep.subr.msk.bf16.mxu1 %vm3526_vm2, %v7551_v47  ;;  %v6069_v26 = vrot.slane %v3795_v18, 9  ;;  %v3278_v18 = vld [vmem:[#allocation2 + $0x50] sm:$0x1] }
 0x165   : > { %v3346_v63 = vsel %vm7450_vm15, %v3341_v42, %v3345_v40  ;;  %v3379_v46 = vrot.slane %v3377_v29, 5  ;;  %v3850_v1 = vrot.slane %v7546_v43, 5  ;;  %v3351_v2 = vrot.slane %v3350_v12, 4  ;;  %v3797_v40 = vld [vmem:[#allocation2 + $0x48] sm:$0xe] }
 0x166   : > { %v3364_v30 = vor.u32 %v3363_v52, %v3360_v53  ;;  %v3374_v51 = vor.u32 %v3373_v22, %v3369_v13  ;;  %v3853_v17 = vrot.slane %v3276_v60, 5  ;;  %v3382_v8 = vshrl.u32 %v7560_v25, 16  ;;  %v7586_v42 = vld [vmem:[#allocation2 + $0x3c] sm:$0xf] }
 0x167   : > { %v3851_v57 = vsel %vm7347_vm0, %v6069_v26, %v3850_v1  ;;  %v3852_v6 = vrot.slane %v3850_v1, 4  ;;  %v3385_v23 = vshll.u32 %v7560_v25, 16  ;;  %v3356_v5 = vsel %vm7450_vm15, %v3351_v2, %v3355_v38 }
 0x168   : > { %v3365_v24 = vrot.slane %v3364_v30, 4  ;;  %v3375_v20 = vrot.slane %v3374_v51, 4  ;;  %v3391_v45 = vshll.u32 %v7546_v43, 16  ;;  %v6034_v16 = vcombine.low %v3346_v63, %v3356_v5 }
 0x169   : > { %v3854_v21 = vsel %vm7347_vm0, %v3852_v6, %v3853_v17  ;;  %v3384_v58 = vrot.slane %v3382_v8, 4  ;;  %v3387_v19 = vrot.slane %v3385_v23, 5  ;;  %v3395_v61 = vshrl.u32 %v7546_v43, 16 }
 0x16a   : > { %v3370_v0 = vsel %vm7450_vm15, %v3365_v24, %v3369_v13  ;;  %v3380_v3 = vsel %vm7450_vm15, %v3375_v20, %v3379_v46  ;;  %v6077_v33 = vcombine.low %v3851_v57, %v3854_v21  ;;  %v3393_v37 = vrot.slane %v3391_v45, 5  ;;  %6404 = vmatprep.mubr.msk.bf16.mxu1 %vm3501_vm7, %v6034_v16 }
 0x16b   : > { %v6035_v48 = vcombine.low %v3370_v0, %v3380_v3  ;;  %v3388_v55 = vor.u32 %v3387_v19, %v3384_v58  ;;  %v3401_v39 = vshll.u32 %v3276_v60, 16  ;;  %v6070_v38 = vrot.slane %v3796_v32, 9  ;;  %v7603_v32 = vld [vmem:[#allocation2 + $0x48] sm:$0xf] }
 0x16c   : > { %6444 = vmatprep.mubr.msk.bf16.mxu0 %vm3501_vm7, %v6077_v33  ;;  %v3857_v53 = vrot.slane %v7576_v41, 5  ;;  %v3860_v29 = vrot.slane %v3277_v36, 5  ;;  %v6071_v12 = vrot.slane %v3797_v40, 9  ;;  %v3397_v13 = vrot.slane %v3395_v61, 4 }
 0x16d   : > { %6405 = vmatmul.mubr.msk.bf16.gmra.mxu1 %vm3501_vm7, %v6035_v48  ;;  %v3389_v52 = vrot.slane %v3388_v55, 4  ;;  %v3403_v22 = vrot.slane %v3401_v39, 5  ;;  %v3864_v63 = vrot.slane %v7582_v34, 5  ;;  %v3867_v26 = vrot.slane %v3278_v18, 5 }
 0x16e   : > { %v3858_v60 = vsel %vm7347_vm0, %v6070_v38, %v3857_v53  ;;  %v3859_v46 = vrot.slane %v3857_v53, 4  ;;  %v3406_v1 = vshrl.u32 %v7586_v42, 16  ;;  %v3398_v30 = vor.u32 %v3397_v13, %v3393_v37  ;;  %v7615_v38 = vld [vmem:[#allocation2 + $0x58] sm:$0xf]  ;;  %v7618_v13 = vld [vmem:[#allocation2 + $0x5c] sm:$0x1] }
 0x16f   : > { %v3394_v2 = vsel %vm7450_vm15, %v3389_v52, %v3393_v37  ;;  %v3865_v51 = vsel %vm7347_vm0, %v6071_v12, %v3864_v63  ;;  %v3866_v17 = vrot.slane %v3864_v63, 4  ;;  %v3409_v8 = vshll.u32 %v7586_v42, 16  ;;  %v3798_v37 = vld [vmem:[#allocation2 + $0x54] sm:$0xe] }
 0x170   : > { %v3861_v57 = vsel %vm7347_vm0, %v3859_v46, %v3860_v29  ;;  %v3408_v6 = vrot.slane %v3406_v1, 4  ;;  %v3415_v23 = vshll.u32 %v7576_v41, 16  ;;  %v3399_v5 = vrot.slane %v3398_v30, 4 }
 0x171   : > { %v6078_v24 = vcombine.low %v3858_v60, %v3861_v57  ;;  %v3868_v20 = vsel %vm7347_vm0, %v3866_v17, %v3867_v26  ;;  %v3419_v45 = vshrl.u32 %v7576_v41, 16  ;;  %v3411_v21 = vrot.slane %v3409_v8, 5 }
 0x172   : > { %v6079_v16 = vcombine.low %v3865_v51, %v3868_v20  ;;  %v3417_v58 = vrot.slane %v3415_v23, 5  ;;  %v3425_v19 = vshll.u32 %v3277_v36, 16  ;;  %v3404_v40 = vsel %vm7450_vm15, %v3399_v5, %v3403_v22  ;;  %v4239_v36 = vld [vmem:[#allocation2 + $0xc] sm:$0xf]  ;;  %v7631_v20 = vld [vmem:[#allocation2 + $0x14] sm:$0x1] }
 0x173   : > { %6445 = vmatmul.mubr.msk.bf16.gmra.mxu0 %vm3501_vm7, %v6078_v24  ;;  %v3421_v0 = vrot.slane %v3419_v45, 4  ;;  %v3430_v3 = vshrl.u32 %v7603_v32, 16  ;;  %v3433_v33 = vshll.u32 %v7603_v32, 16  ;;  %v6036_v48 = vcombine.low %v3394_v2, %v3404_v40  ;;  %v7633_v45 = vld [vmem:[#allocation2 + $0x54] sm:$0xf] }
 0x174   : > { %6448 = vmatprep.mubr.msk.bf16.mxu0 %vm3501_vm7, %v6079_v16  ;;  %v3412_v55 = vor.u32 %v3411_v21, %v3408_v6  ;;  %v3427_v61 = vrot.slane %v3425_v19, 5  ;;  %v3439_v39 = vshll.u32 %v7582_v34, 16  ;;  %v3443_v52 = vshrl.u32 %v7582_v34, 16  ;;  %v7625_v6 = vld [vmem:[#allocation2 + $0x10] sm:$0xf] }
 0x175   : > { %v3422_v53 = vor.u32 %v3421_v0, %v3417_v58  ;;  %v3432_v29 = vrot.slane %v3430_v3, 4  ;;  %v3435_v12 = vrot.slane %v3433_v33, 5  ;;  %6408 = vmatprep.mubr.msk.bf16.mxu1 %vm3501_vm7, %v6036_v48  ;;  %v3449_v60 = vshll.u32 %v3278_v18, 16 }
 0x176   : > { %v3413_v22 = vrot.slane %v3412_v55, 4  ;;  %v3441_v63 = vrot.slane %v3439_v39, 5  ;;  %v6072_v46 = vrot.slane %v3798_v37, 9  ;;  %v3445_v2 = vrot.slane %v3443_v52, 4 }
 0x177   : > { %v3423_v26 = vrot.slane %v3422_v53, 4  ;;  %v3436_v1 = vor.u32 %v3435_v12, %v3432_v29  ;;  %v3871_v30 = vrot.slane %v7615_v38, 5  ;;  %v3451_v17 = vrot.slane %v3449_v60, 5  ;;  %v4242_v60 = vld [vmem:[#allocation2 + $0x18] sm:$0xf] }
 0x178   : > { %v3418_v51 = vsel %vm7450_vm15, %v3413_v22, %v3417_v58  ;;  %v3874_v57 = vrot.slane %v7618_v13, 5  ;;  %v4266_v8 = vshrl.u32 %v4239_v36, 16  ;;  %v3446_v18 = vor.u32 %v3445_v2, %v3441_v63 }
 0x179   : > { %v3428_v23 = vsel %vm7450_vm15, %v3423_v26, %v3427_v61  ;;  %v3437_v5 = vrot.slane %v3436_v1, 4  ;;  %v3872_v24 = vsel %vm7347_vm0, %v6072_v46, %v3871_v30  ;;  %v3873_v21 = vrot.slane %v3871_v30, 4  ;;  %v7655_v30 = vld [vmem:[%s8462_s3 + $0x18] sm:$0xf] }
 0x17a   : > { %v6037_v16 = vcombine.low %v3418_v51, %v3428_v23  ;;  %v4268_v58 = vrot.slane %v4266_v8, 4  ;;  %v4269_v19 = vshll.u32 %v4239_v36, 16  ;;  %v3447_v0 = vrot.slane %v3446_v18, 4  ;;  %v6645_v8 = vld [vmem:[%s8462_s3 + $0x10] sm:$0xf] }
 0x17b   : > { %v3442_v40 = vsel %vm7450_vm15, %v3437_v5, %v3441_v63  ;;  %v4275_v3 = vshll.u32 %v7625_v6, 16  ;;  %v4279_v33 = vshrl.u32 %v7625_v6, 16  ;;  %v3875_v37 = vsel %vm7347_vm0, %v3873_v21, %v3874_v57  ;;  %v7663_v5 = vld [vmem:[#allocation2 + $0x1c] sm:$0xf] }
 0x17c   : > { %6409 = vmatmul.mubr.msk.bf16.gmra.mxu1 %vm3501_vm7, %v6037_v16  ;;  %v4271_v48 = vrot.slane %v4269_v19, 5  ;;  %v4285_v55 = vshll.u32 %v7631_v20, 16  ;;  %v3454_v61 = vshrl.u32 %v7633_v45, 16  ;;  %v3452_v39 = vsel %vm7450_vm15, %v3447_v0, %v3451_v17 }
 0x17d   : > { %v6080_v36 = vcombine.low %v3872_v24, %v3875_v37  ;;  %v4277_v53 = vrot.slane %v4275_v3, 5  ;;  %v4281_v29 = vrot.slane %v4279_v33, 4  ;;  %v3000_v12 = vrot.slane %v7509_v15, %v6947_v35 }
 0x17e   : > { %v6038_v52 = vcombine.low %v3442_v40, %v3452_v39  ;;  %v4272_v22 = vor.u32 %v4271_v48, %v4268_v58  ;;  %v3456_v63 = vrot.slane %v3454_v61, 4  ;;  %v3457_v26 = vshll.u32 %v7633_v45, 16  ;;  %v7667_v40 = vld [vmem:[#allocation2 + $0x20] sm:$0x1] }
 0x17f   : > { %6449 = vmatmul.mubr.msk.bf16.gmra.mxu0 %vm3501_vm7, %v6080_v36  ;;  %v4282_v46 = vor.u32 %v4281_v29, %v4277_v53  ;;  %v3463_v1 = vshll.u32 %v7615_v38, 16  ;;  %v3467_v2 = vshrl.u32 %v7615_v38, 16  ;;  %v4287_v17 = vrot.slane %v4285_v55, 5  ;;  %v4245_v55 = vld [vmem:[#allocation2 + $0x24] sm:$0xf] }
 0x180   : > { %6412 = vmatprep.mubr.msk.bf16.mxu1 %vm3501_vm7, %v6038_v52  ;;  %v4273_v51 = vrot.slane %v4272_v22, 4  ;;  %v3473_v57 = vshll.u32 %v7618_v13, 16  ;;  %v4506_v23 = vsel %vm3526_vm2, %v6645_v8, 0  ;;  %v3459_v24 = vrot.slane %v3457_v26, 5  ;;  %v7675_v29 = vld [vmem:[#allocation2 + $0x28] sm:$0xf] }
 0x181   : > { %v4283_v18 = vrot.slane %v4282_v46, 4  ;;  %v3465_v16 = vrot.slane %v3463_v1, 5  ;;  %v3469_v21 = vrot.slane %v3467_v2, 4  ;;  %6471 = vmatpush3.bf16.msra.mxu0 %v4506_v23  ;;  %v4290_v13 = vshrl.u32 %v4242_v60, 16  ;;  %v7679_v1 = vld [vmem:[#allocation2 + $0x2c] sm:$0x1] }
 0x182   : > { %v4278_v58 = vsel %vm7450_vm15, %v4273_v51, %v4277_v53  ;;  %v3475_v19 = vrot.slane %v3473_v57, 5  ;;  %v4293_v0 = vshll.u32 %v4242_v60, 16  ;;  %6574 = vmatprep.subr.msk.bf16.mxu0 %vm3526_vm2, %v7655_v30  ;;  %v3460_v33 = vor.u32 %v3459_v24, %v3456_v63 }
 0x183   : > { %v4288_v3 = vsel %vm7450_vm15, %v4283_v18, %v4287_v17  ;;  %v3470_v37 = vor.u32 %v3469_v21, %v3465_v16  ;;  %v4299_v48 = vshll.u32 %v7663_v5, 16  ;;  %v4292_v39 = vrot.slane %v4290_v13, 4  ;;  %v7688_v13 = vld [vmem:[#allocation2 + $0x34] sm:$0xf] }
 0x184   : > { %v6107_v61 = vcombine.low %v4278_v58, %v4288_v3  ;;  %v4295_v36 = vrot.slane %v4293_v0, 5  ;;  %v4303_v53 = vshrl.u32 %v7663_v5, 16  ;;  %v3461_v52 = vrot.slane %v3460_v33, 4 }
 0x185   : > { %v3471_v22 = vrot.slane %v3470_v37, 4  ;;  %v4301_v60 = vrot.slane %v4299_v48, 5  ;;  %v4309_v46 = vshll.u32 %v7667_v40, 16  ;;  %v4314_v2 = vshrl.u32 %v4245_v55, 16  ;;  %v4248_v37 = vld [vmem:[#allocation2 + $0x30] sm:$0xf] }
 0x186   : > { %6472 = vmatprep.mubr.msk.bf16.mxu0 %vm3501_vm7, %v6107_v61  ;;  %v4296_v26 = vor.u32 %v4295_v36, %v4292_v39  ;;  %v4305_v63 = vrot.slane %v4303_v53, 4  ;;  %v4317_v51 = vshll.u32 %v4245_v55, 16  ;;  %v3466_v17 = vsel %vm7450_vm15, %v3461_v52, %v3465_v16  ;;  %v7700_v53 = vld [vmem:[#allocation2 + $0x38] sm:$0x1] }
 0x187   : > { %v3476_v57 = vsel %vm7450_vm15, %v3471_v22, %v3475_v19  ;;  %v6048_v8 = vcombine.low %v7386_v28, %v7341_v7  ;;  %v4323_v23 = vshll.u32 %v7675_v29, 16  ;;  %v4316_v58 = vrot.slane %v4314_v2, 4 }
 0x188   : > { %v6039_v18 = vcombine.low %v3466_v17, %v3476_v57  ;;  %v4297_v24 = vrot.slane %v4296_v26, 4  ;;  %v4306_v21 = vor.u32 %v4305_v63, %v4301_v60  ;;  %v4319_v0 = vrot.slane %v4317_v51, 5  ;;  %v4251_v26 = vld [vmem:[#allocation2 + $0x3c] sm:$0xf]  ;;  %v7708_v51 = vld [vmem:[#allocation2 + $0x40] sm:$0xf] }
 0x189   : > { %v4325_v3 = vrot.slane %v4323_v23, 5  ;;  %v4327_v33 = vshrl.u32 %v7675_v29, 16  ;;  %v4333_v16 = vshll.u32 %v7679_v1, 16  ;;  %v4311_v19 = vrot.slane %v4309_v46, 5 }
 0x18a   : > { %6413 = vmatmul.mubr.msk.bf16.gmra.mxu1 %vm3501_vm7, %v6039_v18  ;;  %v4302_v7 = vsel %vm7450_vm15, %v4297_v24, %v4301_v60  ;;  %v4307_v28 = vrot.slane %v4306_v21, 4  ;;  %v6049_v48 = vcombine.low %v7469_v27, %v7366_v10  ;;  %v4320_v55 = vor.u32 %v4319_v0, %v4316_v58 }
 0x18b   : > { %6418 = vmatprep.mubr.msk.bf16.mxu1 %vm3501_vm7, %v6048_v8  ;;  %v4329_v61 = vrot.slane %v4327_v33, 4  ;;  %v4335_v39 = vrot.slane %v4333_v16, 5  ;;  %v4124_v36 = vsel %vm3526_vm2, %v7551_v47, 0  ;;  %v4338_v22 = vshrl.u32 %v4248_v37, 16 }
 0x18c   : > { %v4312_v52 = vsel %vm7450_vm15, %v4307_v28, %v4311_v19  ;;  %v4341_v60 = vshll.u32 %v4248_v37, 16  ;;  %v4347_v46 = vshll.u32 %v7688_v13, 16  ;;  %v6050_v27 = vcombine.low %v7514_v14, %v7503_v54  ;;  %v7714_v54 = vld [vmem:[#allocation2 + $0x44] sm:$0x1]  ;;  %v4254_v19 = vld [vmem:[#allocation2 + $0x48] sm:$0xf] }
 0x18d   : > { %v6108_v63 = vcombine.low %v4302_v7, %v4312_v52  ;;  %v4330_v10 = vor.u32 %v4329_v61, %v4325_v3  ;;  %v4351_v2 = vshrl.u32 %v7688_v13, 16  ;;  %v4321_v47 = vrot.slane %v4320_v55, 4  ;;  %v7723_v55 = vld [vmem:[%s8462_s3 + $0x14] sm:$0xf] }
 0x18e   : > { %v4340_v17 = vrot.slane %v4338_v22, 4  ;;  %v4343_v57 = vrot.slane %v4341_v60, 5  ;;  %v4349_v8 = vrot.slane %v4347_v46, 5  ;;  %v4357_v24 = vshll.u32 %v7700_v53, 16 }
 0x18f   : > { %6473 = vmatmul.mubr.msk.bf16.vlgmr.msra.gmra.mxu0 %vm3501_vm7, %v6108_v63  ;;  %v4331_v23 = vrot.slane %v4330_v10, 4  ;;  %v4353_v18 = vrot.slane %v4351_v2, 4  ;;  %v4362_v21 = vshrl.u32 %v4251_v26, 16  ;;  %v4326_v58 = vsel %vm7450_vm15, %v4321_v47, %v4325_v3  ;;  %v7728_v63 = vld [vmem:[#allocation2 + $0x4c] sm:$0xf] }
 0x190   : > { %v4344_v0 = vor.u32 %v4343_v57, %v4340_v17  ;;  %v4365_v14 = vshll.u32 %v4251_v26, 16  ;;  %v4371_v33 = vshll.u32 %v7708_v51, 16  ;;  %v4375_v28 = vshrl.u32 %v7708_v51, 16  ;;  %v7735_v47 = vld [vmem:[#allocation2 + $0x50] sm:$0x1] }
 0x191   : > { %v4336_v16 = vsel %vm7450_vm15, %v4331_v23, %v4335_v39  ;;  %v4354_v37 = vor.u32 %v4353_v18, %v4349_v8  ;;  %v4364_v7 = vrot.slane %v4362_v21, 4  ;;  %v4359_v60 = vrot.slane %v4357_v24, 5  ;;  %v4257_v18 = vld [vmem:[#allocation2 + $0x54] sm:$0xf] }
 0x192   : > { %v6109_v3 = vcombine.low %v4326_v58, %v4336_v16  ;;  %6419 = vmatmul.mubr.msk.bf16.vlgmr.msra.gmra.mxu1 %vm3501_vm7, %v6049_v48  ;;  %v4345_v61 = vrot.slane %v4344_v0, 4  ;;  %v4367_v52 = vrot.slane %v4365_v14, 5  ;;  %v4373_v22 = vrot.slane %v4371_v33, 5  ;;  %v7744_v33 = vld [vmem:[#allocation2 + $0x58] sm:$0xf] }
 0x193   : > { %6453 = vmatpush3.bf16.msra.mxu1 %v4124_v36  ;;  %6422 = vmatprep.mubr.msk.bf16.mxu1 %vm3501_vm7, %v6050_v27  ;;  %v4355_v39 = vrot.slane %v4354_v37, 4  ;;  %v4377_v46 = vrot.slane %v4375_v28, 4  ;;  %v4381_v26 = vshll.u32 %v7714_v54, 16  ;;  %v6051_v48 = vcombine.low %v7527_v56, %v7518_v4 }
 0x194   : > { %6476 = vmatprep.mubr.msk.bf16.mxu0 %vm3501_vm7, %v6109_v3  ;;  %v4350_v10 = vsel %vm7450_vm15, %v4345_v61, %v4349_v8  ;;  %v4368_v2 = vor.u32 %v4367_v52, %v4364_v7  ;;  %v4386_v36 = vshrl.u32 %v4254_v19, 16  ;;  %6573 = vmatprep.subr.msk.bf16.mxu1 %vm3526_vm2, %v7723_v55  ;;  %v4389_v23 = vshll.u32 %v4254_v19, 16 }
 0x195   : > { %v4360_v27 = vsel %vm7450_vm15, %v4355_v39, %v4359_v60  ;;  %v4378_v17 = vor.u32 %v4377_v46, %v4373_v22  ;;  %v4383_v57 = vrot.slane %v4381_v26, 5  ;;  %v4395_v58 = vshll.u32 %v7728_v63, 16  ;;  %v7753_v39 = vld [vmem:[#allocation2 + $0x5c] sm:$0x1] }
 0x196   : > { %v6110_v24 = vcombine.low %v4350_v10, %v4360_v27  ;;  %v4369_v21 = vrot.slane %v4368_v2, 4  ;;  %v4388_v8 = vrot.slane %v4386_v36, 4  ;;  %v4391_v4 = vrot.slane %v4389_v23, 5  ;;  %v1755_v36 = vpop.f32.mrf.mxu1  ;;  %v4260_v27 = vld [vmem:[#allocation2 + $0x60] sm:$0xf] }
 0x197   : > { %v4379_v0 = vrot.slane %v4378_v17, 4  ;;  %v4399_v56 = vshrl.u32 %v7728_v63, 16  ;;  %v4405_v14 = vshll.u32 %v7735_v47, 16  ;;  %v6052_v16 = vcombine.low %v7560_v25, %v7546_v43 }
 0x198   : > { %6477 = vmatmul.mubr.msk.bf16.gmra.mxu0 %vm3501_vm7, %v6110_v24  ;;  %v4397_v37 = vrot.slane %v4395_v58, 5  ;;  %v4410_v7 = vshrl.u32 %v4257_v18, 16  ;;  %v4413_v28 = vshll.u32 %v4257_v18, 16  ;;  %v4374_v19 = vsel %vm7450_vm15, %v4369_v21, %v4373_v22  ;;  %v7763_v18 = vld [vmem:[#allocation2 + $0x64] sm:$0xf] }
 0x199   : > { %v4384_v3 = vsel %vm7450_vm15, %v4379_v0, %v4383_v57  ;;  %v4392_v61 = vor.u32 %v4391_v4, %v4388_v8  ;;  %v4401_v52 = vrot.slane %v4399_v56, 4  ;;  %v4419_v43 = vshll.u32 %v7744_v33, 16 }
 0x19a   : > { %v6111_v60 = vcombine.low %v4374_v19, %v4384_v3  ;;  %6423 = vmatmul.mubr.msk.bf16.gmra.mxu1 %vm3501_vm7, %v6051_v48  ;;  %v4412_v46 = vrot.slane %v4410_v7, 4  ;;  %v4415_v26 = vrot.slane %v4413_v28, 5  ;;  %v4407_v2 = vrot.slane %v4405_v14, 5 }
 0x19b   : > { %6426 = vmatprep.mubr.msk.bf16.mxu1 %vm3501_vm7, %v6052_v16  ;;  %v4393_v25 = vrot.slane %v4392_v61, 4  ;;  %v4402_v10 = vor.u32 %v4401_v52, %v4397_v37  ;;  %v4423_v22 = vshrl.u32 %v7744_v33, 16  ;;  %v4421_v57 = vrot.slane %v4419_v43, 5 }
 0x19c   : > { %6480 = vmatprep.mubr.msk.bf16.mxu0 %vm3501_vm7, %v6111_v60  ;;  %v4416_v17 = vor.u32 %v4415_v26, %v4412_v46  ;;  %v4429_v23 = vshll.u32 %v7753_v39, 16  ;;  %v6053_v48 = vcombine.low %v7586_v42, %v7576_v41  ;;  %v6054_v58 = vcombine.low %v7603_v32, %v7582_v34  ;;  %v7778_v26 = vld [vmem:[#allocation2 + $0x68] sm:$0x1] }
 0x19d   : > { %v4398_v24 = vsel %vm7450_vm15, %v4393_v25, %v4397_v37  ;;  %v4403_v21 = vrot.slane %v4402_v10, 4  ;;  %v4425_v8 = vrot.slane %v4423_v22, 4  ;;  %v1756_v4 = vadd.f32 %v1755_v36, %v6983_v62 }
 0x19e   : > { %v4417_v0 = vrot.slane %v4416_v17, 4  ;;  %v4434_v56 = vshrl.u32 %v4260_v27, 16  ;;  %v4437_v14 = vshll.u32 %v4260_v27, 16  ;;  %v4443_v41 = vshll.u32 %v7763_v18, 16 }
 0x19f   : > { %v4408_v16 = vsel %vm7450_vm15, %v4403_v21, %v4407_v2  ;;  %v4426_v7 = vor.u32 %v4425_v8, %v4421_v57  ;;  %v4447_v42 = vshrl.u32 %v7763_v18, 16  ;;  %v4431_v37 = vrot.slane %v4429_v23, 5 }
 0x1a0   : > { %v6112_v28 = vcombine.low %v4398_v24, %v4408_v16  ;;  %v2146_v19 = vcombine.high %v1756_v4, %v1756_v4  ;;  %v2153_v3 = vrot.slane %v1756_v4, %v6947_v35  ;;  %v4436_v34 = vrot.slane %v4434_v56, 4 }
 0x1a1   : > { %v4427_v61 = vrot.slane %v4426_v7, 4  ;;  %v4439_v32 = vrot.slane %v4437_v14, 5  ;;  %v4445_v52 = vrot.slane %v4443_v41, 5  ;;  %v4449_v43 = vrot.slane %v4447_v42, 4 }
 0x1a2   : > { %6481 = vmatmul.mubr.msk.bf16.gmra.mxu0 %vm3501_vm7, %v6112_v28  ;;  %6427 = vmatmul.mubr.msk.bf16.gmra.mxu1 %vm3501_vm7, %v6053_v48  ;;  %v2160_v62 = vrot.slane %v2146_v19, %v6947_v35  ;;  %v2161_v60 = vcombine.high %v2153_v3, %v2153_v3  ;;  %v2345_v46 = vmax.f32 %v2153_v3, 0.0  ;;  %v4422_v25 = vsel %vm7450_vm15, %v4417_v0, %v4421_v57  ;;  %v6182_v57 = vld [vmem:[%s8462_s3 + $0x20] sm:$0xf] }
 0x1a3   : > { %v4432_v10 = vsel %vm7450_vm15, %v4427_v61, %v4431_v37  ;;  %6430 = vmatprep.mubr.msk.bf16.mxu1 %vm3501_vm7, %v6054_v58  ;;  %v4440_v2 = vor.u32 %v4439_v32, %v4436_v34  ;;  %v4453_v22 = vshll.u32 %v7778_v26, 16  ;;  %v4450_v21 = vor.u32 %v4449_v43, %v4445_v52  ;;  %v6630_v43 = vld [vmem:[#allocation2 + $0x24] sm:$0xff]  }
 0x1a4   : > { %v6113_v36 = vcombine.low %v4422_v25, %v4432_v10  ;;  %v2162_v27 = vcombine.high %v2160_v62, %v2160_v62  ;;  %v2346_v17 = vmax.f32 %v2161_v60, 0.0  ;;  %v2347_v23 = vmax.f32 %v2160_v62, 0.0  ;;  %v6632_v62 = vld [vmem:[#allocation2 + $0x18] sm:$0xff]   ;;  %v6633_v25 = vld [vmem:[#allocation2 + $0x24] sm:$0xff]  }
 0x1a5   : > { %v2993_v48 = vcombine.low %v7507_v49, %v2345_v46  ;;  %v4441_v24 = vrot.slane %v4440_v2, 4  ;;  %v4455_v8 = vrot.slane %v4453_v22, 5  ;;  %v4959_v4 = vsel %vm3526_vm2, %v7655_v30, 0  ;;  %v4621_v30 = vld [vmem:[#allocation2 + $0xc] sm:$0xe] }
 0x1a6   : > { %6484 = vmatprep.mubr.msk.bf16.mxu0 %vm3501_vm7, %v6113_v36  ;;  %v2348_v0 = vmax.f32 %v2162_v27, 0.0  ;;  %v3009_v58 = vcombine.low %v2346_v17, %v2347_v23  ;;  %v4451_v14 = vrot.slane %v4450_v21, 4  ;;  %6507 = vmatpush3.bf16.msra.mxu0 %v4959_v4  ;;  %v6055_v7 = vcombine.low %v7633_v45, %v7615_v38  ;;  %v6628_v45 = vld [vmem:[#allocation2 + $0x18] sm:$0xff]   ;;  %v6631_v27 = vld [vmem:[#allocation2 + $0x30] sm:$0xff]  }
 0x1a7   : > { %v3007_v56 = vrot.slane %v2993_v48, %v6947_v35  ;;  %6576 = vmatprep.subr.msk.bf16.mxu0 %vm3526_vm2, %v6182_v57  ;;  %v4446_v59 = vsel %vm7450_vm15, %v4441_v24, %v4445_v52  ;;  %v6124_v15 = vrot.slane %v4621_v30, 9  ;;  %v4660_v19 = vrot.slane %v7631_v20, 5  ;;  %v4622_v52 = vld [vmem:[#allocation2 + $0x18] sm:$0xe]  ;;  %v6636_v4 = vld [vmem:[#allocation2 + $0x30] sm:$0xff]   ;;  %v6634_v30 = vld [vmem:[#allocation2 + $0x3c] sm:$0xff]  }
 0x1a8   : > { %v3010_v49 = vcombine.low %v2348_v0, %v2349_v31  ;;  %v3017_v16 = vrot.slane %v3009_v58, %v6947_v35  ;;  %v4456_v42 = vsel %vm7450_vm15, %v4451_v14, %v4455_v8  ;;  %v4657_v31 = vrot.slane %v7625_v6, 5  ;;  %v6637_v14 = vld [vmem:[#allocation2 + $0x3c] sm:$0xff]  }
 0x1a9   : > { %v3008_v41 = vcombine.low %v3000_v12, %v3007_v56  ;;  %v6114_v37 = vcombine.low %v4446_v59, %v4456_v42  ;;  %v4760_v60 = vsel %vm3526_vm2, %v7723_v55, 0  ;;  %v4664_v46 = vrot.slane %v7663_v5, 5  ;;  %v4623_v55 = vld [vmem:[#allocation2 + $0x24] sm:$0xe]  ;;  %v6635_v59 = vld [vmem:[#allocation2 + $0x48] sm:$0xff]  }
 0x1aa   : > { %v3024_v28 = vrot.slane %v3010_v49, %v6947_v35  ;;  %6431 = vmatmul.mubr.msk.bf16.gmra.mxu1 %vm3501_vm7, %v6055_v7  ;;  %v4659_v12 = vrot.slane %v4657_v31, 4  ;;  %v7820_v35 = vsel %vm7347_vm0, %v6124_v15, %v4657_v31  ;;  %v5595_v10 = vsel %vm3526_vm2, %v6182_v57, 0  ;;  %v4625_v7 = vld [vmem:[#allocation2 + $0x3c] sm:$0xe]  ;;  %v4626_v42 = vld [vmem:[#allocation2 + $0x48] sm:$0xe] }
 0x1ab   : > { %v3090_v38 = vsel %vm2437_vm5, %v3008_v41, 0.0  ;;  %6454 = vmatprep.mubr.msk.bf16.mxu1 %vm3501_vm7, %v6629_v50  ;;  %6485 = vmatmul.mubr.msk.bf16.gmra.mxu0 %vm3501_vm7, %v6114_v37  ;;  %v6125_v2 = vrot.slane %v4622_v52, 9  ;;  %v4666_v22 = vrot.slane %v4664_v46, 4  ;;  %v4667_v36 = vrot.slane %v7667_v40, 5  ;;  %v4624_v40 = vld [vmem:[#allocation2 + $0x30] sm:$0xe] }
 0x1ac   : > { %v3025_v3 = vcombine.low %v3017_v16, %v3024_v28  ;;  %v6253_v61 = vpack.c.bf16 %v3090_v38, %v3090_v38  ;;  %6508 = vmatprep.mubr.msk.bf16.mxu0 %vm3501_vm7, %v6628_v45  ;;  %v7824_v6 = vsel %vm7347_vm0, %v4659_v12, %v4660_v19  ;;  %v4671_v5 = vrot.slane %v7675_v29, 5  ;;  %v6640_v19 = vld [vmem:[#allocation2 + $0x48] sm:$0xff]   ;;  %v6638_v52 = vld [vmem:[#allocation2 + $0x54] sm:$0xff]  }
 0x1ad   : > { %v6132_v20 = vcombine.low %v7820_v35, %v7824_v6  ;;  %v7850_v17 = vsel %vm7347_vm0, %v6125_v2, %v4664_v46  ;;  %v7854_v23 = vsel %vm7347_vm0, %v4666_v22, %v4667_v36  ;;  %v6126_v48 = vrot.slane %v4623_v55, 9  ;;  %v7915_v46 = vld [vmem:[#allocation2 + $0x20] sm:$0x1]  ;;  %v7924_v55 = vld [vmem:[#allocation2 + $0x34] sm:$0xf] }
 0x1ae   : > { %v3091_v34 = vsel %vm7460_vm1, %v3025_v3, 0.0  ;;  %3252 = vst.msk [vmem:[#allocation2 + $0x6c] sm:$0xf] %vm3223_vm14, %v6253_v61  ;;  %v6133_v29 = vcombine.low %v7850_v17, %v7854_v23  ;;  %v4673_v24 = vrot.slane %v4671_v5, 4  ;;  %v4674_v21 = vrot.slane %v7679_v1, 5 }
 0x1af   : > { %v6254_v32 = vpack.c.bf16 %v3091_v34, %v3091_v34  ;;  %v7862_v8 = vsel %vm7347_vm0, %v6126_v48, %v4671_v5  ;;  %v6127_v0 = vrot.slane %v4624_v40, 9  ;;  %v4678_v58 = vrot.slane %v7688_v13, 5 }
 0x1b0   : > { %v7866_v57 = vsel %vm7347_vm0, %v4673_v24, %v4674_v21  ;;  %v4681_v16 = vrot.slane %v7700_v53, 5  ;;  %v4685_v41 = vrot.slane %v7708_v51, 5  ;;  %v6128_v53 = vrot.slane %v4625_v7, 9  ;;  %v7888_v51 = vld [vmem:[#allocation2 + $0x1c] sm:$0xf] }
 0x1b1   : > { %3253 = vst.msk [vmem:[#allocation2 + $0x70] sm:$0xf] %vm3223_vm14, %v6254_v32  ;;  %v6134_v56 = vcombine.low %v7862_v8, %v7866_v57  ;;  %v7873_v49 = vsel %vm7347_vm0, %v6127_v0, %v4678_v58  ;;  %v4680_v1 = vrot.slane %v4678_v58, 4  ;;  %v4688_v28 = vrot.slane %v7714_v54, 5  ;;  %v6641_v32 = vld [vmem:[#allocation2 + $0x54] sm:$0xff]  }
 0x1b2   : > { %6455 = vmatmul.mubr.msk.bf16.vlgmr.msra.gmra.mxu1 %vm3501_vm7, %v6632_v62  ;;  %v4687_v31 = vrot.slane %v4685_v41, 4  ;;  %v7892_v37 = vsel %vm7347_vm0, %v6128_v53, %v4685_v41  ;;  %v6129_v45 = vrot.slane %v4626_v42, 9  ;;  %v4692_v15 = vrot.slane %v7728_v63, 5  ;;  %v7908_v62 = vld [vmem:[#allocation2 + $0x28] sm:$0xf] }
 0x1b3   : > { %6489 = vmatpush3.bf16.msra.mxu1 %v4760_v60  ;;  %6458 = vmatprep.mubr.msk.bf16.mxu1 %vm3501_vm7, %v6633_v25  ;;  %v7881_v13 = vsel %vm7347_vm0, %v4680_v1, %v4681_v16  ;;  %v5492_v54 = vrot.slane %v7888_v51, 5  ;;  %v4695_v34 = vrot.slane %v7735_v47, 5  ;;  %v6639_v60 = vld [vmem:[#allocation2 + $0x60] sm:$0xff]   ;;  %v5456_v47 = vld [vmem:[#allocation2 + $0x18] sm:$0xe]  ;;  %v4706_v2 = vrot.slane %v7763_v18, 5 }
 0x1b4   : > { %6509 = vmatmul.mubr.msk.bf16.vlgmr.msra.gmra.mxu0 %vm3501_vm7, %v6630_v43  ;;  %6575 = vmatprep.subr.msk.bf16.mxu1 %vm3526_vm2, %v7838_v9  ;;  %v6135_v50 = vcombine.low %v7873_v49, %v7881_v13  ;;  %v7896_v38 = vsel %vm7347_vm0, %v4687_v31, %v4688_v28  ;;  %v7904_v3 = vsel %vm7347_vm0, %v6129_v45, %v4692_v15  ;;  %v4694_v61 = vrot.slane %v4692_v15, 4  ;;  %v4628_v25 = vld [vmem:[#allocation2 + $0x60] sm:$0xe]  ;;  %v7927_v24 = vld [vmem:[#allocation2 + $0x2c] sm:$0x1] }
 0x1b5   : > { %6512 = vmatprep.mubr.msk.bf16.mxu0 %vm3501_vm7, %v6631_v27  ;;  %6543 = vmatpush3.bf16.msra.mxu0 %v5595_v10  ;;  %v6136_v12 = vcombine.low %v7892_v37, %v7896_v38  ;;  %v5494_v10 = vrot.slane %v5492_v54, 4  ;;  %v4709_v22 = vrot.slane %v7778_v26, 5  ;;  %v5499_v36 = vrot.slane %v7908_v62, 5  ;;  %v6643_v18 = vld [vmem:[#allocation2 + $0x60] sm:$0xff]   ;;  %v5458_v58 = vld [vmem:[#allocation2 + $0x30] sm:$0xe] }
 0x1b6   : > { %v7912_v63 = vsel %vm7347_vm0, %v4694_v61, %v4695_v34  ;;  %v5495_v27 = vrot.slane %v7915_v46, 5  ;;  %v6131_v5 = vrot.slane %v4628_v25, 9  ;;  %v4708_v40 = vrot.slane %v4706_v2, 4  ;;  %v7945_v41 = vld [vmem:[#allocation2 + $0x40] sm:$0xf] }
 0x1b7   : > { %v6137_v43 = vcombine.low %v7904_v3, %v7912_v63  ;;  %v6183_v48 = vrot.slane %v5456_v47, 9  ;;  %v5506_v26 = vrot.slane %v7924_v55, 5  ;;  %v5501_v1 = vrot.slane %v5499_v36, 4  ;;  %v7954_v31 = vld [vmem:[#allocation2 + $0x38] sm:$0x1] }
 0x1b8   : > { %v6642_v21 = vld [vmem:[#allocation2 + $0x6c] sm:$0xff]   ;;  %v5496_v0 = vsel %vm7347_vm0, %v5494_v10, %v5495_v27  ;;  %v5502_v53 = vrot.slane %v7927_v24, 5  ;;  %v6185_v28 = vrot.slane %v5458_v58, 9  ;;  %v7957_v15 = vld [vmem:[#allocation2 + $0x58] sm:$0xf]  ;;  %v5513_v35 = vrot.slane %v7945_v41, 5 }
 0x1b9   : > { %v5493_v7 = vsel %vm7347_vm0, %v6183_v48, %v5492_v54  ;;  %v5508_v45 = vrot.slane %v5506_v26, 4  ;;  %v7962_v61 = vld [vmem:[#allocation2 + $0x44] sm:$0x1]  ;;  %v5459_v34 = vld [vmem:[#allocation2 + $0x3c] sm:$0xe]  ;;  %v5527_v47 = vrot.slane %v7957_v15, 5 }
 0x1ba   : > { %6459 = vmatmul.mubr.msk.bf16.gmra.mxu1 %vm3501_vm7, %v6636_v4  ;;  %v7934_v4 = vsel %vm7347_vm0, %v6131_v5, %v4706_v2  ;;  %v6191_v42 = vcombine.low %v5493_v7, %v5496_v0  ;;  %v5503_v54 = vsel %vm7347_vm0, %v5501_v1, %v5502_v53  ;;  %v7971_v25 = vld [vmem:[#allocation2 + $0x50] sm:$0x1]  ;;  %v7974_v10 = vld [vmem:[#allocation2 + $0x64] sm:$0xf]  ;;  %v5341_v27 = vsel %vm3526_vm2, %v7838_v9, 0 }
 0x1bb   : > { %6462 = vmatprep.mubr.msk.bf16.mxu1 %vm3501_vm7, %v6637_v14  ;;  %v7938_v14 = vsel %vm7347_vm0, %v4708_v40, %v4709_v22  ;;  %v5074_v5 = vld [vmem:[#allocation2 + $0x18] sm:$0xf]  ;;  %v6186_v40 = vrot.slane %v5459_v34, 9  ;;  %v5515_v48 = vrot.slane %v5513_v35, 4  ;;  %v7980_v0 = vld [vmem:[#allocation2 + $0x5c] sm:$0x1] }
 0x1bc   : > { %6513 = vmatmul.mubr.msk.bf16.gmra.mxu0 %vm3501_vm7, %v6634_v30  ;;  %v6139_v16 = vcombine.low %v7934_v4, %v7938_v14  ;;  %v5457_v30 = vld [vmem:[#allocation2 + $0x24] sm:$0xe]  ;;  %v5523_v1 = vrot.slane %v7971_v25, 5  ;;  %v5462_v7 = vld [vmem:[#allocation2 + $0x60] sm:$0xe]  ;;  %v5534_v9 = vrot.slane %v7974_v10, 5 }
 0x1bd   : > { %6516 = vmatprep.mubr.msk.bf16.mxu0 %vm3501_vm7, %v6635_v59  ;;  %v7947_v59 = vld [vmem:[#allocation2 + $0x4c] sm:$0xf]  ;;  %v4699_v17 = vrot.slane %v7744_v33, 5  ;;  %v5101_v23 = vshrl.u32 %v5074_v5, 16  ;;  %v5514_v53 = vsel %vm7347_vm0, %v6186_v40, %v5513_v35  ;;  %v4627_v34 = vld [vmem:[#allocation2 + $0x54] sm:$0xe] }
 0x1be   : > { %v5520_v6 = vrot.slane %v7947_v59, 5  ;;  %v5536_v35 = vrot.slane %v5534_v9, 4  ;;  %v5463_v49 = vld [vmem:[#allocation2 + $0x6c] sm:$0xe]  ;;  %v5230_v4 = vshll.u32 %v7957_v15, 16  ;;  %v5234_v14 = vshrl.u32 %v7957_v15, 16 }
 0x1c2   : > { %6463 = vmatmul.mubr.msk.bf16.gmra.mxu1 %vm3501_vm7, %v6640_v19  ;;  %v6184_v19 = vrot.slane %v5457_v30, 9  ;;  %v5529_v30 = vrot.slane %v5527_v47, 4 }
 0x1c3   : > { %6466 = vmatprep.mubr.msk.bf16.mxu1 %vm3501_vm7, %v6641_v32  ;;  %v5460_v32 = vld [vmem:[#allocation2 + $0x48] sm:$0xe] }
 0x1c4   : > { %6517 = vmatmul.mubr.msk.bf16.gmra.mxu0 %vm3501_vm7, %v6638_v52  ;;  %v5500_v52 = vsel %vm7347_vm0, %v6184_v19, %v5499_v36  ;;  %v6187_v36 = vrot.slane %v5460_v32, 9  ;;  %v4701_v32 = vrot.slane %v4699_v17, 4 }
 0x1c5   : > { %6520 = vmatprep.mubr.msk.bf16.mxu0 %vm3501_vm7, %v6639_v60  ;;  %v5507_v60 = vsel %vm7347_vm0, %v6185_v28, %v5506_v26  ;;  %v6192_v2 = vcombine.low %v5500_v52, %v5503_v54  ;;  %v5516_v26 = vrot.slane %v7962_v61, 5  ;;  %v5110_v28 = vshll.u32 %v7888_v51, 16 }
 0x1c6   : > { %v5521_v57 = vsel %vm7347_vm0, %v6187_v36, %v5520_v6  ;;  %v6189_v54 = vrot.slane %v5462_v7, 9  ;;  %v5103_v52 = vrot.slane %v5101_v23, 4  ;;  %v5080_v7 = vld [vmem:[#allocation2 + $0x30] sm:$0xf] }
 0x1c7   : > { %v5517_v8 = vsel %vm7347_vm0, %v5515_v48, %v5516_v26  ;;  %v6130_v26 = vrot.slane %v4627_v34, 9  ;;  %v5149_v38 = vshrl.u32 %v5080_v7, 16 }
 0x1c8   : > { %v6194_v40 = vcombine.low %v5514_v53, %v5517_v8  ;;  %v5158_v53 = vshll.u32 %v7924_v55, 16 }
 0x1c9   : > { %v4700_v8 = vsel %vm7347_vm0, %v6130_v26, %v4699_v17  ;;  %v5144_v17 = vshll.u32 %v7927_v24, 16 }
 0x1ca   : > { %6467 = vmatmul.mubr.msk.bf16.gmra.mxu1 %vm3501_vm7, %v6643_v18  ;;  %v5461_v18 = vld [vmem:[#allocation2 + $0x54] sm:$0xe] }
 0x1cb   : > { %6490 = vmatprep.mubr.msk.bf16.mxu1 %vm3501_vm7, %v6132_v20  ;;  %v5509_v20 = vrot.slane %v7954_v31, 5  ;;  %v6188_v19 = vrot.slane %v5461_v18, 9 }
 0x1cc   : > { %6521 = vmatmul.mubr.msk.bf16.gmra.mxu0 %vm3501_vm7, %v6642_v21  ;;  %v5522_v21 = vrot.slane %v5520_v6, 4 }
 0x1cd   : > { %6544 = vmatprep.mubr.msk.bf16.mxu0 %vm3501_vm7, %v6191_v42  ;;  %v5510_v22 = vsel %vm7347_vm0, %v5508_v45, %v5509_v20  ;;  %v7993_v42 = vld [vmem:[#allocation2 + $0x68] sm:$0x1]  ;;  %v5114_v45 = vshrl.u32 %v7888_v51, 16  ;;  %v5528_v36 = vsel %vm7347_vm0, %v6188_v19, %v5527_v47 }
 0x1ce   : > { %v6193_v58 = vcombine.low %v5507_v60, %v5510_v22  ;;  %v5524_v33 = vsel %vm7347_vm0, %v5522_v21, %v5523_v1  ;;  %v5537_v20 = vrot.slane %v7993_v42, 5  ;;  %v5077_v22 = vld [vmem:[#allocation2 + $0x24] sm:$0xf]  ;;  %v4702_v21 = vrot.slane %v7753_v39, 5  ;;  %v8030_v1 = vld [vmem:[#allocation2 + $0x70] sm:$0xf] }
 0x1cf   : > { %v5116_v6 = vrot.slane %v5114_v45, 4  ;;  %v6195_v48 = vcombine.low %v5521_v57, %v5524_v33  ;;  %v5541_v13 = vrot.slane %v8030_v1, 5  ;;  %v5125_v47 = vshrl.u32 %v5077_v22, 16 }
 0x1d0   : > { %v4703_v39 = vsel %vm7347_vm0, %v4701_v32, %v4702_v21  ;;  %v5128_v23 = vshll.u32 %v5077_v22, 16  ;;  %v6190_v57 = vrot.slane %v5463_v49, 9  ;;  %v5120_v33 = vshll.u32 %v7915_v46, 16 }
 0x1d1   : > { %v5543_v19 = vrot.slane %v5541_v13, 4 }
 0x1d2   : > { %6491 = vmatmul.mubr.msk.bf16.vlgmr.msra.gmra.mxu1 %vm3501_vm7, %v6133_v29  ;;  %v5104_v29 = vshll.u32 %v5074_v5, 16  ;;  %v5138_v5 = vshrl.u32 %v7908_v62, 16  ;;  %v5130_v34 = vrot.slane %v5128_v23, 5  ;;  %v5122_v46 = vrot.slane %v5120_v33, 5 }
 0x1d3   : > { %6525 = vmatpush3.bf16.msra.mxu1 %v5341_v27  ;;  %6494 = vmatprep.mubr.msk.bf16.mxu1 %vm3501_vm7, %v6134_v56  ;;  %v5530_v56 = vrot.slane %v7980_v0, 5  ;;  %v5134_v27 = vshll.u32 %v7908_v62, 16  ;;  %v5538_v62 = vsel %vm7347_vm0, %v5536_v35, %v5537_v20  ;;  %v5127_v35 = vrot.slane %v5125_v47, 4 }
 0x1d4   : > { %6545 = vmatmul.mubr.msk.bf16.vlgmr.msra.gmra.mxu0 %vm3501_vm7, %v6192_v2  ;;  %v5106_v60 = vrot.slane %v5104_v29, 5  ;;  %v8014_v2 = vrot.slane %v5110_v28, 5  ;;  %v5140_v37 = vrot.slane %v5138_v5, 4  ;;  %v5162_v28 = vshrl.u32 %v7924_v55, 16 }
 0x1d5   : > { %6548 = vmatprep.mubr.msk.bf16.mxu0 %vm3501_vm7, %v6193_v58  ;;  %v8012_v51 = vsel %vm7347_vm0, %v5529_v30, %v5530_v56  ;;  %v5535_v58 = vsel %vm7347_vm0, %v6189_v54, %v5534_v9  ;;  %v8040_v9 = vld [vmem:[#allocation2 + $0x74] sm:$0x1]  ;;  %v8043_v29 = vrot.slane %v5134_v27, 5  ;;  %v6138_v56 = vcombine.low %v4700_v8, %v4703_v39  ;;  %v5083_v27 = vld [vmem:[#allocation2 + $0x3c] sm:$0xf] }
 0x1d6   : > { %v6196_v18 = vcombine.low %v5528_v36, %v8012_v51  ;;  %v5117_v30 = vor.u32 %v5116_v6, %v8014_v2  ;;  %v6197_v45 = vcombine.low %v5535_v58, %v5538_v62  ;;  %v5544_v54 = vrot.slane %v8040_v9, 5 }
 0x1d7   : > { %v5141_v32 = vor.u32 %v5140_v37, %v8043_v29  ;;  %v8053_v6 = vrot.slane %v5158_v53, 5  ;;  %v5164_v22 = vrot.slane %v5162_v28, 4  ;;  %v5182_v5 = vshll.u32 %v7945_v41, 16 }
 0x1d8   : > { %v5118_v51 = vrot.slane %v5117_v30, 4  ;;  %v5545_v36 = vsel %vm7347_vm0, %v5543_v19, %v5544_v54  ;;  %v5131_v24 = vor.u32 %v5130_v34, %v5127_v35  ;;  %v5173_v44 = vshrl.u32 %v5083_v27, 16  ;;  %v5089_v54 = vld [vmem:[#allocation2 + $0x54] sm:$0xf] }
 0x1d9   : > { %v5165_v62 = vor.u32 %v5164_v22, %v8053_v6  ;;  %v5176_v26 = vshll.u32 %v5083_v27, 16  ;;  %v5168_v39 = vshll.u32 %v7954_v31, 16  ;;  %v5210_v47 = vshrl.u32 %v7947_v59, 16 }
 0x1da   : > { %6495 = vmatmul.mubr.msk.bf16.gmra.mxu1 %vm3501_vm7, %v6135_v50  ;;  %v5107_v50 = vor.u32 %v5106_v60, %v5103_v52  ;;  %v5086_v52 = vld [vmem:[#allocation2 + $0x48] sm:$0xf]  ;;  %v5151_v60 = vrot.slane %v5149_v38, 4  ;;  %v5132_v23 = vrot.slane %v5131_v24, 4  ;;  %v5175_v53 = vrot.slane %v5173_v44, 4 }
 0x1db   : > { %6498 = vmatprep.mubr.msk.bf16.mxu1 %vm3501_vm7, %v6136_v12  ;;  %v5152_v12 = vshll.u32 %v5080_v7, 16  ;;  %v5197_v21 = vshrl.u32 %v5086_v52, 16  ;;  %v5200_v3 = vshll.u32 %v5086_v52, 16  ;;  %v5146_v7 = vrot.slane %v5144_v17, 5 }
 0x1dc   : > { %6549 = vmatmul.mubr.msk.bf16.gmra.mxu0 %vm3501_vm7, %v6194_v40  ;;  %v5108_v20 = vrot.slane %v5107_v50, 4  ;;  %v5186_v40 = vshrl.u32 %v7945_v41, 16  ;;  %v5142_v41 = vrot.slane %v5141_v32, 4  ;;  %v5206_v50 = vshll.u32 %v7947_v59, 16 }
 0x1dd   : > { %6552 = vmatprep.mubr.msk.bf16.mxu0 %vm3501_vm7, %v6195_v48  ;;  %v5154_v55 = vrot.slane %v5152_v12, 5  ;;  %v5542_v48 = vsel %vm7347_vm0, %v6190_v57, %v5541_v13  ;;  %v5199_v13 = vrot.slane %v5197_v21, 4  ;;  %v5166_v12 = vrot.slane %v5165_v62, 4 }
 0x1de   : > { %v5113_v63 = vsel %vm7450_vm15, %v5108_v20, %v8014_v2  ;;  %v5188_v49 = vrot.slane %v5186_v40, 4  ;;  %v5202_v2 = vrot.slane %v5200_v3, 5  ;;  %v5147_v37 = vsel %vm7450_vm15, %v5142_v41, %v5146_v7  ;;  %v5095_v3 = vld [vmem:[#allocation2 + $0x6c] sm:$0xf] }
 0x1df   : > { %v5155_v58 = vor.u32 %v5154_v55, %v5151_v60  ;;  %v5178_v28 = vrot.slane %v5176_v26, 5  ;;  %v5137_v31 = vsel %vm7450_vm15, %v5132_v23, %v8043_v29  ;;  %v5170_v8 = vrot.slane %v5168_v39, 5 }
 0x1e0   : > { %v5203_v57 = vor.u32 %v5202_v2, %v5199_v13  ;;  %v5208_v33 = vrot.slane %v5206_v50, 5  ;;  %v6167_v19 = vcombine.low %v5137_v31, %v5147_v37  ;;  %v5192_v20 = vshll.u32 %v7962_v61, 16 }
 0x1e1   : > { %v5156_v38 = vrot.slane %v5155_v58, 4  ;;  %v5171_v29 = vsel %vm7450_vm15, %v5166_v12, %v5170_v8  ;;  %v5179_v35 = vor.u32 %v5178_v28, %v5175_v53  ;;  %v5216_v32 = vshll.u32 %v7971_v25, 16 }
 0x1e2   : > { %6499 = vmatmul.mubr.msk.bf16.gmra.mxu1 %vm3501_vm7, %v6137_v43  ;;  %v5123_v43 = vsel %vm7450_vm15, %v5118_v51, %v5122_v46  ;;  %v5092_v51 = vld [vmem:[#allocation2 + $0x60] sm:$0xf]  ;;  %v5254_v52 = vshll.u32 %v7974_v10, 16  ;;  %v5258_v60 = vshrl.u32 %v7974_v10, 16  ;;  %v5204_v55 = vrot.slane %v5203_v57, 4 }
 0x1e3   : > { %6502 = vmatprep.mubr.msk.bf16.mxu1 %vm3501_vm7, %v6138_v56  ;;  %v6166_v30 = vcombine.low %v5113_v63, %v5123_v43  ;;  %v5212_v56 = vrot.slane %v5210_v47, 4  ;;  %v5221_v22 = vshrl.u32 %v5089_v54, 16  ;;  %v5224_v46 = vshll.u32 %v5089_v54, 16 }
 0x1e4   : > { %6553 = vmatmul.mubr.msk.bf16.gmra.mxu0 %vm3501_vm7, %v6196_v18  ;;  %v8076_v18 = vrot.slane %v5182_v5, 5  ;;  %v5232_v17 = vrot.slane %v5230_v4, 5  ;;  %v5245_v27 = vshrl.u32 %v5092_v51, 16  ;;  %v5248_v5 = vshll.u32 %v5092_v51, 16 }
 0x1e5   : > { %6556 = vmatprep.mubr.msk.bf16.mxu0 %vm3501_vm7, %v6197_v45  ;;  %v6198_v45 = vcombine.low %v5542_v48, %v5545_v36  ;;  %v5213_v15 = vor.u32 %v5212_v56, %v5208_v33  ;;  %v5194_v48 = vrot.slane %v5192_v20, 5  ;;  %v5180_v61 = vrot.slane %v5179_v35, 4 }
 0x1e6   : > { %v5189_v59 = vor.u32 %v5188_v49, %v8076_v18  ;;  %v5218_v36 = vrot.slane %v5216_v32, 5  ;;  %v5256_v21 = vrot.slane %v5254_v52, 5  ;;  %v5260_v25 = vrot.slane %v5258_v60, 4 }
 0x1e7   : > { %v5214_v63 = vrot.slane %v5213_v15, 4  ;;  %v5223_v43 = vrot.slane %v5221_v22, 4  ;;  %v5226_v24 = vrot.slane %v5224_v46, 5  ;;  %v5209_v41 = vsel %vm7450_vm15, %v5204_v55, %v5208_v33 }
 0x1e8   : > { %v5190_v34 = vrot.slane %v5189_v59, 4  ;;  %v5247_v62 = vrot.slane %v5245_v27, 4  ;;  %v5250_v44 = vrot.slane %v5248_v5, 5  ;;  %v5269_v26 = vshrl.u32 %v5095_v3, 16 }
 0x1e9   : > { %v5272_v7 = vshll.u32 %v5095_v3, 16  ;;  %v5278_v39 = vshll.u32 %v8030_v1, 16  ;;  %v5282_v49 = vshrl.u32 %v8030_v1, 16  ;;  %v5261_v13 = vor.u32 %v5260_v25, %v5256_v21 }
 0x1ea   : > { %6503 = vmatmul.mubr.msk.bf16.gmra.mxu1 %vm3501_vm7, %v6139_v16  ;;  %v5161_v16 = vsel %vm7450_vm15, %v5156_v38, %v8053_v6  ;;  %v5236_v6 = vrot.slane %v5234_v14, 4  ;;  %v5195_v10 = vsel %vm7450_vm15, %v5190_v34, %v5194_v48  ;;  %v5264_v2 = vshll.u32 %v7993_v42, 16 }
 0x1eb   : > { %6526 = vmatprep.mubr.msk.bf16.mxu1 %vm3501_vm7, %v6166_v30  ;;  %v6168_v40 = vcombine.low %v5161_v16, %v5171_v29  ;;  %v5185_v50 = vsel %vm7450_vm15, %v5180_v61, %v8076_v18  ;;  %v5219_v47 = vsel %vm7450_vm15, %v5214_v63, %v5218_v36  ;;  %v5227_v30 = vor.u32 %v5226_v24, %v5223_v43 }
 0x1ec   : > { %6557 = vmatmul.mubr.msk.bf16.gmra.mxu0 %vm3501_vm7, %v6198_v45  ;;  %v5237_v58 = vor.u32 %v5236_v6, %v5232_v17  ;;  %v5240_v23 = vshll.u32 %v7980_v0, 16  ;;  %v6169_v37 = vcombine.low %v5185_v50, %v5195_v10  ;;  %v6170_v38 = vcombine.low %v5209_v41, %v5219_v47 }
 0x1ed   : > { %v5251_v53 = vor.u32 %v5250_v44, %v5247_v62  ;;  %v5271_v28 = vrot.slane %v5269_v26, 4  ;;  %v5274_v45 = vrot.slane %v5272_v7, 5  ;;  %v5280_v1 = vrot.slane %v5278_v39, 5 }
 0x1ee   : > { %v5238_v12 = vrot.slane %v5237_v58, 4  ;;  %v5284_v31 = vrot.slane %v5282_v49, 4  ;;  %v5262_v42 = vrot.slane %v5261_v13, 4  ;;  %v5266_v59 = vrot.slane %v5264_v2, 5 }
 0x1ef   : > { %v5228_v18 = vrot.slane %v5227_v30, 4  ;;  %v5242_v8 = vrot.slane %v5240_v23, 5  ;;  %v5252_v57 = vrot.slane %v5251_v53, 4  ;;  %v5275_v33 = vor.u32 %v5274_v45, %v5271_v28 }
 0x1f0   : > { %v5285_v56 = vor.u32 %v5284_v31, %v5280_v1  ;;  %v5267_v54 = vsel %vm7450_vm15, %v5262_v42, %v5266_v59 }
 0x1f1   : > { %v5243_v0 = vsel %vm7450_vm15, %v5238_v12, %v5242_v8  ;;  %v5233_v4 = vsel %vm7450_vm15, %v5228_v18, %v5232_v17  ;;  %v5257_v16 = vsel %vm7450_vm15, %v5252_v57, %v5256_v21  ;;  %v5276_v35 = vrot.slane %v5275_v33, 4 }
 0x1f2   : > { %6527 = vmatmul.mubr.msk.bf16.vlgmr.msra.gmra.mxu1 %vm3501_vm7, %v6167_v19  ;;  %v5288_v19 = vshll.u32 %v8040_v9, 16  ;;  %v6171_v14 = vcombine.low %v5233_v4, %v5243_v0  ;;  %v6172_v29 = vcombine.low %v5257_v16, %v5267_v54  ;;  %v5286_v20 = vrot.slane %v5285_v56, 4 }
 0x1f3   : > { %6530 = vmatprep.mubr.msk.bf16.mxu1 %vm3501_vm7, %v6168_v40  ;;  %v5281_v9 = vsel %vm7450_vm15, %v5276_v35, %v5280_v1 }
 0x1f4   : > { %v5290_v51 = vrot.slane %v5288_v19, 5 }
 0x1f6   : > { %v5291_v34 = vsel %vm7450_vm15, %v5286_v20, %v5290_v51 }
 0x1f7   : > { %v6173_v32 = vcombine.low %v5281_v9, %v5291_v34 }
 0x1fa   : > { %6531 = vmatmul.mubr.msk.bf16.gmra.mxu1 %vm3501_vm7, %v6169_v37 }
 0x1fb   : > { %6534 = vmatprep.mubr.msk.bf16.mxu1 %vm3501_vm7, %v6170_v38 }
 0x202   : > { %6535 = vmatmul.mubr.msk.bf16.gmra.mxu1 %vm3501_vm7, %v6171_v14 }
 0x203   : > { %6538 = vmatprep.mubr.msk.bf16.mxu1 %vm3501_vm7, %v6172_v29 }
 0x20a   : > { %6539 = vmatmul.mubr.msk.bf16.gmra.mxu1 %vm3501_vm7, %v6173_v32 }
 0x20e   : > { %v8136_v52 = vpop.f32.mrf.mxu0 }
 0x210   : > { %v8138_v60 = vpop.f32.mrf.mxu0 }
 0x212   : > { %v8140_v55 = vpop.f32.mrf.mxu0 }
 0x214   : > { %v3964_v15 = vpop.f32.mrf.mxu0 }
 0x222   : > { %v6402_v22 = vpop.f32.mrf.mxu1 }
 0x223   : > { %v6442_v17 = vpop.f32.mrf.mxu0 }
 0x224   : > { %v3564_v46 = vpop.f32.mrf.mxu1 }
 0x225   : > { %v3977_v27 = vpop.f32.mrf.mxu0 }
 0x226   : > { %v6403_v6 = vpop.f32.mrf.mxu1 }
 0x227   : > { %v6443_v40 = vpop.f32.mrf.mxu0 }
 0x228   : > { %v3567_v5 = vpop.f32.mrf.mxu1 }
 0x229   : > { %v3980_v11 = vpop.f32.mrf.mxu0 }
 0x22d   : > { %v6406_v48 = vpop.f32.mrf.mxu1 }
 0x22f   : > { %v3580_v61 = vpop.f32.mrf.mxu1 }
 0x231   : > { %v6407_v25 = vpop.f32.mrf.mxu1 }
 0x233   : > { %v6446_v36 = vpop.f32.mrf.mxu0  ;;  %v3583_v10 = vpop.f32.mrf.mxu1 }
 0x235   : > { %v3993_v21 = vpop.f32.mrf.mxu0 }
 0x237   : > { %v6447_v3 = vpop.f32.mrf.mxu0 }
 0x239   : > { %v3996_v43 = vpop.f32.mrf.mxu0 }
 0x23c   : > { %v6410_v63 = vpop.f32.mrf.mxu1 }
 0x23e   : > { %v3596_v41 = vpop.f32.mrf.mxu1 }
 0x23f   : > { %v6450_v24 = vpop.f32.mrf.mxu0 }
 0x240   : > { %v6411_v62 = vpop.f32.mrf.mxu1 }
 0x241   : > { %v8142_v58 = vpop.f32.mrf.mxu0 }
 0x242   : > { %v3599_v26 = vpop.f32.mrf.mxu1 }
 0x243   : > { %v8144_v44 = vpop.f32.mrf.mxu0 }
 0x245   : > { %v8146_v39 = vpop.f32.mrf.mxu0 }
 0x24a   : > { %v6414_v7 = vpop.f32.mrf.mxu1 }
 0x24c   : > { %v3612_v49 = vpop.f32.mrf.mxu1 }
 0x24e   : > { %v6415_v13 = vpop.f32.mrf.mxu1 }
 0x24f   : > { %v8148_v2 = vpop.f32.mrf.mxu0 }
 0x250   : > { %v3615_v50 = vpop.f32.mrf.mxu1 }
 0x251   : > { %v8150_v47 = vpop.f32.mrf.mxu0 }
 0x252   : > { %v6420_v30 = vpop.f32.mrf.mxu1 }
 0x253   : > { %v8152_v23 = vadd.f32 %v6420_v30, %v6402_v22  ;;  %v8154_v37 = vpop.f32.mrf.mxu0 }
 0x254   : > { %v3728_v38 = vpop.f32.mrf.mxu1 }
 0x255   : > { %v8156_v12 = vadd.f32 %v3728_v38, %v3564_v46  ;;  %v8158_v53 = vpop.f32.mrf.mxu0 }
 0x256   : > { %v6421_v28 = vpop.f32.mrf.mxu1 }
 0x257   : > { %v8160_v45 = vadd.f32 %v6421_v28, %v6403_v6 }
 0x258   : > { %v8162_v1 = vpop.f32.mrf.mxu0  ;;  %v3731_v31 = vpop.f32.mrf.mxu1 }
 0x259   : > { %v3732_v42 = vadd.f32 %v3731_v31, %v3567_v5 }
 0x25a   : > { %v8164_v59 = vpop.f32.mrf.mxu0  ;;  %v6424_v18 = vpop.f32.mrf.mxu1 }
 0x25b   : > { %v3753_v8 = vadd.f32 %v6424_v18, %v6406_v48  ;;  %v8166_v57 = vadd.f32 %v3964_v15, %v3732_v42 }
 0x25c   : > { %v8168_v0 = vpop.f32.mrf.mxu0  ;;  %v3744_v33 = vpop.f32.mrf.mxu1 }
 0x25d   : > { %v3745_v56 = vadd.f32 %v3744_v33, %v3580_v61  ;;  %v8170_v19 = vadd.f32 %v6442_v17, %v3753_v8 }
 0x25e   : > { %v8172_v54 = vpop.f32.mrf.mxu0  ;;  %v6425_v4 = vpop.f32.mrf.mxu1 }
 0x25f   : > { %v3756_v14 = vadd.f32 %v6425_v4, %v6407_v25  ;;  %v8174_v16 = vadd.f32 %v3977_v27, %v3745_v56 }
 0x260   : > { %v3747_v29 = vpop.f32.mrf.mxu1 }
 0x261   : > { %v3748_v35 = vadd.f32 %v3747_v29, %v3583_v10  ;;  %v8176_v20 = vadd.f32 %v6443_v40, %v3756_v14 }
 0x262   : > { %v8178_v51 = vpop.f32.mrf.mxu0  ;;  %v6428_v9 = vpop.f32.mrf.mxu1 }
 0x263   : > { %v3769_v34 = vadd.f32 %v6428_v9, %v6410_v63  ;;  %v8180_v32 = vadd.f32 %v3980_v11, %v3748_v35 }
 0x264   : > { %v8182_v15 = vpop.f32.mrf.mxu0  ;;  %v3760_v22 = vpop.f32.mrf.mxu1 }
 0x265   : > { %v3761_v46 = vadd.f32 %v3760_v22, %v3596_v41  ;;  %v8184_v17 = vadd.f32 %v6446_v36, %v3769_v34 }
 0x266   : > { %v8186_v6 = vpop.f32.mrf.mxu0  ;;  %v6429_v27 = vpop.f32.mrf.mxu1 }
 0x267   : > { %v3772_v5 = vadd.f32 %v6429_v27, %v6411_v62  ;;  %v8188_v48 = vadd.f32 %v3993_v21, %v3761_v46 }
 0x268   : > { %v8190_v40 = vpop.f32.mrf.mxu0  ;;  %v3763_v61 = vpop.f32.mrf.mxu1 }
 0x269   : > { %8505 = vst [vmem:[#allocation3_spill] sm:$0xff] %v8190_v40  ;;  %v3764_v25 = vadd.f32 %v3763_v61, %v3599_v26  ;;  %v8192_v10 = vadd.f32 %v6447_v3, %v3772_v5 }
 0x26a   : > { %v6432_v11 = vpop.f32.mrf.mxu1 }
 0x26b   : > { %v3785_v63 = vadd.f32 %v6432_v11, %v6414_v7  ;;  %v8194_v30 = vadd.f32 %v3996_v43, %v3764_v25  ;;  %v8196_v38 = vpop.f32.mrf.mxu0 }
 0x26c   : > { %8506 = vst [vmem:[#allocation4_spill] sm:$0xff] %v8196_v38  ;;  %v3776_v36 = vpop.f32.mrf.mxu1 }
 0x26d   : > { %v3777_v41 = vadd.f32 %v3776_v36, %v3612_v49  ;;  %v8198_v28 = vadd.f32 %v6450_v24, %v3785_v63  ;;  %v8200_v31 = vpop.f32.mrf.mxu0 }
 0x26e   : > { %8507 = vst [vmem:[#allocation5_spill] sm:$0xff] %v8200_v31  ;;  %v6433_v21 = vpop.f32.mrf.mxu1 }
 0x26f   : > { %v3788_v62 = vadd.f32 %v6433_v21, %v6415_v13  ;;  %v8203_v42 = vadd.f32 %v8142_v58, %v3777_v41  ;;  %v8205_v26 = vpop.f32.mrf.mxu0 }
 0x270   : > { %8509 = vst [vmem:[#allocation7_spill] sm:$0xff] %v8205_v26  ;;  %v3779_v3 = vpop.f32.mrf.mxu1 }
 0x271   : > { %8508 = vst [vmem:[#allocation6_spill] sm:$0xff] %v8203_v42  ;;  %v3780_v18 = vadd.f32 %v3779_v3, %v3615_v50  ;;  %v8208_v43 = vadd.f32 %v8144_v44, %v3788_v62  ;;  %v8210_v7 = vpop.f32.mrf.mxu0 }
 0x272   : > { %8511 = vst [vmem:[#allocation9_spill] sm:$0xff] %v8210_v7  ;;  %v6456_v8 = vpop.f32.mrf.mxu1 }
 0x273   : > { %8510 = vst [vmem:[#allocation8_spill] sm:$0xff] %v8208_v43  ;;  %v8213_v24 = vadd.f32 %v8146_v39, %v3780_v18 }
 0x274   : > { %v8215_v49 = vpop.f32.mrf.mxu0  ;;  %v4160_v33 = vpop.f32.mrf.mxu1 }
 0x275   : > { %8512 = vst [vmem:[#allocation10_spill] sm:$0xff] %v8213_v24 }
 0x276   : > { %v8217_v13 = vpop.f32.mrf.mxu0  ;;  %v6457_v58 = vpop.f32.mrf.mxu1 }
 0x278   : > { %v8219_v56 = vpop.f32.mrf.mxu0  ;;  %v4163_v4 = vpop.f32.mrf.mxu1 }
 0x27a   : > { %v8221_v14 = vpop.f32.mrf.mxu0  ;;  %v6460_v50 = vpop.f32.mrf.mxu1 }
 0x27c   : > { %v8223_v44 = vpop.f32.mrf.mxu0  ;;  %v4176_v29 = vpop.f32.mrf.mxu1 }
 0x27d   : > { %8513 = vst [vmem:[#allocation11_spill] sm:$0xff] %v8223_v44  ;;  %v4024_v44 = vadd.f32 %v8138_v60, %v8156_v12  ;;  %v4224_v60 = vadd.f32 %v4163_v4, %v8166_v57 }
 0x27e   : > { %v8225_v35 = vpop.f32.mrf.mxu0  ;;  %v6461_v9 = vpop.f32.mrf.mxu1 }
 0x27f   : > { %8514 = vst [vmem:[#allocation12_spill] sm:$0xff] %v8225_v35  ;;  %v4606_v4 = vadd.f32 %v8158_v53, %v4224_v60 }
 0x280   : > { %v8227_v39 = vpop.f32.mrf.mxu0  ;;  %v4179_v34 = vpop.f32.mrf.mxu1 }
 0x281   : > { %8515 = vst [vmem:[#allocation13_spill] sm:$0xff] %v8227_v39  ;;  %v4026_v39 = vadd.f32 %v8136_v52, %v8152_v23  ;;  %v4228_v57 = vadd.f32 %v4179_v34, %v8180_v32 }
 0x282   : > { %v8229_v22 = vpop.f32.mrf.mxu0  ;;  %v8231_v46 = vpop.f32.mrf.mxu1 }
 0x283   : > { %8516 = vst [vmem:[#allocation14_spill] sm:$0xff] %v8229_v22  ;;  %v4225_v35 = vadd.f32 %v6456_v8, %v4026_v39 }
 0x284   : > { %v8233_v27 = vpop.f32.mrf.mxu0  ;;  %v8235_v5 = vpop.f32.mrf.mxu1 }
 0x285   : > { %8517 = vst [vmem:[#allocation15_spill] sm:$0xff] %v8233_v27  ;;  %v4231_v32 = vadd.f32 %v8235_v5, %v8188_v48 }
 0x286   : > { %v8237_v61 = vpop.f32.mrf.mxu0  ;;  %v8239_v25 = vpop.f32.mrf.mxu1 }
 0x287   : > { %8518 = vst [vmem:[#allocation16_spill] sm:$0xff] %v8237_v61  ;;  %v4234_v53 = vadd.f32 %v8239_v25, %v8192_v10 }
 0x288   : > { %v8241_v11 = vpop.f32.mrf.mxu0  ;;  %v8243_v63 = vpop.f32.mrf.mxu1 }
 0x289   : > { %8519 = vst [vmem:[#allocation17_spill] sm:$0xff] %v8241_v11 }
 0x28a   : > { %v8245_v36 = vpop.f32.mrf.mxu0  ;;  %v8247_v41 = vpop.f32.mrf.mxu1 }
 0x28b   : > { %8520 = vst [vmem:[#allocation18_spill] sm:$0xff] %v8245_v36 }
 0x28c   : > { %v8249_v21 = vpop.f32.mrf.mxu0  ;;  %v8251_v62 = vpop.f32.mrf.mxu1 }
 0x28d   : > { %8521 = vst [vmem:[#allocation19_spill] sm:$0xff] %v8249_v21  ;;  %8522 = vst [vmem:[#allocation20_spill] sm:$0xff] %v8251_v62 }
 0x28e   : > { %v8253_v3 = vpop.f32.mrf.mxu0  ;;  %v8255_v18 = vpop.f32.mrf.mxu1 }
 0x28f   : > { %8523 = vst [vmem:[#allocation21_spill] sm:$0xff] %v8253_v3  ;;  %8524 = vst [vmem:[#allocation22_spill] sm:$0xff] %v8255_v18 }
 0x290   : > { %v8257_v7 = vpop.f32.mrf.mxu0  ;;  %v8259_v26 = vpop.f32.mrf.mxu1 }
 0x291   : > { %8525 = vst [vmem:[#allocation23_spill] sm:$0xff] %v8257_v7  ;;  %8526 = vst [vmem:[#allocation24_spill] sm:$0xff] %v8259_v26 }
 0x292   : > { %v8261_v61 = vpop.f32.mrf.mxu0  ;;  %v6492_v11 = vpop.f32.mrf.mxu1 }
 0x293   : > { %8527 = vst [vmem:[#allocation25_spill] sm:$0xff] %v8261_v61 }
 0x294   : > { %v4796_v31 = vpop.f32.mrf.mxu1  ;;  %v6546_v24 = vpop.f32.mrf.mxu0 }
 0x296   : > { %v6493_v36 = vpop.f32.mrf.mxu1  ;;  %v8263_v22 = vpop.f32.mrf.mxu0 }
 0x298   : > { %v4799_v27 = vpop.f32.mrf.mxu1  ;;  %v8265_v3 = vpop.f32.mrf.mxu0 }
 0x29a   : > { %v6496_v21 = vpop.f32.mrf.mxu1  ;;  %v8271_v26 = vpop.f32.mrf.mxu0 }
 0x29b   : > { %8528 = vst [vmem:[#allocation26_spill] sm:$0xff] %v8271_v26 }
 0x29c   : > { %v4812_v38 = vpop.f32.mrf.mxu1  ;;  %v8279_v62 = vpop.f32.mrf.mxu0 }
 0x29d   : > { %8531 = vst [vmem:[#allocation29_spill] sm:$0xff] %v8279_v62  ;;  %v4607_v62 = vadd.f32 %v8148_v2, %v4225_v35  ;;  %v4227_v2 = vadd.f32 %v4176_v29, %v8174_v16  ;;  %v4860_v16 = vadd.f32 %v4799_v27, %v4606_v4  ;;  %v4232_v27 = vadd.f32 %v8243_v63, %v8194_v30 }
 0x29e   : > { %v8267_v18 = vpop.f32.mrf.mxu1  ;;  %v8291_v26 = vpop.f32.mrf.mxu0  ;;  %v4616_v63 = vadd.f32 %v8186_v6, %v4234_v53  ;;  %v8533_v6 = vld [vmem:[#allocation11_spill] sm:$0xff]  ;;  %v8540_v53 = vld [vmem:[#allocation8_spill] sm:$0xff] }
 0x29f   : > { %v4861_v12 = vadd.f32 %v6492_v11, %v4607_v62 }
 0x2a0   : > { %v8269_v7 = vpop.f32.mrf.mxu1 }
 0x2a2   : > { %v8273_v61 = vpop.f32.mrf.mxu1 }
 0x2a3   : > { %8529 = vst [vmem:[#allocation27_spill] sm:$0xff] %v8273_v61  ;;  %v4223_v61 = vadd.f32 %v4160_v33, %v4024_v44  ;;  %v8302_v33 = vpop.f32.mrf.mxu0 }
 0x2a4   : > { %v8275_v43 = vpop.f32.mrf.mxu1 }
 0x2a5   : > { %8530 = vst [vmem:[#allocation28_spill] sm:$0xff] %v8275_v43  ;;  %v4027_v43 = vadd.f32 %v8140_v55, %v8160_v45  ;;  %v4605_v39 = vadd.f32 %v8150_v47, %v4223_v61  ;;  %v4229_v55 = vadd.f32 %v6460_v50, %v8170_v19  ;;  %v5060_v61 = vadd.f32 %v8215_v49, %v4861_v12  ;;  %v8534_v12 = vld [vmem:[#allocation12_spill] sm:$0xff] }
 0x2a6   : > { %v8281_v42 = vpop.f32.mrf.mxu1  ;;  %v4233_v19 = vadd.f32 %v8231_v46, %v8184_v17  ;;  %v4609_v17 = vadd.f32 %v8164_v59, %v4227_v2 }
 0x2a7   : > { %v4226_v23 = vadd.f32 %v6457_v58, %v4027_v43  ;;  %v4859_v45 = vadd.f32 %v4796_v31, %v4605_v39  ;;  %v4230_v58 = vadd.f32 %v6461_v9, %v8176_v20  ;;  %v8317_v31 = vpop.f32.mrf.mxu0  ;;  %v4611_v20 = vadd.f32 %v8162_v1, %v4229_v55  ;;  %v8332_v1 = vld [vmem:[%s8463_s4] ss:$0 sm:$0xff] }
 0x2a8   : > { %v8286_v40 = vpop.f32.mrf.mxu1  ;;  %v4863_v5 = vadd.f32 %v4812_v38, %v4609_v17  ;;  %v4613_v38 = vadd.f32 %v8182_v15, %v4231_v32  ;;  %v8532_v15 = vld [vmem:[#allocation3_spill] sm:$0xff]  ;;  %v8541_v17 = vld [vmem:[#allocation22_spill] sm:$0xff] }
 0x2a9   : > { %v4608_v43 = vadd.f32 %v8154_v37, %v4226_v23  ;;  %v5058_v29 = vadd.f32 %v8217_v13, %v4859_v45  ;;  %v4612_v49 = vadd.f32 %v8168_v0, %v4230_v58  ;;  %v4610_v13 = vadd.f32 %v8172_v54, %v4228_v57  ;;  %v8338_v59 = vpop.f32.mrf.mxu0  ;;  %v8536_v58 = vld [vmem:[#allocation6_spill] sm:$0xff]  ;;  %v8537_v57 = vld [vmem:[#allocation20_spill] sm:$0xff] }
 0x2aa   : > { %v8293_v52 = vpop.f32.mrf.mxu1  ;;  %v4865_v10 = vadd.f32 %v6496_v21, %v4611_v20  ;;  %v4615_v0 = vadd.f32 %v8178_v51, %v4233_v19  ;;  %v5062_v39 = vadd.f32 %v8534_v12, %v4863_v5  ;;  %v8538_v4 = vld [vmem:[#allocation27_spill] sm:$0xff] }
 0x2ab   : > { %v4862_v47 = vadd.f32 %v6493_v36, %v4608_v43  ;;  %v4866_v30 = vadd.f32 %v8267_v18, %v4612_v49  ;;  %v8535_v43 = vld [vmem:[#allocation26_spill] sm:$0xff]  ;;  %v4238_v49 = vadd.f32 %v8541_v17, %v8540_v53 }
 0x2ac   : > { %v8297_v8 = vpop.f32.mrf.mxu1 }
 0x2ad   : > { %v5061_v48 = vadd.f32 %v8219_v56, %v4862_v47  ;;  %v4237_v56 = vadd.f32 %v8247_v41, %v8198_v28  ;;  %v4864_v28 = vadd.f32 %v8269_v7, %v4610_v13  ;;  %v5064_v41 = vadd.f32 %v8533_v6, %v4865_v10  ;;  %v8542_v13 = vld [vmem:[#allocation4_spill] sm:$0xff]  ;;  %v8544_v10 = vld [vmem:[#allocation14_spill] sm:$0xff] }
 0x2ae   : > { %v8304_v44 = vpop.f32.mrf.mxu1  ;;  %v4235_v47 = vadd.f32 %v8537_v57, %v8536_v58  ;;  %v4869_v7 = vadd.f32 %v8538_v4, %v4615_v0  ;;  %v8548_v6 = vld [vmem:[#allocation24_spill] sm:$0xff] }
 0x2af   : > { %v5063_v5 = vadd.f32 %v8544_v10, %v4864_v28  ;;  %v8550_v58 = vld [vmem:[#allocation16_spill] sm:$0xff] }
 0x2b0   : > { %v8310_v35 = vpop.f32.mrf.mxu1 }
 0x2b2   : > { %v6528_v37 = vpop.f32.mrf.mxu1 }
 0x2b3   : > { %v5442_v50 = vadd.f32 %v6528_v37, %v5060_v61  ;;  %v8539_v37 = vld [vmem:[#allocation13_spill] sm:$0xff] }
 0x2b4   : > { %v5377_v9 = vpop.f32.mrf.mxu1 }
 0x2b5   : > { %v5696_v34 = vadd.f32 %v6546_v24, %v5442_v50  ;;  %v5440_v46 = vadd.f32 %v5377_v9, %v5058_v29  ;;  %v5059_v24 = vadd.f32 %v8221_v14, %v4860_v16  ;;  %v8358_v14 = vpop.f32.mrf.mxu0  ;;  %v5065_v16 = vadd.f32 %v8539_v37, %v4866_v30 }
 0x2b6   : > { %v6529_v25 = vpop.f32.mrf.mxu1  ;;  %v4870_v30 = vadd.f32 %v8281_v42, %v4616_v63  ;;  %v8549_v42 = vld [vmem:[#allocation5_spill] sm:$0xff] }
 0x2b7   : > { %v5719_v11 = vadd.f32 %v8332_v1, %v5696_v34  ;;  %v5694_v36 = vadd.f32 %v8263_v22, %v5440_v46  ;;  %v5443_v54 = vadd.f32 %v6529_v25, %v5061_v48  ;;  %v4614_v22 = vadd.f32 %v8532_v15, %v4232_v27  ;;  %v6555_v9 = vpop.f32.mrf.mxu0  ;;  %v8543_v46 = vld [vmem:[#allocation29_spill] sm:$0xff] }
 0x2b8   : > { %v5380_v21 = vpop.f32.mrf.mxu1  ;;  %v4619_v34 = vadd.f32 %v8542_v13, %v4237_v56  ;;  %v4617_v63 = vadd.f32 %v8549_v42, %v4235_v47  ;;  %v8553_v13 = vld [vmem:[#allocation7_spill] sm:$0xff] }
 0x2b9   : > { %v5735_v51 = vmax.f32 %v5719_v11, 0.0  ;;  %v5717_v62 = vadd.f32 %v8332_v1, %v5694_v36  ;;  %v5697_v23 = vadd.f32 %v8265_v3, %v5443_v54  ;;  %v5441_v60 = vadd.f32 %v5380_v21, %v5059_v24  ;;  %v8545_v54 = vld [vmem:[#allocation28_spill] sm:$0xff] }
 0x2ba   : > { %v6532_v18 = vpop.f32.mrf.mxu1  ;;  %v4867_v24 = vadd.f32 %v8545_v54, %v4613_v38  ;;  %v5666_v38 = vpop.f32.mrf.mxu0 }
 0x2bb   : > { %v6258_v55 = vpack.c.bf16 %v5735_v51, %v5735_v51  ;;  %v5733_v3 = vmax.f32 %v5717_v62, 0.0  ;;  %v5720_v45 = vadd.f32 %v8332_v1, %v5697_v23  ;;  %v5695_v2 = vadd.f32 %v8535_v43, %v5441_v60  ;;  %v8546_v51 = vld [vmem:[#allocation15_spill] sm:$0xff] }
 0x2bc   : > { %v5446_v61 = vadd.f32 %v6532_v18, %v5064_v41  ;;  %v5393_v19 = vpop.f32.mrf.mxu1  ;;  %v5068_v62 = vadd.f32 %v8546_v51, %v4869_v7  ;;  %v4868_v18 = vadd.f32 %v8286_v40, %v4614_v22  ;;  %v4873_v43 = vadd.f32 %v8293_v52, %v4619_v34  ;;  %v8551_v22 = vld [vmem:[#allocation17_spill] sm:$0xff]  ;;  %v6558_v37 = vpop.f32.mrf.mxu0 }
 0x2bd   : > { %5815 = vst.msk [vmem:[%s8355_s6 + $0x8] sm:$0xf] %vm3223_vm14, %v6258_v55  ;;  %v6256_v20 = vpack.c.bf16 %v5733_v3, %v5733_v3  ;;  %v5736_v50 = vmax.f32 %v5720_v45, 0.0  ;;  %v5718_v29 = vadd.f32 %v8332_v1, %v5695_v2  ;;  %v5444_v32 = vadd.f32 %v5393_v19, %v5062_v39 }
 0x2be   : > { %v5700_v48 = vadd.f32 %v8543_v46, %v5446_v61  ;;  %v6533_v27 = vpop.f32.mrf.mxu1  ;;  %v5066_v57 = vadd.f32 %v8550_v58, %v4867_v24  ;;  %v5069_v47 = vadd.f32 %v8551_v22, %v4870_v30  ;;  %v4620_v34 = vadd.f32 %v8553_v13, %v4238_v49 }
 0x2bf   : > { %5813 = vst.msk [vmem:[%s8355_s6] sm:$0xf] %vm3223_vm14, %v6256_v20  ;;  %v6259_v0 = vpack.c.bf16 %v5736_v50, %v5736_v50  ;;  %v5734_v25 = vmax.f32 %v5718_v29, 0.0  ;;  %v5698_v11 = vadd.f32 %v8291_v26, %v5444_v32  ;;  %v5447_v36 = vadd.f32 %v6533_v27, %v5065_v16  ;;  %v8547_v26 = vld [vmem:[#allocation10_spill] sm:$0xff]  ;;  %v8555_v27 = vld [vmem:[#allocation19_spill] sm:$0xff] }
 0x2c0   : > { %v5723_v21 = vadd.f32 %v8332_v1, %v5700_v48  ;;  %v5396_v56 = vpop.f32.mrf.mxu1  ;;  %v4236_v41 = vadd.f32 %v8548_v6, %v8547_v26  ;;  %v8552_v20 = vld [vmem:[#allocation18_spill] sm:$0xff]  ;;  %v5072_v10 = vadd.f32 %v8555_v27, %v4873_v43  ;;  %v4874_v54 = vadd.f32 %v8304_v44, %v4620_v34 }
 0x2c1   : > { %5816 = vst.msk [vmem:[%s8355_s6 + $0xc] sm:$0xf] %vm3223_vm14, %v6259_v0  ;;  %v6257_v23 = vpack.c.bf16 %v5734_v25, %v5734_v25  ;;  %v5721_v60 = vadd.f32 %v8332_v1, %v5698_v11  ;;  %v5701_v28 = vadd.f32 %v8302_v33, %v5447_v36  ;;  %v5445_v15 = vadd.f32 %v5396_v56, %v5063_v5  ;;  %v5679_v36 = vpop.f32.mrf.mxu0 }
 0x2c2   : > { %v5739_v12 = vmax.f32 %v5723_v21, 0.0  ;;  %v6536_v39 = vpop.f32.mrf.mxu1  ;;  %v5067_v50 = vadd.f32 %v8552_v20, %v4868_v18  ;;  %v8556_v21 = vld [vmem:[#allocation21_spill] sm:$0xff] }
 0x2c3   : > { %5814 = vst.msk [vmem:[%s8355_s6 + $0x4] sm:$0xf] %vm3223_vm14, %v6257_v23  ;;  %v5737_v55 = vmax.f32 %v5721_v60, 0.0  ;;  %v5724_v3 = vadd.f32 %v8332_v1, %v5701_v28  ;;  %v5699_v45 = vadd.f32 %v8317_v31, %v5445_v15  ;;  %v5450_v33 = vadd.f32 %v6536_v39, %v5068_v62  ;;  %v6559_v26 = vpop.f32.mrf.mxu0 }
 0x2c4   : > { %v6262_v2 = vpack.c.bf16 %v5739_v12, %v5739_v12  ;;  %v5409_v40 = vpop.f32.mrf.mxu1  ;;  %v4871_v31 = vadd.f32 %v8297_v8, %v4617_v63  ;;  %v8558_v63 = vld [vmem:[#allocation25_spill] sm:$0xff] }
 0x2c5   : > { %v6260_v4 = vpack.c.bf16 %v5737_v55, %v5737_v55  ;;  %v5740_v7 = vmax.f32 %v5724_v3, 0.0  ;;  %v5722_v61 = vadd.f32 %v8332_v1, %v5699_v45  ;;  %v5704_v19 = vadd.f32 %v8338_v59, %v5450_v33  ;;  %v8554_v59 = vld [vmem:[#allocation9_spill] sm:$0xff] }
 0x2c6   : > { %5819 = vst.msk [vmem:[%s8355_s6 + $0x18] sm:$0xf] %vm3223_vm14, %v6262_v2  ;;  %v5448_v16 = vadd.f32 %v5409_v40, %v5066_v57  ;;  %v6537_v52 = vpop.f32.mrf.mxu1  ;;  %v4618_v46 = vadd.f32 %v8554_v59, %v4236_v41  ;;  %v8557_v41 = vld [vmem:[#allocation23_spill] sm:$0xff]  ;;  %v5682_v40 = vpop.f32.mrf.mxu0 }
 0x2c7   : > { %5817 = vst.msk [vmem:[%s8355_s6 + $0x10] sm:$0xf] %vm3223_vm14, %v6260_v4  ;;  %v6263_v29 = vpack.c.bf16 %v5740_v7, %v5740_v7  ;;  %v5738_v32 = vmax.f32 %v5722_v61, 0.0  ;;  %v5727_v53 = vadd.f32 %v8332_v1, %v5704_v19  ;;  %v5451_v17 = vadd.f32 %v6537_v52, %v5069_v47 }
 0x2c8   : > { %v5702_v8 = vadd.f32 %v8358_v14, %v5448_v16  ;;  %v5412_v48 = vpop.f32.mrf.mxu1  ;;  %v4872_v49 = vadd.f32 %v8310_v35, %v4618_v46  ;;  %v5070_v14 = vadd.f32 %v8556_v21, %v4871_v31  ;;  %v5073_v18 = vadd.f32 %v8557_v41, %v4874_v54 }
 0x2c9   : > { %5820 = vst.msk [vmem:[%s8355_s6 + $0x1c] sm:$0xf] %vm3223_vm14, %v6263_v29  ;;  %v6261_v5 = vpack.c.bf16 %v5738_v32, %v5738_v32  ;;  %v5743_v0 = vmax.f32 %v5727_v53, 0.0  ;;  %v5705_v25 = vadd.f32 %v6555_v9, %v5451_v17  ;;  %v5449_v11 = vadd.f32 %v5412_v48, %v5067_v50 }
 0x2ca   : > { %v5725_v24 = vadd.f32 %v8332_v1, %v5702_v8  ;;  %v6540_v30 = vpop.f32.mrf.mxu1 }
 0x2cb   : > { %5818 = vst.msk [vmem:[%s8355_s6 + $0x14] sm:$0xf] %vm3223_vm14, %v6261_v5  ;;  %v6266_v56 = vpack.c.bf16 %v5743_v0, %v5743_v0  ;;  %v5728_v51 = vadd.f32 %v8332_v1, %v5705_v25  ;;  %v5703_v62 = vadd.f32 %v5666_v38, %v5449_v11  ;;  %v5454_v23 = vadd.f32 %v6540_v30, %v5072_v10 }
 0x2cc   : > { %v5741_v60 = vmax.f32 %v5725_v24, 0.0  ;;  %v5425_v9 = vpop.f32.mrf.mxu1  ;;  %v5071_v38 = vadd.f32 %v8558_v63, %v4872_v49 }
 0x2cd   : > { %5823 = vst.msk [vmem:[%s8355_s6 + $0x28] sm:$0xf] %vm3223_vm14, %v6266_v56  ;;  %v5744_v44 = vmax.f32 %v5728_v51, 0.0  ;;  %v5726_v35 = vadd.f32 %v8332_v1, %v5703_v62  ;;  %v5708_v28 = vadd.f32 %v6558_v37, %v5454_v23  ;;  %v5452_v15 = vadd.f32 %v5425_v9, %v5070_v14 }
 0x2ce   : > { %v6264_v6 = vpack.c.bf16 %v5741_v60, %v5741_v60  ;;  %v6541_v42 = vpop.f32.mrf.mxu1 }
 0x2cf   : > { %v6267_v12 = vpack.c.bf16 %v5744_v44, %v5744_v44  ;;  %v5742_v39 = vmax.f32 %v5726_v35, 0.0  ;;  %v5731_v55 = vadd.f32 %v8332_v1, %v5708_v28  ;;  %v5706_v3 = vadd.f32 %v5679_v36, %v5452_v15 }
 0x2d0   : > { %5821 = vst.msk [vmem:[%s8355_s6 + $0x20] sm:$0xf] %vm3223_vm14, %v6264_v6  ;;  %v5455_v45 = vadd.f32 %v6541_v42, %v5073_v18  ;;  %v5428_v33 = vpop.f32.mrf.mxu1 }
 0x2d1   : > { %5824 = vst.msk [vmem:[%s8355_s6 + $0x2c] sm:$0xf] %vm3223_vm14, %v6267_v12  ;;  %v6265_v43 = vpack.c.bf16 %v5742_v39, %v5742_v39  ;;  %v5747_v2 = vmax.f32 %v5731_v55, 0.0  ;;  %v5729_v58 = vadd.f32 %v8332_v1, %v5706_v3  ;;  %v5453_v57 = vadd.f32 %v5428_v33, %v5071_v38 }
 0x2d2   : > { %v5709_v22 = vadd.f32 %v6559_v26, %v5455_v45 }
 0x2d3   : > { %5822 = vst.msk [vmem:[%s8355_s6 + $0x24] sm:$0xf] %vm3223_vm14, %v6265_v43  ;;  %v6270_v47 = vpack.c.bf16 %v5747_v2, %v5747_v2  ;;  %v5745_v4 = vmax.f32 %v5729_v58, 0.0  ;;  %v5707_v7 = vadd.f32 %v5682_v40, %v5453_v57 }
 0x2d4   : > { %v5732_v61 = vadd.f32 %v8332_v1, %v5709_v22 }
 0x2d5   : > { %5827 = vst.msk [vmem:[%s8355_s6 + $0x38] sm:$0xf] %vm3223_vm14, %v6270_v47  ;;  %v6268_v19 = vpack.c.bf16 %v5745_v4, %v5745_v4  ;;  %v5730_v37 = vadd.f32 %v8332_v1, %v5707_v7 }
 0x2d6   : > { %v5748_v31 = vmax.f32 %v5732_v61, 0.0 }
 0x2d7   : > { %5825 = vst.msk [vmem:[%s8355_s6 + $0x30] sm:$0xf] %vm3223_vm14, %v6268_v19  ;;  %v5746_v16 = vmax.f32 %v5730_v37, 0.0 }
 0x2d8   : > { %v6271_v52 = vpack.c.bf16 %v5748_v31, %v5748_v31 }
 0x2d9   : > { %v6269_v20 = vpack.c.bf16 %v5746_v16, %v5746_v16 }
 0x2da   : > { %5828 = vst.msk [vmem:[%s8355_s6 + $0x3c] sm:$0xf] %vm3223_vm14, %v6271_v52 }
 0x2db   : > { %5826 = vst.msk [vmem:[%s8355_s6 + $0x34] sm:$0xf] %vm3223_vm14, %v6269_v20 }
 0x2dc PF: > { %s15_s22 = sadd.s32 1, %s6684_s22   ;;  %s8559_s18 = smov %s6676_s20 }
 0x2dd   : > { %p12_p8 = scmp.ge.s32.totalorder %s15_s22, 6   ;;  %s8560_s19 = smov %s6680_s21 }
 0x2de   : > { %s8561_s20 = smov %s8564_s23  ;;  %s8562_s21 = smov %s8568_s24 }
 0x2df   :  { %14 = sbr.rel (!%p12_p8) target bundleno = 3 (0x3), region = 80 }

</bundles_post_ra>
